<compile_context>
chip_gen: v7x
topology: tpu7x:2x2x1
jax: 0.10.0
libtpu: 0.0.40
codegen_flags: <defaults>
</compile_context>

<pallas_src>
import functools
import numpy as np
import jax
import jax.numpy as jnp
from jax.experimental import pallas as pl
from jax.experimental.pallas import tpu as pltpu

# ----------------------------- synthetic model config -----------------------------
HIDDEN = 32                  # model_config.hidden_size
CONTENT_DIM = 16             # text_encoder input feature dim
NUM_SPEAKERS = 4
T_MEL = 8                    # contents_max_len
BATCH = 2

NUM_MELS = HIDDEN
UPSAMPLE_INITIAL_CHANNEL = 32
UPSAMPLE_RATES = (4, 4)
UPSAMPLE_KERNEL_SIZES = (8, 8)
RESBLOCK_KERNEL_SIZES = (3,)          # ResBlock2-style
RESBLOCK_DILATIONS = ((1, 3),)
SAMPLING_RATE = 16000
LRELU_SLOPE = 0.1
HARMONIC_NUM = 8
SINE_AMP = 0.1
NOISE_STD = 0.003
VOICED_THRESHOLD = 0.0
HOP = int(np.prod(UPSAMPLE_RATES))    # f0 nearest-upsample factor
T_AUDIO = T_MEL * HOP
NUM_UP = len(UPSAMPLE_RATES)

# static per-stage shapes
STAGE_T_IN = [T_MEL * int(np.prod(UPSAMPLE_RATES[:i])) for i in range(NUM_UP)]
STAGE_T_OUT = [t * r for t, r in zip(STAGE_T_IN, UPSAMPLE_RATES)]
NOISE_STRIDES = [int(np.prod(UPSAMPLE_RATES[i + 1:])) for i in range(NUM_UP)]
NOISE_KS = [2 * NOISE_STRIDES[i] if i + 1 < NUM_UP else 1 for i in range(NUM_UP)]


# ============================ in-kernel helper math ================================
def _silu(x):
    return x * jax.nn.sigmoid(x)


def _leaky(x, slope):
    return jnp.where(x >= 0, x, slope * x)


def _pad_rows(x, lo, hi):
    """Zero-pad a (T, C) time-major activation along the time (sublane) axis."""
    parts = []
    if lo > 0:
        parts.append(jnp.zeros((lo, x.shape[1]), x.dtype))
    parts.append(x)
    if hi > 0:
        parts.append(jnp.zeros((hi, x.shape[1]), x.dtype))
    if len(parts) == 1:
        return x
    return jnp.concatenate(parts, axis=0)


def _conv_tm(x, w_flat, b, k, dil, pad):
    """Stride-1 Conv1d on a time-major (T, Cin) block as one im2col matmul.

    w_flat: (K*Cin, Cout) with row index k*Cin + cin  (pre-laid-out at init).
    """
    t_out = x.shape[0] + 2 * pad - dil * (k - 1)
    xp = _pad_rows(x, pad, pad)
    if k == 1:
        cols = xp
    else:
        cols = jnp.concatenate(
            [xp[tap * dil: tap * dil + t_out, :] for tap in range(k)], axis=1)
    return jnp.dot(cols, w_flat, preferred_element_type=jnp.float32) + b


def _conv_transpose_tm(x, w_phases, b, perm, stride, k, pad):
    """Polyphase ConvTranspose1d on a time-major (Tin, Cin) block.

    w_phases: (stride, J*Cin, Cout), J = K//stride, phase r uses taps
              k = stride*j + (r+pad)%stride and inputs x[q + (r+pad)//stride - j].
    perm:     (stride*Tin, stride*Tin) 0/1 matrix that interleaves the phase
              outputs on the MXU: out[stride*q + r] = phase_r[q].
    """
    t_in = x.shape[0]
    J = k // stride
    offs = [(r + pad) // stride for r in range(stride)]
    lo = max(0, (J - 1) - min(offs))
    hi = max(offs)
    xp = _pad_rows(x, lo, hi)
    outs = []
    for r in range(stride):
        o_r = offs[r]
        if J == 1:
            cols = xp[lo + o_r: lo + o_r + t_in, :]
        else:
            cols = jnp.concatenate(
                [xp[lo + o_r - j: lo + o_r - j + t_in, :] for j in range(J)], axis=1)
        outs.append(jnp.dot(cols, w_phases[r], preferred_element_type=jnp.float32) + b)
    stacked = jnp.concatenate(outs, axis=0)                 # (stride*Tin, Cout), phase-major
    return jnp.dot(perm, stacked, preferred_element_type=jnp.float32)


# ================================ fused kernel =====================================
def _fused_kernel(*refs):
    """Whole HiFiSinger forward for one batch element (grid=(B,), "parallel")."""
    it = iter(refs)
    cont_ref = next(it)                                     # (1, T_mel, Din)
    spk_ref = next(it)                                      # (1, 1, H)
    mask_ref = next(it)                                     # (1, T_mel, 1)
    harc_refs = [next(it) for _ in range(NUM_UP)]           # strided im2col of harmonic src

    tw, tb = next(it)[...], next(it)[...]
    f1w, f1b = next(it)[...], next(it)[...]
    f2w, f2b = next(it)[...], next(it)[...]
    prew, preb = next(it)[...], next(it)[...]
    stages = []
    for _i in range(NUM_UP):
        upw = next(it)[...]
        upb = next(it)[...]
        perm = next(it)[...]
        nw = next(it)[...]
        nb = next(it)[...]
        res = []
        for j in range(len(RESBLOCK_KERNEL_SIZES)):
            cl = []
            for _d in RESBLOCK_DILATIONS[j]:
                rw = next(it)[...]
                rb = next(it)[...]
                cl.append((rw, rb))
            res.append(cl)
        stages.append((upw, upb, perm, nw, nb, res))
    postw, postb = next(it)[...], next(it)[...]
    out_ref = next(it)

    # ---- feature path: text-encoder Linear + speaker add + feature_fuser + mask ----
    x = jnp.dot(cont_ref[0], tw, preferred_element_type=jnp.float32) + tb
    x = x + spk_ref[0]                                      # (1, H) broadcast over time
    x = _silu(jnp.dot(x, f1w, preferred_element_type=jnp.float32) + f1b)
    x = _silu(jnp.dot(x, f2w, preferred_element_type=jnp.float32) + f2b)
    x = x * mask_ref[0]                                     # zero padded frames; (T_mel, H)

    # ---- NSF-HiFiGAN Generator (time-major (T, C) blocks) ----
    x = _conv_tm(x, prew, preb, 7, 1, 3)                    # conv_pre
    for i in range(NUM_UP):
        upw, upb, perm, nw, nb, res = stages[i]
        ur, uk = UPSAMPLE_RATES[i], UPSAMPLE_KERNEL_SIZES[i]
        x = _leaky(x, LRELU_SLOPE)
        x = _conv_transpose_tm(x, upw, upb, perm, ur, uk, (uk - ur) // 2)
        hc = harc_refs[i][0]                                # (T_stage, K_noise)
        if nw.shape[0] == 1:                                # last stage: 1x1 "conv"
            x_src = hc * nw + nb
        else:                                               # strided conv, pre-decimated cols
            x_src = jnp.dot(hc, nw, preferred_element_type=jnp.float32) + nb
        x = x + x_src
        xs = None
        for j, ksz in enumerate(RESBLOCK_KERNEL_SIZES):
            r = x
            for (rw, rb), d in zip(res[j], RESBLOCK_DILATIONS[j]):
                xt = _leaky(r, LRELU_SLOPE)
                xt = _conv_tm(xt, rw, rb, ksz, d, (ksz * d - d) // 2)
                r = xt + r
            xs = r if xs is None else xs + r
        x = xs * (1.0 / len(RESBLOCK_KERNEL_SIZES))
    x = _leaky(x, 0.01)                                     # F.leaky_relu default slope
    x = _conv_tm(x, postw, postb, 7, 1, 3)                  # conv_post -> (T_audio, 1)
    out_ref[0] = jnp.tanh(x)


def _fused_pallas_call(weights, contents, spk_emb, mask_keep, har_cols):
    B = contents.shape[0]
    data = [contents, spk_emb, mask_keep] + list(har_cols)
    in_specs = [pl.BlockSpec((1,) + a.shape[1:], lambda b: (b, 0, 0)) for a in data]
    in_specs += [pl.BlockSpec(w.shape, lambda b, nd=w.ndim: (0,) * nd) for w in weights]
    return pl.pallas_call(
        _fused_kernel,
        grid=(B,),
        in_specs=in_specs,
        out_specs=pl.BlockSpec((1, T_AUDIO, 1), lambda b: (b, 0, 0)),
        out_shape=jax.ShapeDtypeStruct((B, T_AUDIO, 1), jnp.float32),
        compiler_params=pltpu.CompilerParams(dimension_semantics=("parallel",)),
    )(*data, *weights)


# ============================== plain-JAX glue =====================================
def sine_source(f0, p, key):
    """SourceModuleHnNSF + SineGen harmonic source.  f0: (B, T_audio, 1).
    TODO(synk): SineGen uses torch RNG for initial phase / noise; replaced by JAX keys."""
    B, T, _ = f0.shape
    dim = HARMONIC_NUM + 1
    fn = f0 * jnp.arange(1, dim + 1, dtype=jnp.float32)[None, None, :]
    rad = (fn / SAMPLING_RATE) % 1.0
    k1, k2 = jax.random.split(key)
    rand_ini = jax.random.uniform(k1, (B, dim), dtype=jnp.float32)
    rand_ini = rand_ini.at[:, 0].set(0.0)
    rad = rad.at[:, 0, :].add(rand_ini)
    tmp_over_one = jnp.cumsum(rad, axis=1) % 1.0
    over_idx = (tmp_over_one[:, 1:, :] - tmp_over_one[:, :-1, :]) < 0.0
    cumsum_shift = jnp.zeros_like(rad)
    cumsum_shift = cumsum_shift.at[:, 1:, :].set(jnp.where(over_idx, -1.0, 0.0))
    sines = jnp.sin(jnp.cumsum(rad + cumsum_shift, axis=1) * 2.0 * jnp.pi) * SINE_AMP
    uv = (f0 > VOICED_THRESHOLD).astype(jnp.float32)
    noise_amp = uv * NOISE_STD + (1.0 - uv) * SINE_AMP / 3.0
    noise = noise_amp * jax.random.normal(k2, sines.shape, dtype=jnp.float32)
    sine_waves = sines * uv + noise
    merged = jnp.einsum("bti,io->bto", sine_waves, p["src_w"],
                        precision=jax.lax.Precision.HIGHEST) + p["src_b"]
    return jnp.tanh(merged)                                  # (B, T_audio, 1)


def _build_har_cols(har):
    """Strided im2col of the harmonic source for each noise conv (decimate before conv)."""
    B = har.shape[0]
    cols = []
    for i in range(NUM_UP):
        k = NOISE_KS[i]
        if k == 1:
            cols.append(har)                                 # (B, T_audio, 1)
        else:
            s = NOISE_STRIDES[i]
            pad = s // 2
            t_out = STAGE_T_OUT[i]
            h = har[:, :, 0]
            hp = jnp.concatenate([jnp.zeros((B, pad), h.dtype), h,
                                  jnp.zeros((B, pad), h.dtype)], axis=1)
            idx = s * np.arange(t_out)[:, None] + np.arange(k)[None, :]
            cols.append(hp[:, idx])                          # (B, t_out, k)
    return cols


@functools.partial(jax.jit, static_argnames=("contents_max_len",))
def hifisinger_forward(prep, speakers, contents, contents_lens, contents_max_len,
                       pitches, key):
    """HiFiSinger.forward. contents: (B,T,Din); speakers: (B,) int; pitches: (B,T,1)."""
    ids = jnp.arange(contents_max_len)[None, :]
    src_masks = ids >= contents_lens[:, None]                # True = padding
    mask_keep = (1.0 - src_masks.astype(jnp.float32))[:, :, None]
    spk_emb = prep["spk_table"][speakers][:, None, :]        # (B, 1, H)
    # TODO(synk): optional pitch_shift / energy / phones2mel branches omitted (not in config).
    f0_up = jnp.repeat(pitches[:, :, 0], HOP, axis=-1)[:, :, None]
    har = sine_source(f0_up, prep, key)                      # (B, T_audio, 1)
    har_cols = _build_har_cols(har)
    out = _fused_pallas_call(prep["kernel_weights"], contents, spk_emb, mask_keep, har_cols)
    return jnp.transpose(out, (0, 2, 1))                     # (B, 1, T_audio)


# ======================= one-time parameter layout conversion =====================
def _conv_w_flat(w):
    """PyTorch Conv1d weight (Cout, Cin, K) -> im2col layout (K*Cin, Cout)."""
    cout, cin, k = w.shape
    return jnp.transpose(w, (2, 1, 0)).reshape(k * cin, cout)


def _convT_phase_w(w, stride, pad):
    """PyTorch ConvTranspose1d weight (Cin, Cout, K) -> polyphase (stride, J*Cin, Cout)."""
    cin, cout, k = w.shape
    assert k % stride == 0
    J = k // stride
    phases = []
    for r in range(stride):
        rho = (r + pad) % stride
        taps = [w[:, :, stride * j + rho] for j in range(J)]  # each (Cin, Cout)
        phases.append(jnp.concatenate(taps, axis=0))           # (J*Cin, Cout)
    return jnp.stack(phases, axis=0)


def _interleave_perm(t_in, stride):
    """0/1 matrix P with (P @ phase_major)[stride*q + r] = phase_r[q]."""
    t_out = t_in * stride
    P = np.zeros((t_out, t_out), np.float32)
    n = np.arange(t_out)
    P[n, (n % stride) * t_in + (n // stride)] = 1.0
    return jnp.asarray(P)


def prepare_params(p):
    """Hoisted out of the forward: all weight reshapes/flips/flattenings done once."""
    w = [p["text_w"], p["text_b"], p["fuse1_w"], p["fuse1_b"],
         p["fuse2_w"], p["fuse2_b"],
         _conv_w_flat(p["conv_pre_w"]), p["conv_pre_b"].reshape(1, -1)]
    for i in range(NUM_UP):
        ur, uk = UPSAMPLE_RATES[i], UPSAMPLE_KERNEL_SIZES[i]
        w += [_convT_phase_w(p[f"up{i}_w"], ur, (uk - ur) // 2),
              p[f"up{i}_b"].reshape(1, -1),
              _interleave_perm(STAGE_T_IN[i], ur),
              jnp.transpose(p[f"noise{i}_w"][:, 0, :]),       # (K, Cout)
              p[f"noise{i}_b"].reshape(1, -1)]
        for j, _ksz in enumerate(RESBLOCK_KERNEL_SIZES):
            for d_idx, _d in enumerate(RESBLOCK_DILATIONS[j]):
                w += [_conv_w_flat(p[f"res{i}_{j}_{d_idx}_w"]),
                      p[f"res{i}_{j}_{d_idx}_b"].reshape(1, -1)]
    w += [_conv_w_flat(p["conv_post_w"]), p["conv_post_b"].reshape(1, 1)]
    return {"kernel_weights": [jnp.asarray(a, jnp.float32) for a in w],
            "spk_table": p["spk_table"], "src_w": p["src_w"], "src_b": p["src_b"]}


# ================================ parameter init ===================================
def init_linear(key, din, dout, scale=0.1):
    kw, kb = jax.random.split(key)
    return (jax.random.normal(kw, (din, dout), jnp.float32) * scale,
            jax.random.normal(kb, (1, dout), jnp.float32) * 0.01)


def init_conv(key, cout, cin, k, scale=0.1):
    kw, kb = jax.random.split(key)
    return (jax.random.normal(kw, (cout, cin, k), jnp.float32) * scale,
            jax.random.normal(kb, (cout,), jnp.float32) * 0.01)


def init_params(key):
    keys = jax.random.split(key, 64)
    ki = iter(keys)
    p = {}
    p["text_w"], p["text_b"] = init_linear(next(ki), CONTENT_DIM, HIDDEN)
    p["spk_table"] = jax.random.normal(next(ki), (NUM_SPEAKERS, HIDDEN), jnp.float32) * 0.1
    p["fuse1_w"], p["fuse1_b"] = init_linear(next(ki), HIDDEN, HIDDEN)
    p["fuse2_w"], p["fuse2_b"] = init_linear(next(ki), HIDDEN, HIDDEN)
    p["src_w"] = jax.random.normal(next(ki), (HARMONIC_NUM + 1, 1), jnp.float32) * 0.1
    p["src_b"] = jnp.zeros((1,), jnp.float32)
    p["conv_pre_w"], p["conv_pre_b"] = init_conv(next(ki), UPSAMPLE_INITIAL_CHANNEL, NUM_MELS, 7)
    ch = UPSAMPLE_INITIAL_CHANNEL
    for i, (ur, uk) in enumerate(zip(UPSAMPLE_RATES, UPSAMPLE_KERNEL_SIZES)):
        c_cur = UPSAMPLE_INITIAL_CHANNEL // (2 ** (i + 1))
        kw, kb = jax.random.split(next(ki))
        p[f"up{i}_w"] = jax.random.normal(kw, (ch, c_cur, uk), jnp.float32) * 0.1   # ConvT layout
        p[f"up{i}_b"] = jax.random.normal(kb, (c_cur,), jnp.float32) * 0.01
        if i + 1 < NUM_UP:
            s_f0 = int(np.prod(UPSAMPLE_RATES[i + 1:]))
            p[f"noise{i}_w"], p[f"noise{i}_b"] = init_conv(next(ki), c_cur, 1, s_f0 * 2)
        else:
            p[f"noise{i}_w"], p[f"noise{i}_b"] = init_conv(next(ki), c_cur, 1, 1)
        for j, k_sz in enumerate(RESBLOCK_KERNEL_SIZES):
            for d_idx, _ in enumerate(RESBLOCK_DILATIONS[j]):
                p[f"res{i}_{j}_{d_idx}_w"], p[f"res{i}_{j}_{d_idx}_b"] = \
                    init_conv(next(ki), c_cur, c_cur, k_sz)
        ch = c_cur
    p["conv_post_w"], p["conv_post_b"] = init_conv(next(ki), 1, ch, 7)
    return p


# ========================= pure-JAX reference (for checking) ======================
def _ref_conv1d(x, w, b, stride=1, padding=0, dilation=1):
    B, Cin, T = x.shape
    Cout, _, K = w.shape
    xp = jnp.pad(x, ((0, 0), (0, 0), (padding, padding)))
    t_out = T + 2 * padding - dilation * (K - 1)
    acc = jnp.zeros((B, Cout, t_out), jnp.float32)
    for k in range(K):
        xs = xp[:, :, k * dilation:k * dilation + t_out]
        acc = acc + jnp.einsum("oc,bct->bot", w[:, :, k], xs)
    out = acc + b[None, :, None]
    if stride > 1:
        out = out[:, :, ::stride]
    return out


def _ref_conv_transpose1d(x, w, b, stride, padding):
    B, Cin, T = x.shape
    _, Cout, K = w.shape
    xu = jnp.zeros((B, Cin, (T - 1) * stride + 1), x.dtype).at[:, :, ::stride].set(x)
    wc = jnp.flip(jnp.transpose(w, (1, 0, 2)), axis=-1)
    return _ref_conv1d(xu, wc, b, padding=K - 1 - padding)


def reference_forward(params, speakers, contents, contents_lens, contents_max_len,
                      pitches, key):
    ids = jnp.arange(contents_max_len)[None, :]
    src_masks = ids >= contents_lens[:, None]
    mask_keep = (1.0 - src_masks.astype(jnp.float32))[:, :, None]
    spk = params["spk_table"][speakers][:, None, :]
    h = contents @ params["text_w"] + params["text_b"]
    h = h + spk
    h = jax.nn.silu(h @ params["fuse1_w"] + params["fuse1_b"])
    h = jax.nn.silu(h @ params["fuse2_w"] + params["fuse2_b"])
    x = jnp.transpose(h * mask_keep, (0, 2, 1))
    f0_up = jnp.repeat(pitches[:, :, 0], HOP, axis=-1)[:, :, None]
    har = jnp.transpose(sine_source(f0_up, params, key), (0, 2, 1))
    x = _ref_conv1d(x, params["conv_pre_w"], params["conv_pre_b"], padding=3)
    for i in range(NUM_UP):
        ur, uk = UPSAMPLE_RATES[i], UPSAMPLE_KERNEL_SIZES[i]
        x = jnp.where(x >= 0, x, LRELU_SLOPE * x)
        x = _ref_conv_transpose1d(x, params[f"up{i}_w"], params[f"up{i}_b"],
                                  stride=ur, padding=(uk - ur) // 2)
        if i + 1 < NUM_UP:
            s = int(np.prod(UPSAMPLE_RATES[i + 1:]))
            x_src = _ref_conv1d(har, params[f"noise{i}_w"], params[f"noise{i}_b"],
                                stride=s, padding=s // 2)
        else:
            x_src = _ref_conv1d(har, params[f"noise{i}_w"], params[f"noise{i}_b"])
        x = x + x_src
        xs = None
        for j, k_sz in enumerate(RESBLOCK_KERNEL_SIZES):
            r = x
            for d_idx, d in enumerate(RESBLOCK_DILATIONS[j]):
                rt = jnp.where(r >= 0, r, LRELU_SLOPE * r)
                rt = _ref_conv1d(rt, params[f"res{i}_{j}_{d_idx}_w"],
                                 params[f"res{i}_{j}_{d_idx}_b"],
                                 padding=(k_sz * d - d) // 2, dilation=d)
                r = rt + r
            xs = r if xs is None else xs + r
        x = xs / float(len(RESBLOCK_KERNEL_SIZES))
    x = jnp.where(x >= 0, x, 0.01 * x)
    x = _ref_conv1d(x, params["conv_post_w"], params["conv_post_b"], padding=3)
    return jnp.tanh(x)


# ===================================== main ========================================
if __name__ == "__main__":
    root = jax.random.PRNGKey(0)
    k_param, k_cont, k_pitch, k_src = jax.random.split(root, 4)

    params = init_params(k_param)
    prep = prepare_params(params)          # one-time weight layout conversion

    speakers = jnp.array([0, 3], dtype=jnp.int32)
    contents = jax.random.normal(k_cont, (BATCH, T_MEL, CONTENT_DIM), jnp.float32)
    contents_lens = jnp.array([T_MEL, T_MEL - 2], dtype=jnp.int32)
    pitches = jax.random.uniform(k_pitch, (BATCH, T_MEL, 1), jnp.float32,
                                 minval=100.0, maxval=400.0)
    pitches = pitches.at[1, -2:, :].set(0.0)   # a couple of unvoiced frames

    audio = hifisinger_forward(prep, speakers, contents, contents_lens,
                               contents_max_len=T_MEL, pitches=pitches, key=k_src)
    jax.block_until_ready(audio)
    assert audio.shape == (BATCH, 1, T_AUDIO), audio.shape
    assert bool(jnp.all(jnp.isfinite(audio)))

    # numerical check against a straightforward full-precision JAX reference
    with jax.default_matmul_precision("highest"):
        ref = reference_forward(params, speakers, contents, contents_lens, T_MEL,
                                pitches, k_src)
    err = float(jnp.max(jnp.abs(audio - ref)))
    assert err < 5e-3, f"max abs diff vs reference = {err}"

    print("KERNEL_OK")
</pallas_src>

<mosaic_0001>
module attributes {stable_mosaic.version = 11 : i64} {
  func.func @_fused_kernel(%arg0: i32, %arg1: memref<1x8x16xf32, #tpu.memory_space<vmem>>, %arg2: memref<1x1x32xf32, #tpu.memory_space<vmem>>, %arg3: memref<1x8x1xf32, #tpu.memory_space<vmem>>, %arg4: memref<1x32x8xf32, #tpu.memory_space<vmem>>, %arg5: memref<1x128x1xf32, #tpu.memory_space<vmem>>, %arg6: memref<16x32xf32, #tpu.memory_space<vmem>>, %arg7: memref<1x32xf32, #tpu.memory_space<vmem>>, %arg8: memref<32x32xf32, #tpu.memory_space<vmem>>, %arg9: memref<1x32xf32, #tpu.memory_space<vmem>>, %arg10: memref<32x32xf32, #tpu.memory_space<vmem>>, %arg11: memref<1x32xf32, #tpu.memory_space<vmem>>, %arg12: memref<224x32xf32, #tpu.memory_space<vmem>>, %arg13: memref<1x32xf32, #tpu.memory_space<vmem>>, %arg14: memref<4x64x16xf32, #tpu.memory_space<vmem>>, %arg15: memref<1x16xf32, #tpu.memory_space<vmem>>, %arg16: memref<32x32xf32, #tpu.memory_space<vmem>>, %arg17: memref<8x16xf32, #tpu.memory_space<vmem>>, %arg18: memref<1x16xf32, #tpu.memory_space<vmem>>, %arg19: memref<48x16xf32, #tpu.memory_space<vmem>>, %arg20: memref<1x16xf32, #tpu.memory_space<vmem>>, %arg21: memref<48x16xf32, #tpu.memory_space<vmem>>, %arg22: memref<1x16xf32, #tpu.memory_space<vmem>>, %arg23: memref<4x32x8xf32, #tpu.memory_space<vmem>>, %arg24: memref<1x8xf32, #tpu.memory_space<vmem>>, %arg25: memref<128x128xf32, #tpu.memory_space<vmem>>, %arg26: memref<1x8xf32, #tpu.memory_space<vmem>>, %arg27: memref<1x8xf32, #tpu.memory_space<vmem>>, %arg28: memref<24x8xf32, #tpu.memory_space<vmem>>, %arg29: memref<1x8xf32, #tpu.memory_space<vmem>>, %arg30: memref<24x8xf32, #tpu.memory_space<vmem>>, %arg31: memref<1x8xf32, #tpu.memory_space<vmem>>, %arg32: memref<56x1xf32, #tpu.memory_space<vmem>>, %arg33: memref<1x1xf32, #tpu.memory_space<vmem>>, %arg34: memref<1x128x1xf32, #tpu.memory_space<vmem>>) attributes {dimension_semantics = [#tpu.dimension_semantics<parallel>], iteration_bounds = array<i64: 2>, scalar_prefetch = 0 : i64, scratch_operands = 0 : i64, tpu.core_type = #tpu.core_type<tc>, window_params = [{transform_indices = @transform_0, window_bounds = array<i64: 1, 8, 16>}, {transform_indices = @transform_1, window_bounds = array<i64: 1, 1, 32>}, {transform_indices = @transform_2, window_bounds = array<i64: 1, 8, 1>}, {transform_indices = @transform_3, window_bounds = array<i64: 1, 32, 8>}, {transform_indices = @transform_4, window_bounds = array<i64: 1, 128, 1>}, {pipeline_mode = #tpu.pipeline_mode<synchronous>, transform_indices = @transform_5, window_bounds = array<i64: 16, 32>}, {pipeline_mode = #tpu.pipeline_mode<synchronous>, transform_indices = @transform_6, window_bounds = array<i64: 1, 32>}, {pipeline_mode = #tpu.pipeline_mode<synchronous>, transform_indices = @transform_7, window_bounds = array<i64: 32, 32>}, {pipeline_mode = #tpu.pipeline_mode<synchronous>, transform_indices = @transform_8, window_bounds = array<i64: 1, 32>}, {pipeline_mode = #tpu.pipeline_mode<synchronous>, transform_indices = @transform_9, window_bounds = array<i64: 32, 32>}, {pipeline_mode = #tpu.pipeline_mode<synchronous>, transform_indices = @transform_10, window_bounds = array<i64: 1, 32>}, {pipeline_mode = #tpu.pipeline_mode<synchronous>, transform_indices = @transform_11, window_bounds = array<i64: 224, 32>}, {pipeline_mode = #tpu.pipeline_mode<synchronous>, transform_indices = @transform_12, window_bounds = array<i64: 1, 32>}, {pipeline_mode = #tpu.pipeline_mode<synchronous>, transform_indices = @transform_13, window_bounds = array<i64: 4, 64, 16>}, {pipeline_mode = #tpu.pipeline_mode<synchronous>, transform_indices = @transform_14, window_bounds = array<i64: 1, 16>}, {pipeline_mode = #tpu.pipeline_mode<synchronous>, transform_indices = @transform_15, window_bounds = array<i64: 32, 32>}, {pipeline_mode = #tpu.pipeline_mode<synchronous>, transform_indices = @transform_16, window_bounds = array<i64: 8, 16>}, {pipeline_mode = #tpu.pipeline_mode<synchronous>, transform_indices = @transform_17, window_bounds = array<i64: 1, 16>}, {pipeline_mode = #tpu.pipeline_mode<synchronous>, transform_indices = @transform_18, window_bounds = array<i64: 48, 16>}, {pipeline_mode = #tpu.pipeline_mode<synchronous>, transform_indices = @transform_19, window_bounds = array<i64: 1, 16>}, {pipeline_mode = #tpu.pipeline_mode<synchronous>, transform_indices = @transform_20, window_bounds = array<i64: 48, 16>}, {pipeline_mode = #tpu.pipeline_mode<synchronous>, transform_indices = @transform_21, window_bounds = array<i64: 1, 16>}, {pipeline_mode = #tpu.pipeline_mode<synchronous>, transform_indices = @transform_22, window_bounds = array<i64: 4, 32, 8>}, {pipeline_mode = #tpu.pipeline_mode<synchronous>, transform_indices = @transform_23, window_bounds = array<i64: 1, 8>}, {pipeline_mode = #tpu.pipeline_mode<synchronous>, transform_indices = @transform_24, window_bounds = array<i64: 128, 128>}, {pipeline_mode = #tpu.pipeline_mode<synchronous>, transform_indices = @transform_25, window_bounds = array<i64: 1, 8>}, {pipeline_mode = #tpu.pipeline_mode<synchronous>, transform_indices = @transform_26, window_bounds = array<i64: 1, 8>}, {pipeline_mode = #tpu.pipeline_mode<synchronous>, transform_indices = @transform_27, window_bounds = array<i64: 24, 8>}, {pipeline_mode = #tpu.pipeline_mode<synchronous>, transform_indices = @transform_28, window_bounds = array<i64: 1, 8>}, {pipeline_mode = #tpu.pipeline_mode<synchronous>, transform_indices = @transform_29, window_bounds = array<i64: 24, 8>}, {pipeline_mode = #tpu.pipeline_mode<synchronous>, transform_indices = @transform_30, window_bounds = array<i64: 1, 8>}, {pipeline_mode = #tpu.pipeline_mode<synchronous>, transform_indices = @transform_31, window_bounds = array<i64: 56, 1>}, {pipeline_mode = #tpu.pipeline_mode<synchronous>, transform_indices = @transform_32, window_bounds = array<i64: 1, 1>}, {transform_indices = @transform_33, window_bounds = array<i64: 1, 128, 1>}]} {
    %c0 = arith.constant 0 : index
    %c0_0 = arith.constant 0 : index
    %0 = vector.load %arg6[%c0, %c0_0] : memref<16x32xf32, #tpu.memory_space<vmem>>, vector<16x32xf32>
    %c0_1 = arith.constant 0 : index
    %c0_2 = arith.constant 0 : index
    %1 = vector.load %arg7[%c0_1, %c0_2] : memref<1x32xf32, #tpu.memory_space<vmem>>, vector<1x32xf32>
    %c0_3 = arith.constant 0 : index
    %c0_4 = arith.constant 0 : index
    %2 = vector.load %arg8[%c0_3, %c0_4] : memref<32x32xf32, #tpu.memory_space<vmem>>, vector<32x32xf32>
    %c0_5 = arith.constant 0 : index
    %c0_6 = arith.constant 0 : index
    %3 = vector.load %arg9[%c0_5, %c0_6] : memref<1x32xf32, #tpu.memory_space<vmem>>, vector<1x32xf32>
    %c0_7 = arith.constant 0 : index
    %c0_8 = arith.constant 0 : index
    %4 = vector.load %arg10[%c0_7, %c0_8] : memref<32x32xf32, #tpu.memory_space<vmem>>, vector<32x32xf32>
    %c0_9 = arith.constant 0 : index
    %c0_10 = arith.constant 0 : index
    %5 = vector.load %arg11[%c0_9, %c0_10] : memref<1x32xf32, #tpu.memory_space<vmem>>, vector<1x32xf32>
    %c0_11 = arith.constant 0 : index
    %c0_12 = arith.constant 0 : index
    %6 = vector.load %arg12[%c0_11, %c0_12] : memref<224x32xf32, #tpu.memory_space<vmem>>, vector<224x32xf32>
    %c0_13 = arith.constant 0 : index
    %c0_14 = arith.constant 0 : index
    %7 = vector.load %arg13[%c0_13, %c0_14] : memref<1x32xf32, #tpu.memory_space<vmem>>, vector<1x32xf32>
    %c0_15 = arith.constant 0 : index
    %c0_16 = arith.constant 0 : index
    %c0_17 = arith.constant 0 : index
    %8 = vector.load %arg14[%c0_15, %c0_16, %c0_17] : memref<4x64x16xf32, #tpu.memory_space<vmem>>, vector<4x64x16xf32>
    %c0_18 = arith.constant 0 : index
    %c0_19 = arith.constant 0 : index
    %9 = vector.load %arg15[%c0_18, %c0_19] : memref<1x16xf32, #tpu.memory_space<vmem>>, vector<1x16xf32>
    %c0_20 = arith.constant 0 : index
    %c0_21 = arith.constant 0 : index
    %10 = vector.load %arg16[%c0_20, %c0_21] : memref<32x32xf32, #tpu.memory_space<vmem>>, vector<32x32xf32>
    %c0_22 = arith.constant 0 : index
    %c0_23 = arith.constant 0 : index
    %11 = vector.load %arg17[%c0_22, %c0_23] : memref<8x16xf32, #tpu.memory_space<vmem>>, vector<8x16xf32>
    %c0_24 = arith.constant 0 : index
    %c0_25 = arith.constant 0 : index
    %12 = vector.load %arg18[%c0_24, %c0_25] : memref<1x16xf32, #tpu.memory_space<vmem>>, vector<1x16xf32>
    %c0_26 = arith.constant 0 : index
    %c0_27 = arith.constant 0 : index
    %13 = vector.load %arg19[%c0_26, %c0_27] : memref<48x16xf32, #tpu.memory_space<vmem>>, vector<48x16xf32>
    %c0_28 = arith.constant 0 : index
    %c0_29 = arith.constant 0 : index
    %14 = vector.load %arg20[%c0_28, %c0_29] : memref<1x16xf32, #tpu.memory_space<vmem>>, vector<1x16xf32>
    %c0_30 = arith.constant 0 : index
    %c0_31 = arith.constant 0 : index
    %15 = vector.load %arg21[%c0_30, %c0_31] : memref<48x16xf32, #tpu.memory_space<vmem>>, vector<48x16xf32>
    %c0_32 = arith.constant 0 : index
    %c0_33 = arith.constant 0 : index
    %16 = vector.load %arg22[%c0_32, %c0_33] : memref<1x16xf32, #tpu.memory_space<vmem>>, vector<1x16xf32>
    %c0_34 = arith.constant 0 : index
    %c0_35 = arith.constant 0 : index
    %c0_36 = arith.constant 0 : index
    %17 = vector.load %arg23[%c0_34, %c0_35, %c0_36] : memref<4x32x8xf32, #tpu.memory_space<vmem>>, vector<4x32x8xf32>
    %c0_37 = arith.constant 0 : index
    %c0_38 = arith.constant 0 : index
    %18 = vector.load %arg24[%c0_37, %c0_38] : memref<1x8xf32, #tpu.memory_space<vmem>>, vector<1x8xf32>
    %c0_39 = arith.constant 0 : index
    %c0_40 = arith.constant 0 : index
    %19 = vector.load %arg25[%c0_39, %c0_40] : memref<128x128xf32, #tpu.memory_space<vmem>>, vector<128x128xf32>
    %c0_41 = arith.constant 0 : index
    %c0_42 = arith.constant 0 : index
    %20 = vector.load %arg26[%c0_41, %c0_42] : memref<1x8xf32, #tpu.memory_space<vmem>>, vector<1x8xf32>
    %c0_43 = arith.constant 0 : index
    %c0_44 = arith.constant 0 : index
    %21 = vector.load %arg27[%c0_43, %c0_44] : memref<1x8xf32, #tpu.memory_space<vmem>>, vector<1x8xf32>
    %c0_45 = arith.constant 0 : index
    %c0_46 = arith.constant 0 : index
    %22 = vector.load %arg28[%c0_45, %c0_46] : memref<24x8xf32, #tpu.memory_space<vmem>>, vector<24x8xf32>
    %c0_47 = arith.constant 0 : index
    %c0_48 = arith.constant 0 : index
    %23 = vector.load %arg29[%c0_47, %c0_48] : memref<1x8xf32, #tpu.memory_space<vmem>>, vector<1x8xf32>
    %c0_49 = arith.constant 0 : index
    %c0_50 = arith.constant 0 : index
    %24 = vector.load %arg30[%c0_49, %c0_50] : memref<24x8xf32, #tpu.memory_space<vmem>>, vector<24x8xf32>
    %c0_51 = arith.constant 0 : index
    %c0_52 = arith.constant 0 : index
    %25 = vector.load %arg31[%c0_51, %c0_52] : memref<1x8xf32, #tpu.memory_space<vmem>>, vector<1x8xf32>
    %c0_53 = arith.constant 0 : index
    %c0_54 = arith.constant 0 : index
    %26 = vector.load %arg32[%c0_53, %c0_54] : memref<56x1xf32, #tpu.memory_space<vmem>>, vector<56x1xf32>
    %c0_55 = arith.constant 0 : index
    %c0_56 = arith.constant 0 : index
    %27 = vector.load %arg33[%c0_55, %c0_56] : memref<1x1xf32, #tpu.memory_space<vmem>>, vector<1x1xf32>
    %c0_57 = arith.constant 0 : index
    %c0_58 = arith.constant 0 : index
    %c0_59 = arith.constant 0 : index
    %28 = vector.load %arg1[%c0_57, %c0_58, %c0_59] : memref<1x8x16xf32, #tpu.memory_space<vmem>>, vector<1x8x16xf32>
    %29 = vector.shape_cast %28 : vector<1x8x16xf32> to vector<8x16xf32>
    %cst = arith.constant dense<0.000000e+00> : vector<8x32xf32>
    %30 = tpu.matmul %29, %0, %cst {dimension_numbers = #tpu.dot_dimension_numbers<[1], [0], [0], [1], [0, 0, 1, 1], [], []>} : vector<8x16xf32>, vector<16x32xf32>, vector<8x32xf32> -> vector<8x32xf32>
    %31 = vector.broadcast %1 : vector<1x32xf32> to vector<8x32xf32>
    %32 = arith.addf %30, %31 : vector<8x32xf32>
    %c0_60 = arith.constant 0 : index
    %c0_61 = arith.constant 0 : index
    %c0_62 = arith.constant 0 : index
    %33 = vector.load %arg2[%c0_60, %c0_61, %c0_62] : memref<1x1x32xf32, #tpu.memory_space<vmem>>, vector<1x1x32xf32>
    %34 = vector.shape_cast %33 : vector<1x1x32xf32> to vector<1x32xf32>
    %35 = vector.broadcast %34 : vector<1x32xf32> to vector<8x32xf32>
    %36 = arith.addf %32, %35 : vector<8x32xf32>
    %cst_63 = arith.constant dense<0.000000e+00> : vector<8x32xf32>
    %37 = tpu.matmul %36, %2, %cst_63 {dimension_numbers = #tpu.dot_dimension_numbers<[1], [0], [0], [1], [0, 0, 1, 1], [], []>} : vector<8x32xf32>, vector<32x32xf32>, vector<8x32xf32> -> vector<8x32xf32>
    %38 = vector.broadcast %3 : vector<1x32xf32> to vector<8x32xf32>
    %39 = arith.addf %37, %38 : vector<8x32xf32>
    %40 = arith.negf %39 : vector<8x32xf32>
    %41 = math.exp %40 : vector<8x32xf32>
    %cst_64 = arith.constant 1.000000e+00 : f32
    %42 = vector.broadcast %cst_64 : f32 to vector<8x32xf32>
    %43 = arith.addf %42, %41 : vector<8x32xf32>
    %44 = arith.divf %42, %43 : vector<8x32xf32>
    %45 = arith.mulf %39, %44 : vector<8x32xf32>
    %cst_65 = arith.constant dense<0.000000e+00> : vector<8x32xf32>
    %46 = tpu.matmul %45, %4, %cst_65 {dimension_numbers = #tpu.dot_dimension_numbers<[1], [0], [0], [1], [0, 0, 1, 1], [], []>} : vector<8x32xf32>, vector<32x32xf32>, vector<8x32xf32> -> vector<8x32xf32>
    %47 = vector.broadcast %5 : vector<1x32xf32> to vector<8x32xf32>
    %48 = arith.addf %46, %47 : vector<8x32xf32>
    %49 = arith.negf %48 : vector<8x32xf32>
    %50 = math.exp %49 : vector<8x32xf32>
    %cst_66 = arith.constant 1.000000e+00 : f32
    %51 = vector.broadcast %cst_66 : f32 to vector<8x32xf32>
    %52 = arith.addf %51, %50 : vector<8x32xf32>
    %53 = arith.divf %51, %52 : vector<8x32xf32>
    %54 = arith.mulf %48, %53 : vector<8x32xf32>
    %c0_67 = arith.constant 0 : index
    %c0_68 = arith.constant 0 : index
    %c0_69 = arith.constant 0 : index
    %55 = vector.load %arg3[%c0_67, %c0_68, %c0_69] : memref<1x8x1xf32, #tpu.memory_space<vmem>>, vector<1x8x1xf32>
    %56 = vector.shape_cast %55 : vector<1x8x1xf32> to vector<8x1xf32>
    %57 = vector.broadcast %56 : vector<8x1xf32> to vector<8x32xf32>
    %58 = arith.mulf %54, %57 : vector<8x32xf32>
    %cst_70 = arith.constant 0.000000e+00 : f32
    %59 = vector.broadcast %cst_70 : f32 to vector<3x32xf32>
    %cst_71 = arith.constant 0.000000e+00 : f32
    %60 = vector.broadcast %cst_71 : f32 to vector<3x32xf32>
    %61 = tpu.concatenate %59, %58, %60 in 0 : vector<3x32xf32>, vector<8x32xf32>, vector<3x32xf32> -> vector<14x32xf32>
    %62 = vector.extract_strided_slice %61 {offsets = [0, 0], sizes = [8, 32], strides = [1, 1]} : vector<14x32xf32> to vector<8x32xf32>
    %63 = vector.extract_strided_slice %61 {offsets = [1, 0], sizes = [8, 32], strides = [1, 1]} : vector<14x32xf32> to vector<8x32xf32>
    %64 = vector.extract_strided_slice %61 {offsets = [2, 0], sizes = [8, 32], strides = [1, 1]} : vector<14x32xf32> to vector<8x32xf32>
    %65 = vector.extract_strided_slice %61 {offsets = [3, 0], sizes = [8, 32], strides = [1, 1]} : vector<14x32xf32> to vector<8x32xf32>
    %66 = vector.extract_strided_slice %61 {offsets = [4, 0], sizes = [8, 32], strides = [1, 1]} : vector<14x32xf32> to vector<8x32xf32>
    %67 = vector.extract_strided_slice %61 {offsets = [5, 0], sizes = [8, 32], strides = [1, 1]} : vector<14x32xf32> to vector<8x32xf32>
    %68 = vector.extract_strided_slice %61 {offsets = [6, 0], sizes = [8, 32], strides = [1, 1]} : vector<14x32xf32> to vector<8x32xf32>
    %69 = tpu.concatenate %62, %63, %64, %65, %66, %67, %68 in 1 : vector<8x32xf32>, vector<8x32xf32>, vector<8x32xf32>, vector<8x32xf32>, vector<8x32xf32>, vector<8x32xf32>, vector<8x32xf32> -> vector<8x224xf32>
    %cst_72 = arith.constant dense<0.000000e+00> : vector<8x32xf32>
    %70 = tpu.matmul %69, %6, %cst_72 {dimension_numbers = #tpu.dot_dimension_numbers<[1], [0], [0], [1], [0, 0, 1, 1], [], []>} : vector<8x224xf32>, vector<224x32xf32>, vector<8x32xf32> -> vector<8x32xf32>
    %71 = vector.broadcast %7 : vector<1x32xf32> to vector<8x32xf32>
    %72 = arith.addf %70, %71 : vector<8x32xf32>
    %cst_73 = arith.constant 0.000000e+00 : f32
    %73 = vector.broadcast %cst_73 : f32 to vector<8x32xf32>
    %74 = arith.cmpf oge, %72, %73 : vector<8x32xf32>
    %cst_74 = arith.constant 1.000000e-01 : f32
    %75 = vector.broadcast %cst_74 : f32 to vector<8x32xf32>
    %76 = arith.mulf %75, %72 : vector<8x32xf32>
    %77 = arith.select %74, %72, %76 : vector<8x32xi1>, vector<8x32xf32>
    %cst_75 = arith.constant 0.000000e+00 : f32
    %78 = vector.broadcast %cst_75 : f32 to vector<1x32xf32>
    %cst_76 = arith.constant 0.000000e+00 : f32
    %79 = vector.broadcast %cst_76 : f32 to vector<1x32xf32>
    %80 = tpu.concatenate %78, %77, %79 in 0 : vector<1x32xf32>, vector<8x32xf32>, vector<1x32xf32> -> vector<10x32xf32>
    %81 = vector.extract_strided_slice %80 {offsets = [1, 0], sizes = [8, 32], strides = [1, 1]} : vector<10x32xf32> to vector<8x32xf32>
    %82 = vector.extract_strided_slice %80 {offsets = [0, 0], sizes = [8, 32], strides = [1, 1]} : vector<10x32xf32> to vector<8x32xf32>
    %83 = tpu.concatenate %81, %82 in 1 : vector<8x32xf32>, vector<8x32xf32> -> vector<8x64xf32>
    %84 = vector.extract_strided_slice %8 {offsets = [0, 0, 0], sizes = [1, 64, 16], strides = [1, 1, 1]} : vector<4x64x16xf32> to vector<1x64x16xf32>
    %85 = vector.shape_cast %84 : vector<1x64x16xf32> to vector<64x16xf32>
    %cst_77 = arith.constant dense<0.000000e+00> : vector<8x16xf32>
    %86 = tpu.matmul %83, %85, %cst_77 {dimension_numbers = #tpu.dot_dimension_numbers<[1], [0], [0], [1], [0, 0, 1, 1], [], []>} : vector<8x64xf32>, vector<64x16xf32>, vector<8x16xf32> -> vector<8x16xf32>
    %87 = vector.broadcast %9 : vector<1x16xf32> to vector<8x16xf32>
    %88 = arith.addf %86, %87 : vector<8x16xf32>
    %89 = vector.extract_strided_slice %80 {offsets = [1, 0], sizes = [8, 32], strides = [1, 1]} : vector<10x32xf32> to vector<8x32xf32>
    %90 = vector.extract_strided_slice %80 {offsets = [0, 0], sizes = [8, 32], strides = [1, 1]} : vector<10x32xf32> to vector<8x32xf32>
    %91 = tpu.concatenate %89, %90 in 1 : vector<8x32xf32>, vector<8x32xf32> -> vector<8x64xf32>
    %92 = vector.extract_strided_slice %8 {offsets = [1, 0, 0], sizes = [1, 64, 16], strides = [1, 1, 1]} : vector<4x64x16xf32> to vector<1x64x16xf32>
    %93 = vector.shape_cast %92 : vector<1x64x16xf32> to vector<64x16xf32>
    %cst_78 = arith.constant dense<0.000000e+00> : vector<8x16xf32>
    %94 = tpu.matmul %91, %93, %cst_78 {dimension_numbers = #tpu.dot_dimension_numbers<[1], [0], [0], [1], [0, 0, 1, 1], [], []>} : vector<8x64xf32>, vector<64x16xf32>, vector<8x16xf32> -> vector<8x16xf32>
    %95 = vector.broadcast %9 : vector<1x16xf32> to vector<8x16xf32>
    %96 = arith.addf %94, %95 : vector<8x16xf32>
    %97 = vector.extract_strided_slice %80 {offsets = [2, 0], sizes = [8, 32], strides = [1, 1]} : vector<10x32xf32> to vector<8x32xf32>
    %98 = vector.extract_strided_slice %80 {offsets = [1, 0], sizes = [8, 32], strides = [1, 1]} : vector<10x32xf32> to vector<8x32xf32>
    %99 = tpu.concatenate %97, %98 in 1 : vector<8x32xf32>, vector<8x32xf32> -> vector<8x64xf32>
    %100 = vector.extract_strided_slice %8 {offsets = [2, 0, 0], sizes = [1, 64, 16], strides = [1, 1, 1]} : vector<4x64x16xf32> to vector<1x64x16xf32>
    %101 = vector.shape_cast %100 : vector<1x64x16xf32> to vector<64x16xf32>
    %cst_79 = arith.constant dense<0.000000e+00> : vector<8x16xf32>
    %102 = tpu.matmul %99, %101, %cst_79 {dimension_numbers = #tpu.dot_dimension_numbers<[1], [0], [0], [1], [0, 0, 1, 1], [], []>} : vector<8x64xf32>, vector<64x16xf32>, vector<8x16xf32> -> vector<8x16xf32>
    %103 = vector.broadcast %9 : vector<1x16xf32> to vector<8x16xf32>
    %104 = arith.addf %102, %103 : vector<8x16xf32>
    %105 = vector.extract_strided_slice %80 {offsets = [2, 0], sizes = [8, 32], strides = [1, 1]} : vector<10x32xf32> to vector<8x32xf32>
    %106 = vector.extract_strided_slice %80 {offsets = [1, 0], sizes = [8, 32], strides = [1, 1]} : vector<10x32xf32> to vector<8x32xf32>
    %107 = tpu.concatenate %105, %106 in 1 : vector<8x32xf32>, vector<8x32xf32> -> vector<8x64xf32>
    %108 = vector.extract_strided_slice %8 {offsets = [3, 0, 0], sizes = [1, 64, 16], strides = [1, 1, 1]} : vector<4x64x16xf32> to vector<1x64x16xf32>
    %109 = vector.shape_cast %108 : vector<1x64x16xf32> to vector<64x16xf32>
    %cst_80 = arith.constant dense<0.000000e+00> : vector<8x16xf32>
    %110 = tpu.matmul %107, %109, %cst_80 {dimension_numbers = #tpu.dot_dimension_numbers<[1], [0], [0], [1], [0, 0, 1, 1], [], []>} : vector<8x64xf32>, vector<64x16xf32>, vector<8x16xf32> -> vector<8x16xf32>
    %111 = vector.broadcast %9 : vector<1x16xf32> to vector<8x16xf32>
    %112 = arith.addf %110, %111 : vector<8x16xf32>
    %113 = tpu.concatenate %88, %96, %104, %112 in 0 : vector<8x16xf32>, vector<8x16xf32>, vector<8x16xf32>, vector<8x16xf32> -> vector<32x16xf32>
    %cst_81 = arith.constant dense<0.000000e+00> : vector<32x16xf32>
    %114 = tpu.matmul %10, %113, %cst_81 {dimension_numbers = #tpu.dot_dimension_numbers<[1], [0], [0], [1], [0, 0, 1, 1], [], []>} : vector<32x32xf32>, vector<32x16xf32>, vector<32x16xf32> -> vector<32x16xf32>
    %c0_82 = arith.constant 0 : index
    %c0_83 = arith.constant 0 : index
    %c0_84 = arith.constant 0 : index
    %115 = vector.load %arg4[%c0_82, %c0_83, %c0_84] : memref<1x32x8xf32, #tpu.memory_space<vmem>>, vector<1x32x8xf32>
    %116 = vector.shape_cast %115 : vector<1x32x8xf32> to vector<32x8xf32>
    %cst_85 = arith.constant dense<0.000000e+00> : vector<32x16xf32>
    %117 = tpu.matmul %116, %11, %cst_85 {dimension_numbers = #tpu.dot_dimension_numbers<[1], [0], [0], [1], [0, 0, 1, 1], [], []>} : vector<32x8xf32>, vector<8x16xf32>, vector<32x16xf32> -> vector<32x16xf32>
    %118 = vector.broadcast %12 : vector<1x16xf32> to vector<32x16xf32>
    %119 = arith.addf %117, %118 : vector<32x16xf32>
    %120 = arith.addf %114, %119 : vector<32x16xf32>
    %cst_86 = arith.constant 0.000000e+00 : f32
    %121 = vector.broadcast %cst_86 : f32 to vector<32x16xf32>
    %122 = arith.cmpf oge, %120, %121 : vector<32x16xf32>
    %cst_87 = arith.constant 1.000000e-01 : f32
    %123 = vector.broadcast %cst_87 : f32 to vector<32x16xf32>
    %124 = arith.mulf %123, %120 : vector<32x16xf32>
    %125 = arith.select %122, %120, %124 : vector<32x16xi1>, vector<32x16xf32>
    %cst_88 = arith.constant 0.000000e+00 : f32
    %126 = vector.broadcast %cst_88 : f32 to vector<1x16xf32>
    %cst_89 = arith.constant 0.000000e+00 : f32
    %127 = vector.broadcast %cst_89 : f32 to vector<1x16xf32>
    %128 = tpu.concatenate %126, %125, %127 in 0 : vector<1x16xf32>, vector<32x16xf32>, vector<1x16xf32> -> vector<34x16xf32>
    %129 = vector.extract_strided_slice %128 {offsets = [0, 0], sizes = [32, 16], strides = [1, 1]} : vector<34x16xf32> to vector<32x16xf32>
    %130 = vector.extract_strided_slice %128 {offsets = [1, 0], sizes = [32, 16], strides = [1, 1]} : vector<34x16xf32> to vector<32x16xf32>
    %131 = vector.extract_strided_slice %128 {offsets = [2, 0], sizes = [32, 16], strides = [1, 1]} : vector<34x16xf32> to vector<32x16xf32>
    %132 = tpu.concatenate %129, %130, %131 in 1 : vector<32x16xf32>, vector<32x16xf32>, vector<32x16xf32> -> vector<32x48xf32>
    %cst_90 = arith.constant dense<0.000000e+00> : vector<32x16xf32>
    %133 = tpu.matmul %132, %13, %cst_90 {dimension_numbers = #tpu.dot_dimension_numbers<[1], [0], [0], [1], [0, 0, 1, 1], [], []>} : vector<32x48xf32>, vector<48x16xf32>, vector<32x16xf32> -> vector<32x16xf32>
    %134 = vector.broadcast %14 : vector<1x16xf32> to vector<32x16xf32>
    %135 = arith.addf %133, %134 : vector<32x16xf32>
    %136 = arith.addf %135, %120 : vector<32x16xf32>
    %cst_91 = arith.constant 0.000000e+00 : f32
    %137 = vector.broadcast %cst_91 : f32 to vector<32x16xf32>
    %138 = arith.cmpf oge, %136, %137 : vector<32x16xf32>
    %cst_92 = arith.constant 1.000000e-01 : f32
    %139 = vector.broadcast %cst_92 : f32 to vector<32x16xf32>
    %140 = arith.mulf %139, %136 : vector<32x16xf32>
    %141 = arith.select %138, %136, %140 : vector<32x16xi1>, vector<32x16xf32>
    %cst_93 = arith.constant 0.000000e+00 : f32
    %142 = vector.broadcast %cst_93 : f32 to vector<3x16xf32>
    %cst_94 = arith.constant 0.000000e+00 : f32
    %143 = vector.broadcast %cst_94 : f32 to vector<3x16xf32>
    %144 = tpu.concatenate %142, %141, %143 in 0 : vector<3x16xf32>, vector<32x16xf32>, vector<3x16xf32> -> vector<38x16xf32>
    %145 = vector.extract_strided_slice %144 {offsets = [0, 0], sizes = [32, 16], strides = [1, 1]} : vector<38x16xf32> to vector<32x16xf32>
    %146 = vector.extract_strided_slice %144 {offsets = [3, 0], sizes = [32, 16], strides = [1, 1]} : vector<38x16xf32> to vector<32x16xf32>
    %147 = vector.extract_strided_slice %144 {offsets = [6, 0], sizes = [32, 16], strides = [1, 1]} : vector<38x16xf32> to vector<32x16xf32>
    %148 = tpu.concatenate %145, %146, %147 in 1 : vector<32x16xf32>, vector<32x16xf32>, vector<32x16xf32> -> vector<32x48xf32>
    %cst_95 = arith.constant dense<0.000000e+00> : vector<32x16xf32>
    %149 = tpu.matmul %148, %15, %cst_95 {dimension_numbers = #tpu.dot_dimension_numbers<[1], [0], [0], [1], [0, 0, 1, 1], [], []>} : vector<32x48xf32>, vector<48x16xf32>, vector<32x16xf32> -> vector<32x16xf32>
    %150 = vector.broadcast %16 : vector<1x16xf32> to vector<32x16xf32>
    %151 = arith.addf %149, %150 : vector<32x16xf32>
    %152 = arith.addf %151, %136 : vector<32x16xf32>
    %cst_96 = arith.constant 1.000000e+00 : f32
    %153 = vector.broadcast %cst_96 : f32 to vector<32x16xf32>
    %154 = arith.mulf %152, %153 : vector<32x16xf32>
    %cst_97 = arith.constant 0.000000e+00 : f32
    %155 = vector.broadcast %cst_97 : f32 to vector<32x16xf32>
    %156 = arith.cmpf oge, %154, %155 : vector<32x16xf32>
    %cst_98 = arith.constant 1.000000e-01 : f32
    %157 = vector.broadcast %cst_98 : f32 to vector<32x16xf32>
    %158 = arith.mulf %157, %154 : vector<32x16xf32>
    %159 = arith.select %156, %154, %158 : vector<32x16xi1>, vector<32x16xf32>
    %cst_99 = arith.constant 0.000000e+00 : f32
    %160 = vector.broadcast %cst_99 : f32 to vector<1x16xf32>
    %cst_100 = arith.constant 0.000000e+00 : f32
    %161 = vector.broadcast %cst_100 : f32 to vector<1x16xf32>
    %162 = tpu.concatenate %160, %159, %161 in 0 : vector<1x16xf32>, vector<32x16xf32>, vector<1x16xf32> -> vector<34x16xf32>
    %163 = vector.extract_strided_slice %162 {offsets = [1, 0], sizes = [32, 16], strides = [1, 1]} : vector<34x16xf32> to vector<32x16xf32>
    %164 = vector.extract_strided_slice %162 {offsets = [0, 0], sizes = [32, 16], strides = [1, 1]} : vector<34x16xf32> to vector<32x16xf32>
    %165 = tpu.concatenate %163, %164 in 1 : vector<32x16xf32>, vector<32x16xf32> -> vector<32x32xf32>
    %166 = vector.extract_strided_slice %17 {offsets = [0, 0, 0], sizes = [1, 32, 8], strides = [1, 1, 1]} : vector<4x32x8xf32> to vector<1x32x8xf32>
    %167 = vector.shape_cast %166 : vector<1x32x8xf32> to vector<32x8xf32>
    %cst_101 = arith.constant dense<0.000000e+00> : vector<32x8xf32>
    %168 = tpu.matmul %165, %167, %cst_101 {dimension_numbers = #tpu.dot_dimension_numbers<[1], [0], [0], [1], [0, 0, 1, 1], [], []>} : vector<32x32xf32>, vector<32x8xf32>, vector<32x8xf32> -> vector<32x8xf32>
    %169 = vector.broadcast %18 : vector<1x8xf32> to vector<32x8xf32>
    %170 = arith.addf %168, %169 : vector<32x8xf32>
    %171 = vector.extract_strided_slice %162 {offsets = [1, 0], sizes = [32, 16], strides = [1, 1]} : vector<34x16xf32> to vector<32x16xf32>
    %172 = vector.extract_strided_slice %162 {offsets = [0, 0], sizes = [32, 16], strides = [1, 1]} : vector<34x16xf32> to vector<32x16xf32>
    %173 = tpu.concatenate %171, %172 in 1 : vector<32x16xf32>, vector<32x16xf32> -> vector<32x32xf32>
    %174 = vector.extract_strided_slice %17 {offsets = [1, 0, 0], sizes = [1, 32, 8], strides = [1, 1, 1]} : vector<4x32x8xf32> to vector<1x32x8xf32>
    %175 = vector.shape_cast %174 : vector<1x32x8xf32> to vector<32x8xf32>
    %cst_102 = arith.constant dense<0.000000e+00> : vector<32x8xf32>
    %176 = tpu.matmul %173, %175, %cst_102 {dimension_numbers = #tpu.dot_dimension_numbers<[1], [0], [0], [1], [0, 0, 1, 1], [], []>} : vector<32x32xf32>, vector<32x8xf32>, vector<32x8xf32> -> vector<32x8xf32>
    %177 = vector.broadcast %18 : vector<1x8xf32> to vector<32x8xf32>
    %178 = arith.addf %176, %177 : vector<32x8xf32>
    %179 = vector.extract_strided_slice %162 {offsets = [2, 0], sizes = [32, 16], strides = [1, 1]} : vector<34x16xf32> to vector<32x16xf32>
    %180 = vector.extract_strided_slice %162 {offsets = [1, 0], sizes = [32, 16], strides = [1, 1]} : vector<34x16xf32> to vector<32x16xf32>
    %181 = tpu.concatenate %179, %180 in 1 : vector<32x16xf32>, vector<32x16xf32> -> vector<32x32xf32>
    %182 = vector.extract_strided_slice %17 {offsets = [2, 0, 0], sizes = [1, 32, 8], strides = [1, 1, 1]} : vector<4x32x8xf32> to vector<1x32x8xf32>
    %183 = vector.shape_cast %182 : vector<1x32x8xf32> to vector<32x8xf32>
    %cst_103 = arith.constant dense<0.000000e+00> : vector<32x8xf32>
    %184 = tpu.matmul %181, %183, %cst_103 {dimension_numbers = #tpu.dot_dimension_numbers<[1], [0], [0], [1], [0, 0, 1, 1], [], []>} : vector<32x32xf32>, vector<32x8xf32>, vector<32x8xf32> -> vector<32x8xf32>
    %185 = vector.broadcast %18 : vector<1x8xf32> to vector<32x8xf32>
    %186 = arith.addf %184, %185 : vector<32x8xf32>
    %187 = vector.extract_strided_slice %162 {offsets = [2, 0], sizes = [32, 16], strides = [1, 1]} : vector<34x16xf32> to vector<32x16xf32>
    %188 = vector.extract_strided_slice %162 {offsets = [1, 0], sizes = [32, 16], strides = [1, 1]} : vector<34x16xf32> to vector<32x16xf32>
    %189 = tpu.concatenate %187, %188 in 1 : vector<32x16xf32>, vector<32x16xf32> -> vector<32x32xf32>
    %190 = vector.extract_strided_slice %17 {offsets = [3, 0, 0], sizes = [1, 32, 8], strides = [1, 1, 1]} : vector<4x32x8xf32> to vector<1x32x8xf32>
    %191 = vector.shape_cast %190 : vector<1x32x8xf32> to vector<32x8xf32>
    %cst_104 = arith.constant dense<0.000000e+00> : vector<32x8xf32>
    %192 = tpu.matmul %189, %191, %cst_104 {dimension_numbers = #tpu.dot_dimension_numbers<[1], [0], [0], [1], [0, 0, 1, 1], [], []>} : vector<32x32xf32>, vector<32x8xf32>, vector<32x8xf32> -> vector<32x8xf32>
    %193 = vector.broadcast %18 : vector<1x8xf32> to vector<32x8xf32>
    %194 = arith.addf %192, %193 : vector<32x8xf32>
    %195 = tpu.concatenate %170, %178, %186, %194 in 0 : vector<32x8xf32>, vector<32x8xf32>, vector<32x8xf32>, vector<32x8xf32> -> vector<128x8xf32>
    %cst_105 = arith.constant dense<0.000000e+00> : vector<128x8xf32>
    %196 = tpu.matmul %19, %195, %cst_105 {dimension_numbers = #tpu.dot_dimension_numbers<[1], [0], [0], [1], [0, 0, 1, 1], [], []>} : vector<128x128xf32>, vector<128x8xf32>, vector<128x8xf32> -> vector<128x8xf32>
    %c0_106 = arith.constant 0 : index
    %c0_107 = arith.constant 0 : index
    %c0_108 = arith.constant 0 : index
    %197 = vector.load %arg5[%c0_106, %c0_107, %c0_108] : memref<1x128x1xf32, #tpu.memory_space<vmem>>, vector<1x128x1xf32>
    %198 = vector.shape_cast %197 : vector<1x128x1xf32> to vector<128x1xf32>
    %199 = vector.broadcast %198 : vector<128x1xf32> to vector<128x8xf32>
    %200 = vector.broadcast %20 : vector<1x8xf32> to vector<128x8xf32>
    %201 = arith.mulf %199, %200 : vector<128x8xf32>
    %202 = vector.broadcast %21 : vector<1x8xf32> to vector<128x8xf32>
    %203 = arith.addf %201, %202 : vector<128x8xf32>
    %204 = arith.addf %196, %203 : vector<128x8xf32>
    %cst_109 = arith.constant 0.000000e+00 : f32
    %205 = vector.broadcast %cst_109 : f32 to vector<128x8xf32>
    %206 = arith.cmpf oge, %204, %205 : vector<128x8xf32>
    %cst_110 = arith.constant 1.000000e-01 : f32
    %207 = vector.broadcast %cst_110 : f32 to vector<128x8xf32>
    %208 = arith.mulf %207, %204 : vector<128x8xf32>
    %209 = arith.select %206, %204, %208 : vector<128x8xi1>, vector<128x8xf32>
    %cst_111 = arith.constant 0.000000e+00 : f32
    %210 = vector.broadcast %cst_111 : f32 to vector<1x8xf32>
    %cst_112 = arith.constant 0.000000e+00 : f32
    %211 = vector.broadcast %cst_112 : f32 to vector<1x8xf32>
    %212 = tpu.concatenate %210, %209, %211 in 0 : vector<1x8xf32>, vector<128x8xf32>, vector<1x8xf32> -> vector<130x8xf32>
    %213 = vector.extract_strided_slice %212 {offsets = [0, 0], sizes = [128, 8], strides = [1, 1]} : vector<130x8xf32> to vector<128x8xf32>
    %214 = vector.extract_strided_slice %212 {offsets = [1, 0], sizes = [128, 8], strides = [1, 1]} : vector<130x8xf32> to vector<128x8xf32>
    %215 = vector.extract_strided_slice %212 {offsets = [2, 0], sizes = [128, 8], strides = [1, 1]} : vector<130x8xf32> to vector<128x8xf32>
    %216 = tpu.concatenate %213, %214, %215 in 1 : vector<128x8xf32>, vector<128x8xf32>, vector<128x8xf32> -> vector<128x24xf32>
    %cst_113 = arith.constant dense<0.000000e+00> : vector<128x8xf32>
    %217 = tpu.matmul %216, %22, %cst_113 {dimension_numbers = #tpu.dot_dimension_numbers<[1], [0], [0], [1], [0, 0, 1, 1], [], []>} : vector<128x24xf32>, vector<24x8xf32>, vector<128x8xf32> -> vector<128x8xf32>
    %218 = vector.broadcast %23 : vector<1x8xf32> to vector<128x8xf32>
    %219 = arith.addf %217, %218 : vector<128x8xf32>
    %220 = arith.addf %219, %204 : vector<128x8xf32>
    %cst_114 = arith.constant 0.000000e+00 : f32
    %221 = vector.broadcast %cst_114 : f32 to vector<128x8xf32>
    %222 = arith.cmpf oge, %220, %221 : vector<128x8xf32>
    %cst_115 = arith.constant 1.000000e-01 : f32
    %223 = vector.broadcast %cst_115 : f32 to vector<128x8xf32>
    %224 = arith.mulf %223, %220 : vector<128x8xf32>
    %225 = arith.select %222, %220, %224 : vector<128x8xi1>, vector<128x8xf32>
    %cst_116 = arith.constant 0.000000e+00 : f32
    %226 = vector.broadcast %cst_116 : f32 to vector<3x8xf32>
    %cst_117 = arith.constant 0.000000e+00 : f32
    %227 = vector.broadcast %cst_117 : f32 to vector<3x8xf32>
    %228 = tpu.concatenate %226, %225, %227 in 0 : vector<3x8xf32>, vector<128x8xf32>, vector<3x8xf32> -> vector<134x8xf32>
    %229 = vector.extract_strided_slice %228 {offsets = [0, 0], sizes = [128, 8], strides = [1, 1]} : vector<134x8xf32> to vector<128x8xf32>
    %230 = vector.extract_strided_slice %228 {offsets = [3, 0], sizes = [128, 8], strides = [1, 1]} : vector<134x8xf32> to vector<128x8xf32>
    %231 = vector.extract_strided_slice %228 {offsets = [6, 0], sizes = [128, 8], strides = [1, 1]} : vector<134x8xf32> to vector<128x8xf32>
    %232 = tpu.concatenate %229, %230, %231 in 1 : vector<128x8xf32>, vector<128x8xf32>, vector<128x8xf32> -> vector<128x24xf32>
    %cst_118 = arith.constant dense<0.000000e+00> : vector<128x8xf32>
    %233 = tpu.matmul %232, %24, %cst_118 {dimension_numbers = #tpu.dot_dimension_numbers<[1], [0], [0], [1], [0, 0, 1, 1], [], []>} : vector<128x24xf32>, vector<24x8xf32>, vector<128x8xf32> -> vector<128x8xf32>
    %234 = vector.broadcast %25 : vector<1x8xf32> to vector<128x8xf32>
    %235 = arith.addf %233, %234 : vector<128x8xf32>
    %236 = arith.addf %235, %220 : vector<128x8xf32>
    %cst_119 = arith.constant 1.000000e+00 : f32
    %237 = vector.broadcast %cst_119 : f32 to vector<128x8xf32>
    %238 = arith.mulf %236, %237 : vector<128x8xf32>
    %cst_120 = arith.constant 0.000000e+00 : f32
    %239 = vector.broadcast %cst_120 : f32 to vector<128x8xf32>
    %240 = arith.cmpf oge, %238, %239 : vector<128x8xf32>
    %cst_121 = arith.constant 0.00999999977 : f32
    %241 = vector.broadcast %cst_121 : f32 to vector<128x8xf32>
    %242 = arith.mulf %241, %238 : vector<128x8xf32>
    %243 = arith.select %240, %238, %242 : vector<128x8xi1>, vector<128x8xf32>
    %cst_122 = arith.constant 0.000000e+00 : f32
    %244 = vector.broadcast %cst_122 : f32 to vector<3x8xf32>
    %cst_123 = arith.constant 0.000000e+00 : f32
    %245 = vector.broadcast %cst_123 : f32 to vector<3x8xf32>
    %246 = tpu.concatenate %244, %243, %245 in 0 : vector<3x8xf32>, vector<128x8xf32>, vector<3x8xf32> -> vector<134x8xf32>
    %247 = vector.extract_strided_slice %246 {offsets = [0, 0], sizes = [128, 8], strides = [1, 1]} : vector<134x8xf32> to vector<128x8xf32>
    %248 = vector.extract_strided_slice %246 {offsets = [1, 0], sizes = [128, 8], strides = [1, 1]} : vector<134x8xf32> to vector<128x8xf32>
    %249 = vector.extract_strided_slice %246 {offsets = [2, 0], sizes = [128, 8], strides = [1, 1]} : vector<134x8xf32> to vector<128x8xf32>
    %250 = vector.extract_strided_slice %246 {offsets = [3, 0], sizes = [128, 8], strides = [1, 1]} : vector<134x8xf32> to vector<128x8xf32>
    %251 = vector.extract_strided_slice %246 {offsets = [4, 0], sizes = [128, 8], strides = [1, 1]} : vector<134x8xf32> to vector<128x8xf32>
    %252 = vector.extract_strided_slice %246 {offsets = [5, 0], sizes = [128, 8], strides = [1, 1]} : vector<134x8xf32> to vector<128x8xf32>
    %253 = vector.extract_strided_slice %246 {offsets = [6, 0], sizes = [128, 8], strides = [1, 1]} : vector<134x8xf32> to vector<128x8xf32>
    %254 = tpu.concatenate %247, %248, %249, %250, %251, %252, %253 in 1 : vector<128x8xf32>, vector<128x8xf32>, vector<128x8xf32>, vector<128x8xf32>, vector<128x8xf32>, vector<128x8xf32>, vector<128x8xf32> -> vector<128x56xf32>
    %cst_124 = arith.constant dense<0.000000e+00> : vector<128x1xf32>
    %255 = tpu.matmul %254, %26, %cst_124 {dimension_numbers = #tpu.dot_dimension_numbers<[1], [0], [0], [1], [0, 0, 1, 1], [], []>} : vector<128x56xf32>, vector<56x1xf32>, vector<128x1xf32> -> vector<128x1xf32>
    %256 = vector.broadcast %27 : vector<1x1xf32> to vector<128x1xf32>
    %257 = arith.addf %255, %256 : vector<128x1xf32>
    %258 = math.tanh %257 : vector<128x1xf32>
    %c0_125 = arith.constant 0 : index
    %c0_126 = arith.constant 0 : index
    %c0_127 = arith.constant 0 : index
    %259 = vector.load %arg34[%c0_125, %c0_126, %c0_127] : memref<1x128x1xf32, #tpu.memory_space<vmem>>, vector<1x128x1xf32>
    %260 = vector.shape_cast %259 : vector<1x128x1xf32> to vector<128x1xf32>
    %261 = vector.shape_cast %258 : vector<128x1xf32> to vector<1x128x1xf32>
    tpu.vector_store %arg34[%c0_125, %c0_126, %c0_127], %261 {strides = array<i32>} : memref<1x128x1xf32, #tpu.memory_space<vmem>>, vector<1x128x1xf32>,
    return
  }
  func.func @transform_0(%arg0: i32) -> (i32, i32, i32) {
    %c0_i32 = arith.constant 0 : i32
    %c0_i32_0 = arith.constant 0 : i32
    %c0_i32_1 = arith.constant 0 : i32
    return %arg0, %c0_i32, %c0_i32_0 : i32, i32, i32
  }
  func.func @transform_1(%arg0: i32) -> (i32, i32, i32) {
    %c0_i32 = arith.constant 0 : i32
    %c0_i32_0 = arith.constant 0 : i32
    %c0_i32_1 = arith.constant 0 : i32
    return %arg0, %c0_i32, %c0_i32_0 : i32, i32, i32
  }
  func.func @transform_2(%arg0: i32) -> (i32, i32, i32) {
    %c0_i32 = arith.constant 0 : i32
    %c0_i32_0 = arith.constant 0 : i32
    %c0_i32_1 = arith.constant 0 : i32
    return %arg0, %c0_i32, %c0_i32_0 : i32, i32, i32
  }
  func.func @transform_3(%arg0: i32) -> (i32, i32, i32) {
    %c0_i32 = arith.constant 0 : i32
    %c0_i32_0 = arith.constant 0 : i32
    %c0_i32_1 = arith.constant 0 : i32
    return %arg0, %c0_i32, %c0_i32_0 : i32, i32, i32
  }
  func.func @transform_4(%arg0: i32) -> (i32, i32, i32) {
    %c0_i32 = arith.constant 0 : i32
    %c0_i32_0 = arith.constant 0 : i32
    %c0_i32_1 = arith.constant 0 : i32
    return %arg0, %c0_i32, %c0_i32_0 : i32, i32, i32
  }
  func.func @transform_5(%arg0: i32) -> (i32, i32) {
    %c0_i32 = arith.constant 0 : i32
    %c0_i32_0 = arith.constant 0 : i32
    %c0_i32_1 = arith.constant 0 : i32
    return %c0_i32, %c0_i32_0 : i32, i32
  }
  func.func @transform_6(%arg0: i32) -> (i32, i32) {
    %c0_i32 = arith.constant 0 : i32
    %c0_i32_0 = arith.constant 0 : i32
    %c0_i32_1 = arith.constant 0 : i32
    return %c0_i32, %c0_i32_0 : i32, i32
  }
  func.func @transform_7(%arg0: i32) -> (i32, i32) {
    %c0_i32 = arith.constant 0 : i32
    %c0_i32_0 = arith.constant 0 : i32
    %c0_i32_1 = arith.constant 0 : i32
    return %c0_i32, %c0_i32_0 : i32, i32
  }
  func.func @transform_8(%arg0: i32) -> (i32, i32) {
    %c0_i32 = arith.constant 0 : i32
    %c0_i32_0 = arith.constant 0 : i32
    %c0_i32_1 = arith.constant 0 : i32
    return %c0_i32, %c0_i32_0 : i32, i32
  }
  func.func @transform_9(%arg0: i32) -> (i32, i32) {
    %c0_i32 = arith.constant 0 : i32
    %c0_i32_0 = arith.constant 0 : i32
    %c0_i32_1 = arith.constant 0 : i32
    return %c0_i32, %c0_i32_0 : i32, i32
  }
  func.func @transform_10(%arg0: i32) -> (i32, i32) {
    %c0_i32 = arith.constant 0 : i32
    %c0_i32_0 = arith.constant 0 : i32
    %c0_i32_1 = arith.constant 0 : i32
    return %c0_i32, %c0_i32_0 : i32, i32
  }
  func.func @transform_11(%arg0: i32) -> (i32, i32) {
    %c0_i32 = arith.constant 0 : i32
    %c0_i32_0 = arith.constant 0 : i32
    %c0_i32_1 = arith.constant 0 : i32
    return %c0_i32, %c0_i32_0 : i32, i32
  }
  func.func @transform_12(%arg0: i32) -> (i32, i32) {
    %c0_i32 = arith.constant 0 : i32
    %c0_i32_0 = arith.constant 0 : i32
    %c0_i32_1 = arith.constant 0 : i32
    return %c0_i32, %c0_i32_0 : i32, i32
  }
  func.func @transform_13(%arg0: i32) -> (i32, i32, i32) {
    %c0_i32 = arith.constant 0 : i32
    %c0_i32_0 = arith.constant 0 : i32
    %c0_i32_1 = arith.constant 0 : i32
    %c0_i32_2 = arith.constant 0 : i32
    return %c0_i32, %c0_i32_0, %c0_i32_1 : i32, i32, i32
  }
  func.func @transform_14(%arg0: i32) -> (i32, i32) {
    %c0_i32 = arith.constant 0 : i32
    %c0_i32_0 = arith.constant 0 : i32
    %c0_i32_1 = arith.constant 0 : i32
    return %c0_i32, %c0_i32_0 : i32, i32
  }
  func.func @transform_15(%arg0: i32) -> (i32, i32) {
    %c0_i32 = arith.constant 0 : i32
    %c0_i32_0 = arith.constant 0 : i32
    %c0_i32_1 = arith.constant 0 : i32
    return %c0_i32, %c0_i32_0 : i32, i32
  }
  func.func @transform_16(%arg0: i32) -> (i32, i32) {
    %c0_i32 = arith.constant 0 : i32
    %c0_i32_0 = arith.constant 0 : i32
    %c0_i32_1 = arith.constant 0 : i32
    return %c0_i32, %c0_i32_0 : i32, i32
  }
  func.func @transform_17(%arg0: i32) -> (i32, i32) {
    %c0_i32 = arith.constant 0 : i32
    %c0_i32_0 = arith.constant 0 : i32
    %c0_i32_1 = arith.constant 0 : i32
    return %c0_i32, %c0_i32_0 : i32, i32
  }
  func.func @transform_18(%arg0: i32) -> (i32, i32) {
    %c0_i32 = arith.constant 0 : i32
    %c0_i32_0 = arith.constant 0 : i32
    %c0_i32_1 = arith.constant 0 : i32
    return %c0_i32, %c0_i32_0 : i32, i32
  }
  func.func @transform_19(%arg0: i32) -> (i32, i32) {
    %c0_i32 = arith.constant 0 : i32
    %c0_i32_0 = arith.constant 0 : i32
    %c0_i32_1 = arith.constant 0 : i32
    return %c0_i32, %c0_i32_0 : i32, i32
  }
  func.func @transform_20(%arg0: i32) -> (i32, i32) {
    %c0_i32 = arith.constant 0 : i32
    %c0_i32_0 = arith.constant 0 : i32
    %c0_i32_1 = arith.constant 0 : i32
    return %c0_i32, %c0_i32_0 : i32, i32
  }
  func.func @transform_21(%arg0: i32) -> (i32, i32) {
    %c0_i32 = arith.constant 0 : i32
    %c0_i32_0 = arith.constant 0 : i32
    %c0_i32_1 = arith.constant 0 : i32
    return %c0_i32, %c0_i32_0 : i32, i32
  }
  func.func @transform_22(%arg0: i32) -> (i32, i32, i32) {
    %c0_i32 = arith.constant 0 : i32
    %c0_i32_0 = arith.constant 0 : i32
    %c0_i32_1 = arith.constant 0 : i32
    %c0_i32_2 = arith.constant 0 : i32
    return %c0_i32, %c0_i32_0, %c0_i32_1 : i32, i32, i32
  }
  func.func @transform_23(%arg0: i32) -> (i32, i32) {
    %c0_i32 = arith.constant 0 : i32
    %c0_i32_0 = arith.constant 0 : i32
    %c0_i32_1 = arith.constant 0 : i32
    return %c0_i32, %c0_i32_0 : i32, i32
  }
  func.func @transform_24(%arg0: i32) -> (i32, i32) {
    %c0_i32 = arith.constant 0 : i32
    %c0_i32_0 = arith.constant 0 : i32
    %c0_i32_1 = arith.constant 0 : i32
    return %c0_i32, %c0_i32_0 : i32, i32
  }
  func.func @transform_25(%arg0: i32) -> (i32, i32) {
    %c0_i32 = arith.constant 0 : i32
    %c0_i32_0 = arith.constant 0 : i32
    %c0_i32_1 = arith.constant 0 : i32
    return %c0_i32, %c0_i32_0 : i32, i32
  }
  func.func @transform_26(%arg0: i32) -> (i32, i32) {
    %c0_i32 = arith.constant 0 : i32
    %c0_i32_0 = arith.constant 0 : i32
    %c0_i32_1 = arith.constant 0 : i32
    return %c0_i32, %c0_i32_0 : i32, i32
  }
  func.func @transform_27(%arg0: i32) -> (i32, i32) {
    %c0_i32 = arith.constant 0 : i32
    %c0_i32_0 = arith.constant 0 : i32
    %c0_i32_1 = arith.constant 0 : i32
    return %c0_i32, %c0_i32_0 : i32, i32
  }
  func.func @transform_28(%arg0: i32) -> (i32, i32) {
    %c0_i32 = arith.constant 0 : i32
    %c0_i32_0 = arith.constant 0 : i32
    %c0_i32_1 = arith.constant 0 : i32
    return %c0_i32, %c0_i32_0 : i32, i32
  }
  func.func @transform_29(%arg0: i32) -> (i32, i32) {
    %c0_i32 = arith.constant 0 : i32
    %c0_i32_0 = arith.constant 0 : i32
    %c0_i32_1 = arith.constant 0 : i32
    return %c0_i32, %c0_i32_0 : i32, i32
  }
  func.func @transform_30(%arg0: i32) -> (i32, i32) {
    %c0_i32 = arith.constant 0 : i32
    %c0_i32_0 = arith.constant 0 : i32
    %c0_i32_1 = arith.constant 0 : i32
    return %c0_i32, %c0_i32_0 : i32, i32
  }
  func.func @transform_31(%arg0: i32) -> (i32, i32) {
    %c0_i32 = arith.constant 0 : i32
    %c0_i32_0 = arith.constant 0 : i32
    %c0_i32_1 = arith.constant 0 : i32
    return %c0_i32, %c0_i32_0 : i32, i32
  }
  func.func @transform_32(%arg0: i32) -> (i32, i32) {
    %c0_i32 = arith.constant 0 : i32
    %c0_i32_0 = arith.constant 0 : i32
    %c0_i32_1 = arith.constant 0 : i32
    return %c0_i32, %c0_i32_0 : i32, i32
  }
  func.func @transform_33(%arg0: i32) -> (i32, i32, i32) {
    %c0_i32 = arith.constant 0 : i32
    %c0_i32_0 = arith.constant 0 : i32
    %c0_i32_1 = arith.constant 0 : i32
    return %arg0, %c0_i32, %c0_i32_0 : i32, i32, i32
  }
}

</mosaic_0001>

<bundles_post_ra>
// kernel: hifisinger_forward.1
= control target key start
LH: loop header
LB: loop body
LE: loop exit
PB: predicated region body
PF: predicated region fallthrough
CT: control target
= control target key end

     0   :  { %s6426_s6 = smov 1   ;;  %s6427_s10 = smov 2   ;;  %s8344_s0 = inlined_call_operand.smem [shape: u32[34], index: -1, kind: input, shape index: {}] }
   0x1   :  { %s6479_s5 = sld [smem:[%s8344_s0]]   ;;  %s6428_s14 = smov 3  }
   0x2   :  { %s6484_s9 = sld [smem:[%s8344_s0 + %s6426_s6]]   ;;  %s6429_s18 = smov 4  }
   0x3   :  { %s6489_s13 = sld [smem:[%s8344_s0 + %s6427_s10]]   ;;  %s6430_s22 = smov 5  }
   0x4   :  { %s6494_s17 = sld [smem:[%s8344_s0 + %s6428_s14]]   ;;  %s6431_s26 = smov 6  }
   0x5   :  { %s6499_s21 = sld [smem:[%s8344_s0 + %s6429_s18]]   ;;  %s6432_s30 = smov 7  }
   0x6   :  { %s6504_s25 = sld [smem:[%s8344_s0 + %s6430_s22]]   ;;  %s6433_s4 = smov 8  }
   0x7   :  { %s6509_s29 = sld [smem:[%s8344_s0 + %s6431_s26]]   ;;  %s6434_s10 = smov 9  }
   0x8   :  { %s6514_s3 = sld [smem:[%s8344_s0 + %s6432_s30]]   ;;  %s6435_s15 = smov 10  }
   0x9   :  { %s6519_s8 = sld [smem:[%s8344_s0 + %s6433_s4]]   ;;  %s6436_s20 = smov 11  }
   0xa   :  { %s6524_s14 = sld [smem:[%s8344_s0 + %s6434_s10]]   ;;  %s6437_s26 = smov 12  }
   0xb   :  { %8366 = sst [smem:[#allocation3_spill]] %s6499_s21  ;;  %s6438_s1 = smov 13  }
   0xc   :  { %s6529_s19 = sld [smem:[%s8344_s0 + %s6435_s15]]   ;;  %s6439_s7 = smov 14  }
   0xd   :  { %s6534_s24 = sld [smem:[%s8344_s0 + %s6436_s20]]   ;;  %s6440_s15 = smov 15  }
   0xe   :  { %s6539_s30 = sld [smem:[%s8344_s0 + %s6437_s26]]   ;;  %s6441_s22 = smov 16  }
   0xf   :  { %s6544_s6 = sld [smem:[%s8344_s0 + %s6438_s1]]   ;;  %s6442_s28 = smov 17  }
  0x10   :  { %s6549_s12 = sld [smem:[%s8344_s0 + %s6439_s7]]   ;;  %s6443_s7 = smov 18  }
  0x11   :  { %s6554_s20 = sld [smem:[%s8344_s0 + %s6440_s15]]   ;;  %s6444_s15 = smov 19  }
  0x12   :  { %s6559_s27 = sld [smem:[%s8344_s0 + %s6441_s22]]   ;;  %s6445_s22 = smov 20  }
  0x13   :  { %s6564_s4 = sld [smem:[%s8344_s0 + %s6442_s28]]   ;;  %s6446_s28 = smov 21  }
  0x14   :  { %s6569_s21 = sld [smem:[%s8344_s0 + %s6443_s7]]   ;;  %s6447_s7 = smov 22  }
  0x15   :  { %s6458_s1 = smov 33  }
  0x16   :  { %8367 = sst [smem:[#allocation4_spill]] %s6549_s12 }
  0x17   :  { %8368 = sst [smem:[#allocation5_spill]] %s6554_s20 }
  0x18   :  { %s6574_s12 = sld [smem:[%s8344_s0 + %s6444_s15]]   ;;  %s6448_s15 = smov 23  }
  0x19   :  { %8369 = sst [smem:[#allocation6_spill]] %s6564_s4 }
  0x1a   :  { %8370 = sst [smem:[#allocation7_spill]] %s6569_s21 }
  0x1b   :  { %s6579_s20 = sld [smem:[%s8344_s0 + %s6445_s22]]   ;;  %s6449_s22 = smov 24  }
  0x1c   :  { %s6584_s4 = sld [smem:[%s8344_s0 + %s6446_s28]]   ;;  %s6450_s28 = smov 25  }
  0x1d   :  { %s6589_s21 = sld [smem:[%s8344_s0 + %s6447_s7]]   ;;  %s6451_s7 = smov 26  }
  0x1e   :  { %8371 = sst [smem:[#allocation8_spill]] %s6574_s12 }
  0x1f   :  { %s6594_s12 = sld [smem:[%s8344_s0 + %s6448_s15]]   ;;  %s6452_s15 = smov 27  }
  0x21   :  { %8372 = sst [smem:[#allocation9_spill]] %s6579_s20 }
  0x22   :  { %8373 = sst [smem:[#allocation10_spill]] %s6584_s4 }
  0x23   :  { %8374 = sst [smem:[#allocation11_spill]] %s6589_s21 }
  0x24   :  { %s6599_s20 = sld [smem:[%s8344_s0 + %s6449_s22]]   ;;  %s6453_s22 = smov 28  }
  0x25   :  { %8375 = sst [smem:[#allocation12_spill]] %s6594_s12 }
  0x26   :  { %s6604_s4 = sld [smem:[%s8344_s0 + %s6450_s28]]   ;;  %s6454_s28 = smov 29  }
  0x27   :  { %s6609_s21 = sld [smem:[%s8344_s0 + %s6451_s7]]   ;;  %s6455_s7 = smov 30  }
  0x28   :  { %s6614_s12 = sld [smem:[%s8344_s0 + %s6452_s15]]   ;;  %s6456_s15 = smov 31  }
  0x2a   :  { %8376 = sst [smem:[#allocation13_spill]] %s6599_s20 }
  0x2b   :  { %s6619_s20 = sld [smem:[%s8344_s0 + %s6453_s22]]   ;;  %s6457_s22 = smov 32  }
  0x2c   :  { %8377 = sst [smem:[#allocation14_spill]] %s6604_s4 }
  0x2d   :  { %8378 = sst [smem:[#allocation15_spill]] %s6609_s21 }
  0x2e   :  { %8379 = sst [smem:[#allocation16_spill]] %s6614_s12 }
  0x2f   :  { %s6624_s4 = sld [smem:[%s8344_s0 + %s6454_s28]]  }
  0x30   :  { %s6629_s21 = sld [smem:[%s8344_s0 + %s6455_s7]]   ;;  %s6644_s7 = smov 0  }
  0x31   :  { %8380 = sst [smem:[#allocation17_spill]] %s6619_s20 }
  0x32   :  { %s6634_s12 = sld [smem:[%s8344_s0 + %s6456_s15]]  }
  0x33   :  { %s5389_s20 = sld [smem:[%s8344_s0 + %s6457_s22]]  }
  0x35   :  { %8381 = sst [smem:[#allocation18_spill]] %s6624_s4 }
  0x36   :  { %s6642_s4 = sld [smem:[%s8344_s0 + %s6458_s1]]  }
  0x39   :  { %v72_v0 = vstv %s5389_s20 }
  0x3a   :  { %73 = vst [vmem:[#allocation2] sm:$0x1] %v72_v0 }
  0x3b LB: > { %s5391_s10 = sadd.s32 4294967295, %s6424_s7   ;;  %p5395_p0 = scmp.ge.s32.totalorder %s6424_s7, 1  ;;  %s6424_s7 = sphi %s6644_s7, %s79_s7  }
  0x3c   : > { %p959_p1 = scmp.lt.s32.totalorder %s6424_s7, 3 }
  0x3e   : > { %p960_p2 = pnand %p5395_p0, %p959_p1 }
  0x3f   : > { %v1085_v1 = vld [vmem:[%s6504_s25] sm:$0xff] (!%p960_p2)  ;;  %v1086_v2 = vld [vmem:[%s6504_s25 + $0x8] sm:$0xff] (!%p960_p2)  ;;  %p1059_p3 = scmp.lt.s32.totalorder (!%p960_p2), %s5391_s10, 1  ;;  %v6459_v3 = vmov (!%p960_p2), 0.0|0.0   ;;  %vm6460_vm0 = vmmov (!%p960_p2), 0   ;;  %v6461_v5 = vmov (!%p960_p2), 0.0  }
  0x40   : > { %963 = sbr.rel (%p960_p2) target bundleno = 4281 (0x10b9), region = 152  ;;  %6094 = vmatprep.subr.bf16.mxu0 (!%p960_p2), %v6459_v3  ;;  %v6095_v4 = vpack.c.bf16 (!%p960_p2), %v1086_v2, %v1085_v1  ;;  %5725 = vmatprep.mubr.msk.f32.mxu0 (!%p960_p2), %vm6460_vm0, %v6461_v5  ;;  %v1088_v6 = vld [vmem:[%s6514_s3] sm:$0xff] (!%p960_p2)  ;;  %v1089_v7 = vld [vmem:[%s6514_s3 + $0x8] sm:$0xff] (!%p960_p2)  ;;  %vm1238_vm1 = vcmask (!%p960_p2), 130048   ;;  %v1090_v10 = vld [vmem:[%s6514_s3 + $0x10] sm:$0xff] (!%p960_p2)  ;;  %vm1326_vm2 = vcmask (!%p960_p2), 261120  }
  0x41   : > { %6097 = vmatprep.subr.bf16.mxu1 (!%p960_p2), %v6459_v3  ;;  %v6098_v8 = vpack.c.bf16 (!%p960_p2), %v1089_v7, %v1088_v6  ;;  %5736 = vmatprep.mubr.msk.f32.mxu1 (!%p960_p2), %vm6460_vm0, %v6461_v5  ;;  %v1091_v11 = vld [vmem:[%s6514_s3 + $0x18] sm:$0xff] (!%p960_p2)  ;;  %v5404_v13 = vld [vmem:[%s6509_s29] ss:$0 sm:$0xff] (!%p960_p2)  ;;  %v1094_v20 = vld [vmem:[%s6524_s14 + $0x8] sm:$0xff] (!%p960_p2)  ;;  %v6462_v25 = vmov (!%p960_p2), 0   ;;  %vm1503_vm3 = vcmask (!%p960_p2), 1042432  }
  0x42   : > { %6096 = vmatpush3.bf16.msra.mxu0 (!%p960_p2), %v6095_v4  ;;  %v6101_v12 = vpack.c.bf16 (!%p960_p2), %v1091_v11, %v1090_v10  ;;  %v1093_v19 = vld [vmem:[%s6524_s14] sm:$0xff] (!%p960_p2)  ;;  %v1095_v22 = vld [vmem:[%s6524_s14 + $0x10] sm:$0xff] (!%p960_p2)  ;;  %v1096_v23 = vld [vmem:[%s6524_s14 + $0x18] sm:$0xff] (!%p960_p2)  ;;  %6376 = vset.pattern.permute.xlu0 (!%p960_p2), %v6462_v25  ;;  %vm1508_vm4 = vcmask (!%p960_p2), 1046528   ;;  %s8361_s16 = smov (!%p960_p2), 32   ;;  %vm1515_vm5 = vcmask (!%p960_p2), 1045504  }
  0x43   : > { %6099 = vmatpush3.bf16.msra.mxu1 (!%p960_p2), %v6098_v8  ;;  %6103 = vmatprep.subr.bf16.mxu0 (!%p960_p2), %v6459_v3  ;;  %v6104_v21 = vpack.c.bf16 (!%p960_p2), %v1094_v20, %v1093_v19  ;;  %v6107_v24 = vpack.c.bf16 (!%p960_p2), %v1096_v23, %v1095_v22  ;;  %v5407_v27 = vld [vmem:[%s6519_s8] ss:$0 sm:$0xff] (!%p960_p2)  ;;  %v1099_v37 = vld [vmem:[%s6534_s24 + $0x8] sm:$0xff] (!%p960_p2)  ;;  %v1100_v38 = vld [vmem:[%s6534_s24 + $0x10] sm:$0xff] (!%p960_p2)  ;;  %vm1540_vm6 = vcmask (!%p960_p2), 1041408   ;;  %s6464_s18 = smov (!%p960_p2), 64  }
  0x44   : > { %6100 = vmatprep.subr.bf16.mxu1 (!%p960_p2), %v6459_v3  ;;  %6377 = vset.pattern.permute.xlu1 (!%p960_p2), %v6462_v25  ;;  %v1098_v36 = vld [vmem:[%s6534_s24] sm:$0xff] (!%p960_p2)  ;;  %v1101_v40 = vld [vmem:[%s6534_s24 + $0x18] sm:$0xff] (!%p960_p2)  ;;  %v1103_v43 = vld [vmem:[%s6534_s24 + $0x28] sm:$0xff] (!%p960_p2)  ;;  %vm1522_vm7 = vcmask (!%p960_p2), 1044480   ;;  %s6465_s22 = smov (!%p960_p2), 96   ;;  %vm1529_vm8 = vcmask (!%p960_p2), 1043456  }
  0x45   : > { %v6110_v39 = vpack.c.bf16 (!%p960_p2), %v1099_v37, %v1098_v36  ;;  %v6113_v41 = vpack.c.bf16 (!%p960_p2), %v1101_v40, %v1100_v38  ;;  %v1102_v42 = vld [vmem:[%s6534_s24 + $0x20] sm:$0xff] (!%p960_p2)  ;;  %v1104_v45 = vld [vmem:[%s6534_s24 + $0x30] sm:$0xff] (!%p960_p2)  ;;  %v1105_v46 = vld [vmem:[%s6534_s24 + $0x38] sm:$0xff] (!%p960_p2)  ;;  %vm1548_vm9 = vcmask (!%p960_p2), 523264   ;;  %vm1550_vm10 = vcmask (!%p960_p2), 785408   ;;  %s8382_s23 = sld [smem:[#allocation5_spill]] (!%p960_p2) }
  0x46   : > { %v6116_v44 = vpack.c.bf16 (!%p960_p2), %v1103_v43, %v1102_v42  ;;  %v6119_v47 = vpack.c.bf16 (!%p960_p2), %v1105_v46, %v1104_v45  ;;  %v1106_v48 = vld [vmem:[%s6534_s24 + $0x40] sm:$0xff] (!%p960_p2)  ;;  %v1107_v49 = vld [vmem:[%s6534_s24 + $0x48] sm:$0xff] (!%p960_p2)  ;;  %v1108_v51 = vld [vmem:[%s6534_s24 + $0x50] sm:$0xff] (!%p960_p2)  ;;  %vm1639_vm12 = vcmask (!%p960_p2), 1040384   ;;  %vm1965_vm13 = vcmask (!%p960_p2), 64512   ;;  %s8383_s1 = sld [smem:[#allocation4_spill]] (!%p960_p2) }
  0x47   : > { %s8406_s10 = smov (!%p1059_p3, %s5391_s10), 1  ;;  %6102 = vmatpush3.bf16.msra.mxu1 %v6101_v12  ;;  %v6122_v50 = vpack.c.bf16 %v1107_v49, %v1106_v48  ;;  %v1109_v52 = vld [vmem:[%s6534_s24 + $0x58] sm:$0xff]  ;;  %v1110_v54 = vld [vmem:[%s6534_s24 + $0x60] sm:$0xff]  ;;  %v1111_v55 = vld [vmem:[%s6534_s24 + $0x68] sm:$0xff]  ;;  %s8384_s2 = sld [smem:[#allocation7_spill]] }
  0x48   : > { %s5396_s0 = sshll.u32 %s8406_s10, 3  ;;  %6109 = vmatprep.subr.bf16.mxu1 %v6459_v3  ;;  %s1065_s11 = scalar_lea.vmem %s6484_s9, %s8406_s10  ;;  %v6125_v53 = vpack.c.bf16 %v1109_v52, %v1108_v51  ;;  %v6128_v56 = vpack.c.bf16 %v1111_v55, %v1110_v54  ;;  %v1112_v57 = vld [vmem:[%s6534_s24 + $0x70] sm:$0xff]  ;;  %v1113_v58 = vld [vmem:[%s6534_s24 + $0x78] sm:$0xff]  ;;  %v1114_v60 = vld [vmem:[%s6534_s24 + $0x80] sm:$0xff] }
  0x49   : > { %s1062_s20 = scalar_lea.vmem %s6479_s5, %s5396_s0  ;;  %v5406_v15 = vld [vmem:[%s1065_s11] ss:$0 sm:$0xff]  ;;  %s1069_s15 = scalar_lea.vmem %s6489_s13, %s5396_s0  ;;  %v6131_v59 = vpack.c.bf16 %v1113_v58, %v1112_v57  ;;  %v1115_v61 = vld [vmem:[%s6534_s24 + $0x88] sm:$0xff]  ;;  %v1116_v63 = vld [vmem:[%s6534_s24 + $0x90] sm:$0xff] }
  0x4a   : > { %v1231_v9 = vld [vmem:[%s1062_s20] sm:$0xff]  ;;  %v6134_v62 = vpack.c.bf16 %v1115_v61, %v1114_v60  ;;  %v1117_v0 = vld [vmem:[%s6534_s24 + $0x98] sm:$0xff]  ;;  %v1119_v4 = vld [vmem:[%s6534_s24 + $0xa8] sm:$0xff]  ;;  %s5511_s26 = sshll.u32 %s8406_s10, 5  ;;  %s8385_s0 = sld [smem:[#allocation6_spill]] }
  0x4b   : > { %5726 = vmatmul.mubr.msk.f32.vlgmr.msra.gmra.mrb[0].mxu0 %vm1238_vm1, %v1231_v9  ;;  %v1493_v26 = vld [vmem:[%s1069_s15] sm:$0xff]  ;;  %v6137_v1 = vpack.c.bf16 %v1117_v0, %v1116_v63  ;;  %v1120_v7 = vld [vmem:[%s6534_s24 + $0xb0] sm:$0xff]  ;;  %v1121_v8 = vld [vmem:[%s6534_s24 + $0xb8] sm:$0xff]  ;;  %s1074_s28 = scalar_lea.vmem %s6494_s17, %s5511_s26  ;;  %s8363_s20 = smov 16  }
  0x4c   : > { %5747 = vmatprep.mubr.msk.f32.mxu0 %vm6460_vm0, %v6461_v5  ;;  %6105 = vmatpush3.bf16.msra.mxu0 %v6104_v21  ;;  %v1118_v2 = vld [vmem:[%s6534_s24 + $0xa0] sm:$0xff]  ;;  %v6143_v9 = vpack.c.bf16 %v1121_v8, %v1120_v7  ;;  %v1125_v25 = vld [vmem:[%s6534_s24 + $0xd8] sm:$0xff]  ;;  %v1129_v60 = vld [vmem:[%s6544_s6 + $0x10] sm:$0xff]  ;;  %s8386_s11 = sld [smem:[#allocation8_spill]]  ;;  %s8387_s15 = sld [smem:[#allocation9_spill]] }
  0x4d   : > { %6106 = vmatprep.subr.bf16.mxu0 %v6459_v3  ;;  %1496 = vperm.xlu0 %6376, %v1493_v26   ;;  %v6140_v6 = vpack.c.bf16 %v1119_v4, %v1118_v2  ;;  %v5410_v10 = vld [vmem:[%s6529_s19] ss:$0 sm:$0xff]  ;;  %v1134_v7 = vld [vmem:[%s6544_s6 + $0x38] sm:$0xff]  ;;  %s8390_s26 = sld [smem:[#allocation3_spill]] }
  0x4e   : > { %v1127_v58 = vld [vmem:[%s6544_s6] sm:$0xff] }
  0x4f   : > { %v1131_v0 = vld [vmem:[%s6544_s6 + $0x20] sm:$0xff] }
  0x50   : > { %6108 = vmatpush3.bf16.msra.mxu0 %v6107_v24  ;;  %v1124_v24 = vld [vmem:[%s6534_s24 + $0xd0] sm:$0xff]  ;;  %v5413_v4 = vld [vmem:[%s6539_s30] ss:$0 sm:$0xff] }
  0x51   : > { %6151 = vmatprep.subr.bf16.mxu0 %v6459_v3  ;;  %v6149_v26 = vpack.c.bf16 %v1125_v25, %v1124_v24 }
  0xcc   : > { %v1497_v21 = vpop.permute.xlu0 %1496 }
 0x11e   : > { %v1308_v14 = vpop.f32.mrb[0].mxu0 }
 0x11f   : > { %v1309_v16 = vadd.f32 %v5404_v13, %v1308_v14  ;;  %v5727_v17 = vpop.f32.mrb[1].mxu0 }
 0x120   : > { %v1122_v17 = vld [vmem:[%s6534_s24 + $0xc0] sm:$0xff] }
 0x121   : > { %v1319_v18 = vadd.f32 %v5406_v15, %v1309_v16 }
 0x123   : > { %5737 = vmatmul.mubr.msk.f32.vlgmr.msra.gmra.mrb[0].mxu1 %vm1326_vm2, %v1319_v18  ;;  %v1123_v18 = vld [vmem:[%s6534_s24 + $0xc8] sm:$0xff] }
 0x124   : > { %6111 = vmatpush1.bf16.msra.mxu1 %v6110_v39  ;;  %v6146_v19 = vpack.c.bf16 %v1123_v18, %v1122_v17 }
 0x125   : > { %6112 = vmatprep.subr.bf16.mxu1 %v6459_v3 }
 0x128   : > { %6114 = vmatpush1.bf16.msra.mxu1 %v6113_v41 }
 0x129   : > { %6115 = vmatprep.subr.bf16.mxu1 %v6459_v3 }
 0x12c   : > { %6117 = vmatpush1.bf16.msra.mxu1 %v6116_v44 }
 0x12d   : > { %6118 = vmatprep.subr.bf16.mxu1 %v6459_v3 }
 0x130   : > { %6120 = vmatpush1.bf16.msra.mxu1 %v6119_v47 }
 0x131   : > { %6121 = vmatprep.subr.bf16.mxu1 %v6459_v3 }
 0x134   : > { %6123 = vmatpush1.bf16.msra.mxu1 %v6122_v50 }
 0x135   : > { %6124 = vmatprep.subr.bf16.mxu1 %v6459_v3 }
 0x138   : > { %6126 = vmatpush1.bf16.msra.mxu1 %v6125_v53 }
 0x139   : > { %6127 = vmatprep.subr.bf16.mxu1 %v6459_v3 }
 0x13c   : > { %6129 = vmatpush1.bf16.msra.mxu1 %v6128_v56 }
 0x13d   : > { %6130 = vmatprep.subr.bf16.mxu1 %v6459_v3 }
 0x140   : > { %6132 = vmatpush1.bf16.msra.mxu1 %v6131_v59  ;;  %v1128_v59 = vld [vmem:[%s6544_s6 + $0x8] sm:$0xff] }
 0x141   : > { %6133 = vmatprep.subr.bf16.mxu1 %v6459_v3  ;;  %v6152_v61 = vpack.c.bf16 %v1128_v59, %v1127_v58  ;;  %v1154_v58 = vld [vmem:[%s6544_s6 + $0xd8] sm:$0xff] }
 0x144   : > { %6135 = vmatpush1.bf16.msra.mxu1 %v6134_v62  ;;  %v1130_v62 = vld [vmem:[%s6544_s6 + $0x18] sm:$0xff] }
 0x145   : > { %6136 = vmatprep.subr.bf16.mxu1 %v6459_v3  ;;  %v6155_v63 = vpack.c.bf16 %v1130_v62, %v1129_v60  ;;  %v1156_v62 = vld [vmem:[%s6544_s6 + $0xe8] sm:$0xff] }
 0x148   : > { %6138 = vmatpush1.bf16.msra.mxu1 %v6137_v1  ;;  %v1132_v1 = vld [vmem:[%s6544_s6 + $0x28] sm:$0xff] }
 0x149   : > { %6139 = vmatprep.subr.bf16.mxu1 %v6459_v3  ;;  %v6158_v2 = vpack.c.bf16 %v1132_v1, %v1131_v0  ;;  %v1157_v0 = vld [vmem:[%s6544_s6 + $0xf0] sm:$0xff]  ;;  %v1158_v1 = vld [vmem:[%s6544_s6 + $0xf8] sm:$0xff] }
 0x14c   : > { %6141 = vmatpush1.bf16.msra.mxu1 %v6140_v6  ;;  %v1133_v6 = vld [vmem:[%s6544_s6 + $0x30] sm:$0xff] }
 0x14d   : > { %6142 = vmatprep.subr.bf16.mxu1 %v6459_v3  ;;  %v6161_v8 = vpack.c.bf16 %v1134_v7, %v1133_v6  ;;  %v1956_v6 = vld [vmem:[%s1074_s28 + $0x8] sm:$0xff]  ;;  %v1957_v7 = vld [vmem:[%s1074_s28 + $0x10] sm:$0xff] }
 0x150   : > { %6144 = vmatpush1.bf16.msra.mxu1 %v6143_v9 }
 0x151   : > { %6145 = vmatprep.subr.bf16.mxu1 %v6459_v3 }
 0x154   : > { %6147 = vmatpush1.bf16.msra.mxu1 %v6146_v19 }
 0x155   : > { %6148 = vmatprep.subr.bf16.mxu1 %v6459_v3 }
 0x158   : > { %6150 = vmatpush1.bf16.msra.mxu1 %v6149_v26 }
 0x1f6   : > { %v1396_v28 = vpop.f32.mrb[0].mxu1 }
 0x1f7   : > { %v1397_v29 = vadd.f32 %v5407_v27, %v1396_v28  ;;  %v5738_v30 = vpop.f32.mrb[1].mxu1 }
 0x1f9   : > { %v5409_v31 = vmul.f32 -1.442695, %v1397_v29 }
 0x1fb   : > { %6378 = vpow2.f32 %v5409_v31 }
 0x205   : > { %v6379_v32 = vpop.eup %6378 }
 0x206   : > { %v1403_v33 = vadd.f32 1.0, %v6379_v32 }
 0x208   : > { %6380 = vrcp.f32 %v1403_v33 }
 0x212   : > { %v6381_v34 = vpop.eup %6380 }
 0x213   : > { %v1406_v35 = vmul.f32 %v6381_v34, %v1397_v29 }
 0x215   : > { %5748 = vmatmul.mubr.msk.f32.vlgmr.msra.gmra.mrb[2].mxu0 %vm1326_vm2, %v1406_v35 }
 0x216   : > { %5766 = vmatprep.mubr.msk.f32.mxu0 %vm6460_vm0, %v6461_v5  ;;  %6153 = vmatpush3.bf16.msra.mxu0 %v6152_v61  ;;  %v1155_v61 = vld [vmem:[%s6544_s6 + $0xe0] sm:$0xff] }
 0x217   : > { %6154 = vmatprep.subr.bf16.mxu0 %v6459_v3 }
 0x21a   : > { %6156 = vmatpush3.bf16.msra.mxu0 %v6155_v63  ;;  %v6194_v63 = vpack.c.bf16 %v1156_v62, %v1155_v61 }
 0x21b   : > { %6157 = vmatprep.subr.bf16.mxu0 %v6459_v3 }
 0x21e   : > { %6159 = vmatpush3.bf16.msra.mxu0 %v6158_v2  ;;  %v6197_v2 = vpack.c.bf16 %v1158_v1, %v1157_v0 }
 0x21f   : > { %6160 = vmatprep.subr.bf16.mxu0 %v6459_v3 }
 0x222   : > { %6162 = vmatpush3.bf16.msra.mxu0 %v6161_v8  ;;  %v1958_v8 = vld [vmem:[%s1074_s28 + $0x18] sm:$0xff] }
 0x223   : > { %6163 = vmatprep.subr.bf16.mxu0 %v6459_v3 }
 0x2e8   : > { %v1482_v11 = vpop.f32.mrb[2].mxu0 }
 0x2e9   : > { %v1483_v12 = vadd.f32 %v5410_v10, %v1482_v11  ;;  %v5749_v13 = vpop.f32.mrb[3].mxu0 }
 0x2eb   : > { %v5412_v14 = vmul.f32 -1.442695, %v1483_v12 }
 0x2ed   : > { %6382 = vpow2.f32 %v5412_v14 }
 0x2f7   : > { %v6383_v15 = vpop.eup %6382 }
 0x2f8   : > { %v1489_v16 = vadd.f32 1.0, %v6383_v15 }
 0x2fa   : > { %6384 = vrcp.f32 %v1489_v16 }
 0x304   : > { %v6385_v20 = vpop.eup %6384 }
 0x305   : > { %v1492_v22 = vmul.f32 %v6385_v20, %v1483_v12  ;;  %v1135_v20 = vld [vmem:[%s6544_s6 + $0x40] sm:$0xff] }
 0x307   : > { %v1499_v23 = vmul.f32 %v1497_v21, %v1492_v22  ;;  %v1136_v21 = vld [vmem:[%s6544_s6 + $0x48] sm:$0xff] }
 0x309   : > { %v1501_v27 = vrot.slane %v1499_v23, 5 }
 0x30b   : > { %v1504_v28 = vsel %vm1503_vm3, 0.0, %v1501_v27  ;;  %v1505_v29 = vsel %vm1503_vm3, %v1501_v27, 0.0  ;;  %v6164_v27 = vpack.c.bf16 %v1136_v21, %v1135_v20 }
 0x30c   : > { %v1534_v30 = vrot.slane %v1504_v28, 5  ;;  %v1535_v31 = vrot.slane %v1505_v29, 5  ;;  %v1509_v32 = vrot.slane %v1504_v28, 1  ;;  %v1510_v33 = vrot.slane %v1505_v29, 1 }
 0x30d   : > { %v1516_v34 = vrot.slane %v1504_v28, 2  ;;  %v1517_v35 = vrot.slane %v1505_v29, 2  ;;  %v1541_v38 = vrot.slane %v1504_v28, 6  ;;  %v1542_v39 = vrot.slane %v1505_v29, 6 }
 0x30e   : > { %v1536_v36 = vsel %vm1503_vm3, %v1534_v30, %v1535_v31  ;;  %v1511_v37 = vsel %vm1508_vm4, %v1509_v32, %v1510_v33  ;;  %v1523_v42 = vrot.slane %v1504_v28, 3  ;;  %v1524_v43 = vrot.slane %v1505_v29, 3  ;;  %v1139_v32 = vld [vmem:[%s6544_s6 + $0x60] sm:$0xff]  ;;  %v1140_v33 = vld [vmem:[%s6544_s6 + $0x68] sm:$0xff] }
 0x30f   : > { %1537 = vrot.lane.b32.xlu1 %v1536_v36, %s8361_s16  ;;  %1512 = vrot.lane.b32.xlu0 %v1511_v37, %s8361_s16  ;;  %v1518_v40 = vsel %vm1515_vm5, %v1516_v34, %v1517_v35  ;;  %v1543_v41 = vsel %vm1540_vm6, %v1541_v38, %v1542_v39  ;;  %v1531_v45 = vrot.slane %v1505_v29, 4  ;;  %v1530_v46 = vrot.slane %v1504_v28, 4  ;;  %v1138_v29 = vld [vmem:[%s6544_s6 + $0x58] sm:$0xff]  ;;  %v1141_v35 = vld [vmem:[%s6544_s6 + $0x70] sm:$0xff] }
 0x310   : > { %v1525_v44 = vsel %vm1522_vm7, %v1523_v42, %v1524_v43  ;;  %v6170_v34 = vpack.c.bf16 %v1140_v33, %v1139_v32  ;;  %v1142_v36 = vld [vmem:[%s6544_s6 + $0x78] sm:$0xff]  ;;  %v1143_v38 = vld [vmem:[%s6544_s6 + $0x80] sm:$0xff]  ;;  %v1144_v39 = vld [vmem:[%s6544_s6 + $0x88] sm:$0xff] }
 0x311   : > { %v1532_v49 = vsel %vm1529_vm8, %v1530_v46, %v1531_v45  ;;  %v6173_v37 = vpack.c.bf16 %v1142_v36, %v1141_v35  ;;  %v1146_v42 = vld [vmem:[%s6544_s6 + $0x98] sm:$0xff]  ;;  %v1148_v45 = vld [vmem:[%s6544_s6 + $0xa8] sm:$0xff]  ;;  %v1168_v32 = vld [vmem:[%s8384_s2 + $0x10] sm:$0xff] }
 0x312   : > { %v1169_v33 = vld [vmem:[%s8384_s2 + $0x18] sm:$0xff] }
 0x313   : > { %1519 = vrot.lane.b32.xlu1 %v1518_v40, %s6464_s18  ;;  %1544 = vrot.lane.b32.xlu0 %v1543_v41, %s6464_s18  ;;  %v6176_v40 = vpack.c.bf16 %v1144_v39, %v1143_v38  ;;  %v1145_v41 = vld [vmem:[%s6544_s6 + $0x90] sm:$0xff]  ;;  %v6211_v36 = vpack.c.bf16 %v1169_v33, %v1168_v32  ;;  %v5429_v32 = vld [vmem:[%s8386_s11] ss:$0 sm:$0xff]  ;;  %s8388_s18 = sld [smem:[#allocation10_spill]]  ;;  %s8392_s11 = sld [smem:[#allocation12_spill]] }
 0x314   : > { %v6179_v43 = vpack.c.bf16 %v1146_v42, %v1145_v41  ;;  %v1170_v41 = vld [vmem:[%s8384_s2 + $0x20] sm:$0xff]  ;;  %v1171_v42 = vld [vmem:[%s8384_s2 + $0x28] sm:$0xff] }
 0x317   : > { %1526 = vrot.lane.b32.xlu1 %v1525_v44, %s6465_s22  ;;  %v1147_v44 = vld [vmem:[%s6544_s6 + $0xa0] sm:$0xff]  ;;  %s8389_s22 = sld [smem:[#allocation11_spill]] }
 0x381   : > { %v1538_v47 = vpop.permute.xlu1 %1537  ;;  %v1513_v48 = vpop.permute.xlu0 %1512 }
 0x382   : > { %v1552_v50 = vsel %vm1326_vm2, %v1532_v49, %v1538_v47  ;;  %v1547_v54 = vsel %vm1326_vm2, %v1504_v28, %v1513_v48  ;;  %v1137_v28 = vld [vmem:[%s6544_s6 + $0x50] sm:$0xff]  ;;  %v6182_v47 = vpack.c.bf16 %v1148_v45, %v1147_v44  ;;  %v1150_v49 = vld [vmem:[%s6544_s6 + $0xb8] sm:$0xff] }
 0x383   : > { %v6167_v31 = vpack.c.bf16 %v1138_v29, %v1137_v28  ;;  %v1149_v48 = vld [vmem:[%s6544_s6 + $0xb0] sm:$0xff]  ;;  %v1167_v28 = vld [vmem:[%s8384_s2 + $0x8] sm:$0xff] }
 0x385   : > { %v1520_v51 = vpop.permute.xlu1 %1519  ;;  %v1545_v52 = vpop.permute.xlu0 %1544 }
 0x386   : > { %v1553_v53 = vsel %vm1548_vm9, %v1552_v50, %v1545_v52  ;;  %v1549_v55 = vsel %vm1548_vm9, %v1547_v54, %v1520_v51  ;;  %v6185_v51 = vpack.c.bf16 %v1150_v49, %v1149_v48  ;;  %v1151_v52 = vld [vmem:[%s6544_s6 + $0xc0] sm:$0xff] }
 0x387   : > { %5414 = vmatprep.mubr.msk.f32.mxu1 %vm1550_vm10, %v1553_v53  ;;  %v1152_v53 = vld [vmem:[%s6544_s6 + $0xc8] sm:$0xff] }
 0x389   : > { %v1527_v56 = vpop.permute.xlu1 %1526 }
 0x38a   : > { %v1551_v57 = vsel %vm1550_vm10, %v1549_v55, %v1527_v56  ;;  %v6188_v56 = vpack.c.bf16 %v1152_v53, %v1151_v52  ;;  %vm2248_vm10 = vcmask 392192  }
 0x38b   : > { %1628 = vmatmul.mubr.f32.vlgmr.msra.gmra.mrb[2].mxu1 %v1551_v57  ;;  %v1153_v57 = vld [vmem:[%s6544_s6 + $0xd0] sm:$0xff] }
 0x38c   : > { %v6191_v60 = vpack.c.bf16 %v1154_v58, %v1153_v57 }
 0x45e   : > { %v1629_v9 = vpop.f32.mrb[2].mxu1 }
 0x45f   : > { %v1630_v10 = vadd.f32 %v5413_v4, %v1629_v9  ;;  %v1631_v11 = vpop.f32.mrb[3].mxu1  ;;  %v1955_v4 = vld [vmem:[%s1074_s28] sm:$0xff] }
 0x460   : > { %5828 = vmatprep.mubr.msk.f32.mxu1 %vm1965_vm13, %v1955_v4  ;;  %v5415_v11 = vld [vmem:[%s8383_s1] ss:$0 sm:$0xff]  ;;  %s8352_s1 = sshll.u32 %s8406_s10, 7 }
 0x461   : > { %vm1633_vm11 = vcmp.ge.f32.partialorder %v1630_v10, 0.0  ;;  %v1634_v12 = vmul.f32 0.1, %v1630_v10  ;;  %s7002_s28 = scalar_lea.vmem %s8390_s26, %s8352_s1  ;;  %s8394_s26 = sld [smem:[#allocation15_spill]] }
 0x462   : > { %s8353_s1 = smov 48  }
 0x463   : > { %v1635_v13 = vsel %vm1633_vm11, %v1630_v10, %v1634_v12 }
 0x464   : > { %v1637_v14 = vrot.slane %v1635_v13, 7 }
 0x466   : > { %v1641_v15 = vsel %vm1639_vm12, %v1637_v14, 0.0  ;;  %v1640_v16 = vsel %vm1639_vm12, 0.0, %v1637_v14 }
 0x467   : > { %v1643_v17 = vrot.slane %v1640_v16, 7  ;;  %v1803_v18 = vrot.slane %v1641_v15, 7 }
 0x469   : > { %1644 = vrot.lane.b32.xlu0 %v1643_v17, %s8361_s16  ;;  %v1804_v19 = vsel %vm1639_vm12, %v1643_v17, %v1803_v18 }
 0x46a   : > { %1805 = vrot.lane.b32.xlu1 %v1804_v19, %s8361_s16 }
 0x4db   : > { %v1645_v22 = vpop.permute.xlu0 %1644 }
 0x4dc   : > { %v1647_v23 = vsel %vm1326_vm2, %v1640_v16, %v1645_v22  ;;  %v1648_v24 = vsel %vm1326_vm2, %v1641_v15, %v1645_v22  ;;  %v1806_v46 = vpop.permute.xlu1 %1805 }
 0x4dd   : > { %v1657_v25 = vrot.slane %v1647_v23, 1  ;;  %v1658_v26 = vrot.slane %v1648_v24, 1  ;;  %v1808_v50 = vsel %vm1326_vm2, %v1641_v15, %v1806_v46  ;;  %v1810_v54 = vrot.slane %v1647_v23, 2  ;;  %v1161_v24 = vld [vmem:[%s8382_s23 + $0x8] sm:$0xff] }
 0x4de   : > { %v1811_v55 = vrot.slane %v1808_v50, 2  ;;  %v6215_v46 = vpack.c.bf16 %v1171_v42, %v1170_v41 }
 0x4df   : > { %v1659_v30 = vsel %vm1508_vm4, %v1657_v25, %v1658_v26  ;;  %v1162_v25 = vld [vmem:[%s8382_s23 + $0x10] sm:$0xff]  ;;  %v1163_v26 = vld [vmem:[%s8382_s23 + $0x18] sm:$0xff] }
 0x4e0   : > { %5767 = vmatmul.mubr.msk.f32.vlgmr.msra.gmra.mrb[4].mxu0 %vm1548_vm9, %v1659_v30  ;;  %v1812_v59 = vsel %vm1515_vm5, %v1810_v54, %v1811_v55 }
 0x4e1   : > { %6165 = vmatpush3.bf16.msra.mxu0 %v6164_v27  ;;  %5785 = vmatprep.mubr.msk.f32.mxu0 %vm6460_vm0, %v6461_v5  ;;  %v1166_v27 = vld [vmem:[%s8384_s2] sm:$0xff] }
 0x4e2   : > { %6166 = vmatprep.subr.bf16.mxu0 %v6459_v3  ;;  %v6207_v29 = vpack.c.bf16 %v1167_v28, %v1166_v27 }
 0x4e5   : > { %6168 = vmatpush3.bf16.msra.mxu0 %v6167_v31 }
 0x4e6   : > { %6169 = vmatprep.subr.bf16.mxu0 %v6459_v3 }
 0x4e9   : > { %6171 = vmatpush3.bf16.msra.mxu0 %v6170_v34 }
 0x4ea   : > { %6172 = vmatprep.subr.bf16.mxu0 %v6459_v3 }
 0x4ed   : > { %6174 = vmatpush3.bf16.msra.mxu0 %v6173_v37 }
 0x4ee   : > { %6175 = vmatprep.subr.bf16.mxu0 %v6459_v3 }
 0x4f0   : > { %5786 = vmatmul.mubr.msk.f32.vlgmr.msra.gmra.mrb[6].mxu0 %vm1548_vm9, %v1659_v30  ;;  %v5420_v30 = vld [vmem:[%s8385_s0] ss:$0 sm:$0xff]  ;;  %s8391_s0 = sld [smem:[#allocation13_spill]] }
 0x4f1   : > { %6177 = vmatpush3.bf16.msra.mxu0 %v6176_v40  ;;  %5804 = vmatprep.mubr.msk.f32.mxu0 %vm6460_vm0, %v6461_v5 }
 0x4f2   : > { %6178 = vmatprep.subr.bf16.mxu0 %v6459_v3 }
 0x4f5   : > { %6180 = vmatpush3.bf16.msra.mxu0 %v6179_v43 }
 0x4f6   : > { %6181 = vmatprep.subr.bf16.mxu0 %v6459_v3 }
 0x4f9   : > { %6183 = vmatpush3.bf16.msra.mxu0 %v6182_v47 }
 0x4fa   : > { %6184 = vmatprep.subr.bf16.mxu0 %v6459_v3 }
 0x4fd   : > { %6186 = vmatpush3.bf16.msra.mxu0 %v6185_v51 }
 0x4fe   : > { %6187 = vmatprep.subr.bf16.mxu0 %v6459_v3 }
 0x500   : > { %5805 = vmatmul.mubr.msk.f32.vlgmr.msra.gmra.mrb[8].mxu0 %vm1548_vm9, %v1812_v59 }
 0x501   : > { %6189 = vmatpush3.bf16.msra.mxu0 %v6188_v56  ;;  %5823 = vmatprep.mubr.msk.f32.mxu0 %vm6460_vm0, %v6461_v5  ;;  %v1164_v5 = vld [vmem:[%s6559_s27] sm:$0xff] }
 0x502   : > { %6190 = vmatprep.subr.bf16.mxu0 %v6459_v3  ;;  %5826 = vmatprep.subr.mxu1 %v1164_v5 }
 0x503   : > { %5827 = vmatpush3.msra.mxu1 %v1164_v5 }
 0x504   : > { %5829 = vmatmul.mubr.msk.f32.vlgmr.msra.gmra.mrb[4].mxu1 %vm1965_vm13, %v1956_v6 }
 0x505   : > { %6192 = vmatpush3.bf16.msra.mxu0 %v6191_v60  ;;  %5831 = vmatprep.mubr.msk.f32.mxu1 %vm1965_vm13, %v1957_v7 }
 0x506   : > { %6193 = vmatprep.subr.bf16.mxu0 %v6459_v3 }
 0x508   : > { %5832 = vmatmul.mubr.msk.f32.gmra.mrb[6].mxu1 %vm1965_vm13, %v1958_v8 }
 0x509   : > { %6195 = vmatpush3.bf16.msra.mxu0 %v6194_v63 }
 0x50a   : > { %6196 = vmatprep.subr.bf16.mxu0 %v6459_v3  ;;  %v1160_v3 = vld [vmem:[%s8382_s23] sm:$0xff] }
 0x50b   : > { %5842 = vmatprep.mubr.msk.f32.mxu1 %vm1326_vm2, %v1160_v3 }
 0x50d   : > { %6198 = vmatpush3.bf16.msra.mxu0 %v6197_v2 }
 0x510   : > { %5824 = vmatmul.mubr.msk.f32.vlgmr.msra.gmra.mrb[10].mxu0 %vm1548_vm9, %v1812_v59 }
 0x5b3   : > { %v1728_v9 = vpop.f32.mrb[4].mxu0 }
 0x5b4   : > { %v5768_v10 = vpop.f32.mrb[5].mxu0  ;;  %v1729_v13 = vadd.f32 %v5415_v11, %v1728_v9 }
 0x5c3   : > { %v1798_v12 = vpop.f32.mrb[6].mxu0 }
 0x5c4   : > { %v1799_v14 = vadd.f32 %v5415_v11, %v1798_v12  ;;  %v5787_v15 = vpop.f32.mrb[7].mxu0 }
 0x5c6   : > { %v6199_v16 = vpack.c.bf16 %v1799_v14, %v1729_v13 }
 0x5c8   : > { %6200 = vmatprep.subr.bf16.mxu1 %v6199_v16 }
 0x5c9   : > { %6202 = vmatpush3.bf16.msra.mxu1 %v6199_v16 }
 0x5d3   : > { %v1881_v17 = vpop.f32.mrb[8].mxu0 }
 0x5d4   : > { %v5806_v18 = vpop.f32.mrb[9].mxu0  ;;  %v1882_v20 = vadd.f32 %v5415_v11, %v1881_v17 }
 0x5e3   : > { %v1951_v19 = vpop.f32.mrb[10].mxu0 }
 0x5e4   : > { %v1952_v21 = vadd.f32 %v5415_v11, %v1951_v19  ;;  %v5825_v22 = vpop.f32.mrb[11].mxu0 }
 0x5e6   : > { %v6203_v23 = vpack.c.bf16 %v1952_v21, %v1882_v20 }
 0x5e8   : > { %6204 = vmatprep.subr.bf16.mxu1 %v6203_v23 }
 0x5e9   : > { %6206 = vmatpush3.bf16.msra.mxu1 %v6203_v23 }
 0x5ea   : > { %6208 = vmatprep.subr.bf16.mxu1 %v6207_v29 }
 0x5ec   : > { %5843 = vmatmul.mubr.msk.f32.vlgmr.msra.gmra.mrb[4].mxu1 %vm1326_vm2, %v1161_v24 }
 0x5ed   : > { %5845 = vmatprep.mubr.msk.f32.mxu1 %vm1326_vm2, %v1162_v25  ;;  %6210 = vmatpush3.bf16.msra.mxu1 %v6207_v29 }
 0x5ee   : > { %6212 = vmatprep.subr.bf16.mxu1 %v6211_v36 }
 0x5f0   : > { %5846 = vmatmul.mubr.msk.f32.gmra.mrb[6].mxu1 %vm1326_vm2, %v1163_v26 }
 0x5f1   : > { %6214 = vmatpush3.bf16.msra.mxu1 %v6211_v36 }
 0x5f2   : > { %6216 = vmatprep.subr.bf16.mxu1 %v6215_v46 }
 0x5f5   : > { %6218 = vmatpush3.bf16.msra.mxu1 %v6215_v46 }
 0x6bf   : > { %v5844_v31 = vpop.f32.mrb[4].mxu1 }
 0x6c0   : > { %v6838_v34 = vadd.f32 %v5844_v31, %v5420_v30  ;;  %v2141_v35 = vpop.f32.mrb[5].mxu1 }
 0x6c1   : > { %v6840_v37 = vadd.f32 %v5420_v30, %v2141_v35 }
 0x6c2   : > { %vm2161_vm14 = vcmp.ge.f32.partialorder %v6838_v34, 0.0  ;;  %v2165_v38 = vmul.f32 0.1, %v6838_v34 }
 0x6c3   : > { %vm2160_vm15 = vcmp.ge.f32.partialorder %v6840_v37, 0.0  ;;  %v2164_v39 = vmul.f32 0.1, %v6840_v37  ;;  %v5847_v40 = vpop.f32.mrb[6].mxu1 }
 0x6c4   : > { %v2169_v43 = vsel %vm2161_vm14, %v6838_v34, %v2165_v38  ;;  %v6849_v44 = vadd.f32 %v5847_v40, %v5420_v30  ;;  %v2151_v45 = vpop.f32.mrb[7].mxu1  ;;  %v1174_v40 = vld [vmem:[%s8387_s15 + $0x8] sm:$0xff] }
 0x6c5   : > { %v2177_v47 = vrot.slane %v2169_v43, 7  ;;  %v2168_v48 = vsel %vm2160_vm15, %v6840_v37, %v2164_v39  ;;  %v6852_v49 = vadd.f32 %v5420_v30, %v2151_v45  ;;  %v1173_v39 = vld [vmem:[%s8387_s15] sm:$0xff] }
 0x6c6   : > { %v2176_v50 = vrot.slane %v2168_v48, 7  ;;  %vm2163_vm0 = vcmp.ge.f32.partialorder %v6849_v44, 0.0  ;;  %v2167_v51 = vmul.f32 0.1, %v6849_v44  ;;  %v6219_v42 = vpack.c.bf16 %v1174_v40, %v1173_v39  ;;  %v1176_v48 = vld [vmem:[%s8387_s15 + $0x18] sm:$0xff] }
 0x6c7   : > { %vm2162_vm9 = vcmp.ge.f32.partialorder %v6852_v49, 0.0  ;;  %v2166_v52 = vmul.f32 0.1, %v6852_v49 }
 0x6c8   : > { %v2171_v53 = vsel %vm2163_vm0, %v6849_v44, %v2167_v51  ;;  %v2178_v54 = vsel %vm1639_vm12, %v2176_v50, %v2177_v47  ;;  %v2188_v55 = vsel %vm1639_vm12, 0.0, %v2176_v50  ;;  %6220 = vmatprep.subr.bf16.mxu1 %v6219_v42 }
 0x6c9   : > { %v2181_v56 = vrot.slane %v2171_v53, 7  ;;  %v2170_v57 = vsel %vm2162_vm9, %v6852_v49, %v2166_v52  ;;  %v2192_v58 = vrot.slane %v2188_v55, 1  ;;  %v2193_v59 = vrot.slane %v2178_v54, 1 }
 0x6ca   : > { %v2179_v60 = vrot.slane %v2170_v57, 7  ;;  %v2213_v62 = vrot.slane %v2188_v55, 2  ;;  %v2214_v63 = vrot.slane %v2178_v54, 2  ;;  %v1177_v57 = vld [vmem:[%s8387_s15 + $0x20] sm:$0xff] }
 0x6cb   : > { %v2194_v61 = vsel %vm1508_vm4, %v2192_v58, %v2193_v59  ;;  %v2189_v8 = vsel %vm1639_vm12, %v2181_v56, 0.0  ;;  %v1178_v58 = vld [vmem:[%s8387_s15 + $0x28] sm:$0xff] }
 0x6cc   : > { %2201 = vrot.lane.b32.xlu0 %v2194_v61, %s8363_s20  ;;  %v2180_v0 = vsel %vm1639_vm12, %v2177_v47, %v2179_v60  ;;  %v2182_v1 = vsel %vm1639_vm12, %v2179_v60, %v2181_v56  ;;  %v2215_v4 = vsel %vm1515_vm5, %v2213_v62, %v2214_v63  ;;  %v2199_v10 = vrot.slane %v2189_v8, 1  ;;  %v1175_v47 = vld [vmem:[%s8387_s15 + $0x10] sm:$0xff] }
 0x6cd   : > { %v2195_v2 = vrot.slane %v2180_v0, 1  ;;  %v2216_v6 = vrot.slane %v2180_v0, 2  ;;  %v2197_v7 = vrot.slane %v2182_v1, 1  ;;  %v2218_v11 = vrot.slane %v2182_v1, 2 }
 0x6ce   : > { %v2220_v14 = vrot.slane %v2189_v8, 2  ;;  %v6223_v50 = vpack.c.bf16 %v1176_v48, %v1175_v47  ;;  %v6227_v62 = vpack.c.bf16 %v1178_v58, %v1177_v57  ;;  %v1185_v57 = vld [vmem:[%s8389_s22 + $0x28] sm:$0xff] }
 0x6cf   : > { %v2196_v5 = vsel %vm1508_vm4, %v2193_v59, %v2195_v2  ;;  %v2217_v3 = vsel %vm1515_vm5, %v2214_v63, %v2216_v6  ;;  %v2198_v9 = vsel %vm1508_vm4, %v2195_v2, %v2197_v7  ;;  %v2200_v12 = vsel %vm1508_vm4, %v2197_v7, %v2199_v10 }
 0x6d0   : > { %2203 = vrot.lane.b32.xlu1 %v2196_v5, %s8363_s20  ;;  %2222 = vrot.lane.b32.xlu0 %v2215_v4, %s8361_s16  ;;  %v2219_v13 = vsel %vm1515_vm5, %v2216_v6, %v2218_v11  ;;  %v2221_v15 = vsel %vm1515_vm5, %v2218_v11, %v2220_v14 }
 0x6d4   : > { %2224 = vrot.lane.b32.xlu1 %v2217_v3, %s8361_s16  ;;  %2205 = vrot.lane.b32.xlu0 %v2198_v9, %s8363_s20 }
 0x6d8   : > { %2207 = vrot.lane.b32.xlu1 %v2200_v12, %s8363_s20  ;;  %2226 = vrot.lane.b32.xlu0 %v2219_v13, %s8361_s16 }
 0x6dc   : > { %2228 = vrot.lane.b32.xlu1 %v2221_v15, %s8361_s16 }
 0x73e   : > { %v2202_v16 = vpop.permute.xlu0 %2201 }
 0x73f   : > { %v2234_v17 = vsel %vm1238_vm1, %v2188_v55, %v2202_v16 }
 0x742   : > { %v2204_v18 = vpop.permute.xlu1 %2203  ;;  %v2223_v19 = vpop.permute.xlu0 %2222 }
 0x743   : > { %v2238_v20 = vsel %vm1326_vm2, %v2234_v17, %v2223_v19  ;;  %v2235_v21 = vsel %vm1238_vm1, %v2178_v54, %v2204_v18 }
 0x744   : > { %5860 = vmatprep.mubr.msk.f32.mxu1 %vm2248_vm10, %v2238_v20 }
 0x746   : > { %v2225_v22 = vpop.permute.xlu1 %2224  ;;  %v2206_v23 = vpop.permute.xlu0 %2205 }
 0x747   : > { %v2239_v24 = vsel %vm1326_vm2, %v2235_v21, %v2225_v22  ;;  %v2236_v25 = vsel %vm1238_vm1, %v2180_v0, %v2206_v23 }
 0x748   : > { %5861 = vmatmul.mubr.msk.f32.vlgmr.msra.gmra.mrb[8].mxu1 %vm2248_vm10, %v2239_v24 }
 0x749   : > { %6222 = vmatpush3.bf16.msra.mxu1 %v6219_v42 }
 0x74a   : > { %v2208_v26 = vpop.permute.xlu1 %2207  ;;  %v2227_v27 = vpop.permute.xlu0 %2226  ;;  %6224 = vmatprep.subr.bf16.mxu1 %v6223_v50 }
 0x74b   : > { %v2240_v28 = vsel %vm1326_vm2, %v2236_v25, %v2227_v27  ;;  %v2237_v29 = vsel %vm1238_vm1, %v2182_v1, %v2208_v26 }
 0x74c   : > { %5863 = vmatprep.mubr.msk.f32.mxu1 %vm2248_vm10, %v2240_v28 }
 0x74d   : > { %6226 = vmatpush3.bf16.msra.mxu1 %v6223_v50 }
 0x74e   : > { %v2229_v30 = vpop.permute.xlu1 %2228  ;;  %6228 = vmatprep.subr.bf16.mxu1 %v6227_v62 }
 0x74f   : > { %v2241_v31 = vsel %vm1326_vm2, %v2237_v29, %v2229_v30 }
 0x750   : > { %5864 = vmatmul.mubr.msk.f32.gmra.mrb[10].mxu1 %vm2248_vm10, %v2241_v31 }
 0x751   : > { %6230 = vmatpush3.bf16.msra.mxu1 %v6227_v62 }
 0x81b   : > { %v5862_v33 = vpop.f32.mrb[8].mxu1 }
 0x81c   : > { %v2333_v35 = vadd.f32 %v5862_v33, %v5429_v32  ;;  %v2327_v36 = vpop.f32.mrb[9].mxu1 }
 0x81d   : > { %v2328_v38 = vadd.f32 %v5429_v32, %v2327_v36 }
 0x81e   : > { %v6897_v41 = vadd.f32 %v6838_v34, %v2333_v35 }
 0x81f   : > { %v6900_v43 = vadd.f32 %v6840_v37, %v2328_v38 }
 0x820   : > { %vm2351_vm11 = vcmp.ge.f32.partialorder %v6897_v41, 0.0  ;;  %v2355_v45 = vmul.f32 0.1, %v6897_v41 }
 0x821   : > { %vm2350_vm14 = vcmp.ge.f32.partialorder %v6900_v43, 0.0  ;;  %v2354_v46 = vmul.f32 0.1, %v6900_v43 }
 0x822   : > { %v2359_v34 = vsel %vm2351_vm11, %v6897_v41, %v2355_v45 }
 0x823   : > { %v2367_v51 = vrot.slane %v2359_v34, 5  ;;  %v2358_v37 = vsel %vm2350_vm14, %v6900_v43, %v2354_v46  ;;  %v5865_v52 = vpop.f32.mrb[10].mxu1  ;;  %v5434_v46 = vld [vmem:[%s8388_s18] ss:$0 sm:$0xff]  ;;  %s8393_s18 = sld [smem:[#allocation14_spill]] }
 0x824   : > { %v2343_v53 = vadd.f32 %v5865_v52, %v5429_v32  ;;  %v2337_v54 = vpop.f32.mrb[11].mxu1  ;;  %v2366_v55 = vrot.slane %v2358_v37, 5  ;;  %v1180_v37 = vld [vmem:[%s8389_s22] sm:$0xff]  ;;  %v1181_v52 = vld [vmem:[%s8389_s22 + $0x8] sm:$0xff] }
 0x825   : > { %v2338_v56 = vadd.f32 %v5429_v32, %v2337_v54  ;;  %v6231_v54 = vpack.c.bf16 %v1181_v52, %v1180_v37 }
 0x826   : > { %v6913_v59 = vadd.f32 %v6849_v44, %v2343_v53  ;;  %v2368_v60 = vsel %vm1503_vm3, %v2366_v55, %v2367_v51  ;;  %v2378_v61 = vsel %vm1503_vm3, 0.0, %v2366_v55 }
 0x827   : > { %v6918_v63 = vadd.f32 %v6852_v49, %v2338_v56  ;;  %v2382_v0 = vrot.slane %v2378_v61, 3  ;;  %v2383_v1 = vrot.slane %v2368_v60, 3  ;;  %v2403_v5 = vrot.slane %v2378_v61, 6  ;;  %v1184_v56 = vld [vmem:[%s8389_s22 + $0x20] sm:$0xff]  ;;  %6232 = vmatprep.subr.bf16.mxu0 %v6231_v54 }
 0x828   : > { %vm2353_vm15 = vcmp.ge.f32.partialorder %v6913_v59, 0.0  ;;  %v2357_v2 = vmul.f32 0.1, %v6913_v59  ;;  %v2404_v6 = vrot.slane %v2368_v60, 6  ;;  %6234 = vmatpush3.bf16.msra.mxu0 %v6231_v54 }
 0x829   : > { %vm2352_vm0 = vcmp.ge.f32.partialorder %v6918_v63, 0.0  ;;  %v2356_v44 = vmul.f32 0.1, %v6918_v63  ;;  %v2384_v4 = vsel %vm1522_vm7, %v2382_v0, %v2383_v1 }
 0x82a   : > { %v2361_v7 = vsel %vm2353_vm15, %v6913_v59, %v2357_v2  ;;  %2391 = vrot.lane.b32.xlu0 %v2384_v4, %s8363_s20  ;;  %v2405_v9 = vsel %vm1540_vm6, %v2403_v5, %v2404_v6  ;;  %v1182_v5 = vld [vmem:[%s8389_s22 + $0x10] sm:$0xff] }
 0x82b   : > { %v2371_v49 = vrot.slane %v2361_v7, 5  ;;  %v2360_v8 = vsel %vm2352_vm0, %v6918_v63, %v2356_v44  ;;  %v1183_v44 = vld [vmem:[%s8389_s22 + $0x18] sm:$0xff]  ;;  %v1186_v4 = vld [vmem:[%s8389_s22 + $0x30] sm:$0xff] }
 0x82c   : > { %v2369_v3 = vrot.slane %v2360_v8, 5  ;;  %v6235_v7 = vpack.c.bf16 %v1183_v44, %v1182_v5 }
 0x82d   : > { %v2379_v18 = vsel %vm1503_vm3, %v2371_v49, 0.0 }
 0x82e   : > { %2412 = vrot.lane.b32.xlu0 %v2405_v9, %s8361_s16  ;;  %v2370_v10 = vsel %vm1503_vm3, %v2367_v51, %v2369_v3  ;;  %v2372_v11 = vsel %vm1503_vm3, %v2369_v3, %v2371_v49  ;;  %v2389_v21 = vrot.slane %v2379_v18, 3  ;;  %v2410_v23 = vrot.slane %v2379_v18, 6  ;;  %v1187_v49 = vld [vmem:[%s8389_s22 + $0x38] sm:$0xff]  ;;  %6236 = vmatprep.subr.bf16.mxu0 %v6235_v7 }
 0x82f   : > { %v2385_v12 = vrot.slane %v2370_v10, 3  ;;  %v2387_v13 = vrot.slane %v2372_v11, 3  ;;  %v2406_v16 = vrot.slane %v2370_v10, 6  ;;  %v2408_v17 = vrot.slane %v2372_v11, 6  ;;  %6238 = vmatpush3.bf16.msra.mxu0 %v6235_v7 }
 0x831   : > { %v2388_v14 = vsel %vm1522_vm7, %v2385_v12, %v2387_v13  ;;  %v2386_v15 = vsel %vm1522_vm7, %v2383_v1, %v2385_v12  ;;  %v2409_v19 = vsel %vm1540_vm6, %v2406_v16, %v2408_v17  ;;  %v2407_v20 = vsel %vm1540_vm6, %v2404_v6, %v2406_v16  ;;  %v1189_v16 = vld [vmem:[%s8389_s22 + $0x48] sm:$0xff] }
 0x832   : > { %2395 = vrot.lane.b32.xlu0 %v2388_v14, %s8363_s20  ;;  %2393 = vrot.lane.b32.xlu1 %v2386_v15, %s8363_s20  ;;  %v2390_v22 = vsel %vm1522_vm7, %v2387_v13, %v2389_v21  ;;  %v2411_v24 = vsel %vm1540_vm6, %v2408_v17, %v2410_v23  ;;  %v1188_v15 = vld [vmem:[%s8389_s22 + $0x40] sm:$0xff] }
 0x836   : > { %2416 = vrot.lane.b32.xlu0 %v2409_v19, %s8361_s16  ;;  %2414 = vrot.lane.b32.xlu1 %v2407_v20, %s8361_s16  ;;  %v1193_v19 = vld [vmem:[%s8389_s22 + $0x68] sm:$0xff] }
 0x83a   : > { %2397 = vrot.lane.b32.xlu1 %v2390_v22, %s8363_s20 }
 0x83e   : > { %2418 = vrot.lane.b32.xlu1 %v2411_v24, %s8361_s16 }
 0x89c   : > { %v2392_v25 = vpop.permute.xlu0 %2391 }
 0x89d   : > { %v2424_v26 = vsel %vm1238_vm1, %v2378_v61, %v2392_v25 }
 0x8a0   : > { %v2413_v27 = vpop.permute.xlu0 %2412 }
 0x8a1   : > { %v2428_v28 = vsel %vm1326_vm2, %v2424_v26, %v2413_v27 }
 0x8a2   : > { %5878 = vmatprep.mubr.msk.f32.mxu1 %vm2248_vm10, %v2428_v28 }
 0x8a4   : > { %v2394_v29 = vpop.permute.xlu1 %2393  ;;  %v2396_v30 = vpop.permute.xlu0 %2395 }
 0x8a5   : > { %v2425_v31 = vsel %vm1238_vm1, %v2368_v60, %v2394_v29  ;;  %v2426_v32 = vsel %vm1238_vm1, %v2370_v10, %v2396_v30  ;;  %v6239_v60 = vpack.c.bf16 %v1185_v57, %v1184_v56  ;;  %v6243_v10 = vpack.c.bf16 %v1187_v49, %v1186_v4 }
 0x8a7   : > { %6240 = vmatprep.subr.bf16.mxu1 %v6239_v60 }
 0x8a8   : > { %v2415_v33 = vpop.permute.xlu1 %2414  ;;  %v2417_v35 = vpop.permute.xlu0 %2416 }
 0x8a9   : > { %v2429_v36 = vsel %vm1326_vm2, %v2425_v31, %v2415_v33  ;;  %v2430_v38 = vsel %vm1326_vm2, %v2426_v32, %v2417_v35  ;;  %v2990_v35 = vld [vmem:[%s7002_s28] sm:$0xff] }
 0x8aa   : > { %5879 = vmatmul.mubr.msk.f32.vlgmr.msra.gmra.mrb[12].mxu1 %vm2248_vm10, %v2429_v36  ;;  %v2992_v36 = vld [vmem:[%s7002_s28 + $0x10] sm:$0xff] }
 0x8ab   : > { %5881 = vmatprep.mubr.msk.f32.mxu1 %vm2248_vm10, %v2430_v38  ;;  %6242 = vmatpush3.bf16.msra.mxu1 %v6239_v60  ;;  %v2994_v38 = vld [vmem:[%s7002_s28 + $0x20] sm:$0xff]  ;;  %v1194_v60 = vld [vmem:[%s8389_s22 + $0x70] sm:$0xff] }
 0x8ac   : > { %v2398_v39 = vpop.permute.xlu1 %2397  ;;  %6244 = vmatprep.subr.bf16.mxu1 %v6243_v10 }
 0x8ad   : > { %v2427_v40 = vsel %vm1238_vm1, %v2372_v11, %v2398_v39  ;;  %v2996_v39 = vld [vmem:[%s7002_s28 + $0x30] sm:$0xff] }
 0x8af   : > { %6246 = vmatpush3.bf16.msra.mxu1 %v6243_v10 }
 0x8b0   : > { %v2419_v42 = vpop.permute.xlu1 %2418 }
 0x8b1   : > { %v2431_v45 = vsel %vm1326_vm2, %v2427_v40, %v2419_v42  ;;  %v2998_v40 = vld [vmem:[%s7002_s28 + $0x40] sm:$0xff]  ;;  %v3000_v42 = vld [vmem:[%s7002_s28 + $0x50] sm:$0xff] }
 0x8b2   : > { %5882 = vmatmul.mubr.msk.f32.gmra.mrb[14].mxu1 %vm2248_vm10, %v2431_v45  ;;  %v3002_v45 = vld [vmem:[%s7002_s28 + $0x60] sm:$0xff] }
 0x97d   : > { %v5880_v47 = vpop.f32.mrb[12].mxu1 }
 0x97e   : > { %v2522_v48 = vadd.f32 %v5880_v47, %v5434_v46  ;;  %v2516_v34 = vpop.f32.mrb[13].mxu1 }
 0x97f   : > { %v2517_v50 = vadd.f32 %v5434_v46, %v2516_v34 }
 0x980   : > { %v2536_v51 = vadd.f32 %v2522_v48, %v6897_v41 }
 0x981   : > { %v2535_v53 = vadd.f32 %v2517_v50, %v6900_v43 }
 0x982   : > { %vm2540_vm9 = vcmp.ge.f32.partialorder %v2536_v51, 0.0  ;;  %v2544_v55 = vmul.f32 0.1, %v2536_v51 }
 0x983   : > { %vm2539_vm11 = vcmp.ge.f32.partialorder %v2535_v53, 0.0  ;;  %v2543_v58 = vmul.f32 0.1, %v2535_v53 }
 0x984   : > { %v2548_v61 = vsel %vm2540_vm9, %v2536_v51, %v2544_v55  ;;  %v1190_v55 = vld [vmem:[%s8389_s22 + $0x50] sm:$0xff] }
 0x985   : > { %v2556_v41 = vrot.slane %v2548_v61, 7  ;;  %v2547_v62 = vsel %vm2539_vm11, %v2535_v53, %v2543_v58  ;;  %v5883_v0 = vpop.f32.mrb[14].mxu1  ;;  %v1191_v58 = vld [vmem:[%s8389_s22 + $0x58] sm:$0xff] }
 0x986   : > { %v2532_v43 = vadd.f32 %v5883_v0, %v5434_v46  ;;  %v2526_v1 = vpop.f32.mrb[15].mxu1  ;;  %v2555_v2 = vrot.slane %v2547_v62, 7  ;;  %v1195_v61 = vld [vmem:[%s8389_s22 + $0x78] sm:$0xff] }
 0x987   : > { %v2527_v6 = vadd.f32 %v5434_v46, %v2526_v1  ;;  %v3004_v46 = vld [vmem:[%s7002_s28 + $0x70] sm:$0xff]  ;;  %v6259_v5 = vpack.c.bf16 %v1195_v61, %v1194_v60 }
 0x988   : > { %v2538_v8 = vadd.f32 %v2532_v43, %v6913_v59  ;;  %v2567_v3 = vsel %vm1639_vm12, 0.0, %v2555_v2  ;;  %v6971_v9 = vsel %vm1639_vm12, %v2555_v2, %v2556_v41  ;;  %v1192_v59 = vld [vmem:[%s8389_s22 + $0x60] sm:$0xff]  ;;  %v6251_v2 = vpack.c.bf16 %v1191_v58, %v1190_v55 }
 0x989   : > { %v2537_v11 = vadd.f32 %v2527_v6, %v6918_v63  ;;  %v2570_v12 = vrot.slane %v2567_v3, 7  ;;  %v2571_v13 = vrot.slane %v6971_v9, 7  ;;  %v6980_v63 = vpack.c.bf16 %v1189_v16, %v1188_v15  ;;  %v1197_v16 = vld [vmem:[%s8391_s0] sm:$0xff] }
 0x98a   : > { %vm2542_vm14 = vcmp.ge.f32.partialorder %v2538_v8, 0.0  ;;  %v2546_v14 = vmul.f32 0.1, %v2538_v8  ;;  %v6984_v21 = vpack.c.bf16 %v1193_v19, %v1192_v59  ;;  %v2991_v59 = vld [vmem:[%s7002_s28 + $0x8] sm:$0xff] }
 0x98b   : > { %vm2541_vm15 = vcmp.ge.f32.partialorder %v2537_v11, 0.0  ;;  %v2545_v17 = vmul.f32 0.1, %v2537_v11  ;;  %2577 = vrot.lane.b32.xlu0 %v2570_v12, %s8363_s20  ;;  %v2572_v18 = vsel %vm1639_vm12, %v2570_v12, %v2571_v13  ;;  %6248 = vmatprep.subr.bf16.mxu0 %v6980_v63  ;;  %v2999_v19 = vld [vmem:[%s7002_s28 + $0x48] sm:$0xff] }
 0x98c   : > { %v2550_v20 = vsel %vm2542_vm14, %v2538_v8, %v2546_v14  ;;  %2579 = vrot.lane.b32.xlu1 %v2572_v18, %s8363_s20  ;;  %6256 = vmatprep.subr.bf16.mxu1 %v6984_v21  ;;  %v2995_v18 = vld [vmem:[%s7002_s28 + $0x28] sm:$0xff] }
 0x98d   : > { %v2560_v22 = vrot.slane %v2550_v20, 7  ;;  %v2549_v23 = vsel %vm2541_vm15, %v2537_v11, %v2545_v17  ;;  %v2993_v17 = vld [vmem:[%s7002_s28 + $0x18] sm:$0xff] }
 0x98e   : > { %v2558_v24 = vrot.slane %v2549_v23, 7  ;;  %v3001_v20 = vld [vmem:[%s7002_s28 + $0x58] sm:$0xff]  ;;  %v5439_v23 = vld [vmem:[%s8392_s11] ss:$0 sm:$0xff]  ;;  %s8355_s11 = smov 8  }
 0x98f   : > { %v6991_v27 = vsel %vm1639_vm12, %v2560_v22, 0.0 }
 0x990   : > { %v2559_v25 = vsel %vm1639_vm12, %v2556_v41, %v2558_v24  ;;  %v2561_v26 = vsel %vm1639_vm12, %v2558_v24, %v2560_v22  ;;  %v2796_v32 = vrot.slane %v6991_v27, 7  ;;  %v3005_v22 = vld [vmem:[%s7002_s28 + $0x78] sm:$0xff] }
 0x991   : > { %v2573_v28 = vrot.slane %v2559_v25, 7  ;;  %v2575_v29 = vrot.slane %v2561_v26, 7 }
 0x993   : > { %v2576_v30 = vsel %vm1639_vm12, %v2573_v28, %v2575_v29  ;;  %v2574_v31 = vsel %vm1639_vm12, %v2571_v13, %v2573_v28  ;;  %v2797_v33 = vsel %vm1639_vm12, %v2575_v29, %v2796_v32 }
 0x994   : > { %2583 = vrot.lane.b32.xlu1 %v2576_v30, %s8363_s20  ;;  %2581 = vrot.lane.b32.xlu0 %v2574_v31, %s8363_s20 }
 0x998   : > { %2798 = vrot.lane.b32.xlu1 %v2797_v33, %s8363_s20  ;;  %2585 = vrot.lane.b32.xlu0 %v2575_v29, %s8363_s20 }
 0x99c   : > { %3008 = vperm.xlu0 %6376, %v2990_v35   ;;  %3013 = vperm.xlu1 %6377, %v2991_v59  }
 0x9a0   : > { %3018 = vperm.xlu0 %6376, %v2992_v36   ;;  %3023 = vperm.xlu1 %6377, %v2993_v17  }
 0x9a4   : > { %3028 = vperm.xlu0 %6376, %v2994_v38   ;;  %3033 = vperm.xlu1 %6377, %v2995_v18  }
 0x9a8   : > { %3038 = vperm.xlu0 %6376, %v2996_v39  }
 0x9ac   : > { %3048 = vperm.xlu0 %6376, %v2998_v40  }
 0x9b0   : > { %3058 = vperm.xlu0 %6376, %v3000_v42  }
 0x9b4   : > { %3068 = vperm.xlu0 %6376, %v3002_v45  }
 0x9b8   : > { %3078 = vperm.xlu0 %6376, %v3004_v46  }
 0x9fd   : > { %v2578_v47 = vpop.permute.xlu0 %2577 }
 0x9fe   : > { %v2592_v48 = vsel %vm1238_vm1, %v2567_v3, %v2578_v47  ;;  %v2580_v34 = vpop.permute.xlu1 %2579 }
 0x9ff   : > { %v2608_v50 = vrot.slane %v2592_v48, 1  ;;  %v2593_v51 = vsel %vm1238_vm1, %v6971_v9, %v2580_v34  ;;  %v2803_v44 = vrot.slane %v2592_v48, 2 }
 0xa00   : > { %v2609_v37 = vrot.slane %v2593_v51, 1  ;;  %v2804_v4 = vrot.slane %v2593_v51, 2 }
 0xa02   : > { %v2610_v52 = vsel %vm1508_vm4, %v2608_v50, %v2609_v37  ;;  %v2805_v9 = vsel %vm1515_vm5, %v2803_v44, %v2804_v4  ;;  %v1198_v44 = vld [vmem:[%s8391_s0 + $0x8] sm:$0xff] }
 0xa03   : > { %5892 = vmatprep.mubr.msk.f32.mxu0 %vm1326_vm2, %v2610_v52  ;;  %5906 = vmatprep.mubr.msk.f32.mxu1 %vm1326_vm2, %v2610_v52 }
 0xa06   : > { %v2584_v53 = vpop.permute.xlu1 %2583  ;;  %v2582_v54 = vpop.permute.xlu0 %2581 }
 0xa07   : > { %v2595_v56 = vsel %vm1238_vm1, %v2561_v26, %v2584_v53  ;;  %v2594_v57 = vsel %vm1238_vm1, %v2559_v25, %v2582_v54 }
 0xa08   : > { %v2613_v41 = vrot.slane %v2595_v56, 1  ;;  %v2611_v62 = vrot.slane %v2594_v57, 1  ;;  %v2806_v3 = vrot.slane %v2594_v57, 2  ;;  %v2808_v10 = vrot.slane %v2595_v56, 2 }
 0xa0a   : > { %v2586_v0 = vpop.permute.xlu0 %2585  ;;  %v2612_v43 = vsel %vm1508_vm4, %v2609_v37, %v2611_v62  ;;  %v2614_v1 = vsel %vm1508_vm4, %v2611_v62, %v2613_v41  ;;  %v2799_v49 = vpop.permute.xlu1 %2798  ;;  %v2807_v12 = vsel %vm1515_vm5, %v2804_v4, %v2806_v3  ;;  %v2809_v14 = vsel %vm1515_vm5, %v2806_v3, %v2808_v10  ;;  %v1199_v4 = vld [vmem:[%s8391_s0 + $0x10] sm:$0xff]  ;;  %v1204_v3 = vld [vmem:[%s8391_s0 + $0x38] sm:$0xff] }
 0xa0b   : > { %v2596_v6 = vsel %vm1238_vm1, %v6991_v27, %v2586_v0  ;;  %5893 = vmatmul.mubr.msk.f32.vlgmr.msra.gmra.mrb[12].mxu0 %vm1326_vm2, %v2612_v43  ;;  %5907 = vmatmul.mubr.msk.f32.vlgmr.msra.gmra.mrb[16].mxu1 %vm1326_vm2, %v2612_v43  ;;  %v2801_v11 = vsel %vm1238_vm1, %v6991_v27, %v2799_v49  ;;  %v1202_v49 = vld [vmem:[%s8391_s0 + $0x28] sm:$0xff] }
 0xa0c   : > { %v2615_v7 = vrot.slane %v2596_v6, 1  ;;  %5895 = vmatprep.mubr.msk.f32.mxu0 %vm1326_vm2, %v2614_v1  ;;  %5909 = vmatprep.mubr.msk.f32.mxu1 %vm1326_vm2, %v2614_v1  ;;  %v2810_v13 = vrot.slane %v2801_v11, 2  ;;  %v1200_v6 = vld [vmem:[%s8391_s0 + $0x18] sm:$0xff]  ;;  %v1207_v11 = vld [vmem:[%s8391_s0 + $0x50] sm:$0xff] }
 0xa0d   : > { %6250 = vmatpush3.bf16.msra.mxu0 %v6980_v63  ;;  %6258 = vmatpush3.bf16.msra.mxu1 %v6984_v21  ;;  %v2997_v63 = vld [vmem:[%s7002_s28 + $0x38] sm:$0xff]  ;;  %v3003_v21 = vld [vmem:[%s7002_s28 + $0x68] sm:$0xff]  ;;  %s8395_s28 = sld [smem:[#allocation16_spill]] }
 0xa0e   : > { %v2616_v8 = vsel %vm1508_vm4, %v2613_v41, %v2615_v7  ;;  %6252 = vmatprep.subr.bf16.mxu0 %v6251_v2  ;;  %6260 = vmatprep.subr.bf16.mxu1 %v6259_v5  ;;  %v2811_v15 = vsel %vm1515_vm5, %v2808_v10, %v2810_v13  ;;  %v1201_v7 = vld [vmem:[%s8391_s0 + $0x20] sm:$0xff]  ;;  %v1206_v10 = vld [vmem:[%s8391_s0 + $0x48] sm:$0xff] }
 0xa0f   : > { %5896 = vmatmul.mubr.msk.f32.gmra.mrb[14].mxu0 %vm1326_vm2, %v2616_v8  ;;  %5910 = vmatmul.mubr.msk.f32.gmra.mrb[18].mxu1 %vm1326_vm2, %v2616_v8  ;;  %v1203_v8 = vld [vmem:[%s8391_s0 + $0x30] sm:$0xff]  ;;  %v1209_v13 = vld [vmem:[%s8391_s0 + $0x60] sm:$0xff] }
 0xa10   : > { %5920 = vmatprep.mubr.msk.f32.mxu0 %vm1326_vm2, %v2805_v9  ;;  %5934 = vmatprep.mubr.msk.f32.mxu1 %vm1326_vm2, %v2805_v9  ;;  %v1205_v9 = vld [vmem:[%s8391_s0 + $0x40] sm:$0xff] }
 0xa11   : > { %6254 = vmatpush3.bf16.msra.mxu0 %v6251_v2  ;;  %6262 = vmatpush3.bf16.msra.mxu1 %v6259_v5 }
 0xa12   : > { %3043 = vperm.xlu1 %6377, %v2997_v63   ;;  %v7080_v63 = vld [vmem:[%s8393_s18] ss:$0 sm:$0xff]  ;;  %s8396_s18 = sld [smem:[#allocation18_spill]] }
 0xa14   : > { %5921 = vmatmul.mubr.msk.f32.vlgmr.msra.gmra.mrb[16].mxu0 %vm1326_vm2, %v2807_v12  ;;  %5935 = vmatmul.mubr.msk.f32.vlgmr.msra.gmra.mrb[20].mxu1 %vm1326_vm2, %v2807_v12  ;;  %v1208_v12 = vld [vmem:[%s8391_s0 + $0x58] sm:$0xff] }
 0xa15   : > { %5923 = vmatprep.mubr.msk.f32.mxu0 %vm1326_vm2, %v2809_v14  ;;  %5937 = vmatprep.mubr.msk.f32.mxu1 %vm1326_vm2, %v2809_v14  ;;  %v1210_v14 = vld [vmem:[%s8391_s0 + $0x68] sm:$0xff] }
 0xa16   : > { %3053 = vperm.xlu1 %6377, %v2999_v19  }
 0xa18   : > { %5924 = vmatmul.mubr.msk.f32.gmra.mrb[18].mxu0 %vm1326_vm2, %v2811_v15  ;;  %5938 = vmatmul.mubr.msk.f32.gmra.mrb[22].mxu1 %vm1326_vm2, %v2811_v15  ;;  %v1211_v15 = vld [vmem:[%s8391_s0 + $0x70] sm:$0xff] }
 0xa19   : > { %5972 = vmatprep.mubr.f32.mxu0 %v1197_v16  ;;  %v1212_v16 = vld [vmem:[%s8391_s0 + $0x78] sm:$0xff]  ;;  %s8403_s0 = smov 16  }
 0xa1a   : > { %3063 = vperm.xlu1 %6377, %v3001_v20  }
 0xa1b   : > { %v3009_v59 = vpop.permute.xlu0 %3008  ;;  %v3014_v17 = vpop.permute.xlu1 %3013 }
 0xa1c   : > { %v3093_v19 = vmul.f32 %v7080_v63, %v3014_v17 }
 0xa1e   : > { %3073 = vperm.xlu1 %6377, %v3003_v21   ;;  %v3092_v21 = vmul.f32 %v7080_v63, %v3009_v59 }
 0xa1f   : > { %v3019_v18 = vpop.permute.xlu0 %3018  ;;  %v3024_v20 = vpop.permute.xlu1 %3023 }
 0xa22   : > { %3083 = vperm.xlu1 %6377, %v3005_v22  }
 0xa23   : > { %v3029_v22 = vpop.permute.xlu0 %3028 }
 0xade   : > { %v5894_v24 = vpop.f32.mrb[12].mxu0  ;;  %v5908_v25 = vpop.f32.mrb[16].mxu1 }
 0xadf   : > { %v2697_v26 = vadd.f32 %v5894_v24, %v5439_v23  ;;  %v2782_v27 = vadd.f32 %v5908_v25, %v5439_v23  ;;  %v2691_v28 = vpop.f32.mrb[13].mxu0  ;;  %v2776_v29 = vpop.f32.mrb[17].mxu1  ;;  %v3095_v24 = vmul.f32 %v7080_v63, %v3024_v20 }
 0xae0   : > { %v2692_v30 = vadd.f32 %v5439_v23, %v2691_v28  ;;  %v2777_v31 = vadd.f32 %v5439_v23, %v2776_v29  ;;  %v3034_v29 = vpop.permute.xlu1 %3033 }
 0xae2   : > { %v6263_v32 = vpack.c.bf16 %v2697_v26, %v2692_v30  ;;  %v6271_v33 = vpack.c.bf16 %v2782_v27, %v2777_v31  ;;  %v5897_v35 = vpop.f32.mrb[14].mxu0  ;;  %v5911_v36 = vpop.f32.mrb[18].mxu1  ;;  %v3094_v26 = vmul.f32 %v7080_v63, %v3019_v18 }
 0xae3   : > { %v2707_v38 = vadd.f32 %v5897_v35, %v5439_v23  ;;  %v2792_v39 = vadd.f32 %v5911_v36, %v5439_v23  ;;  %v2701_v40 = vpop.f32.mrb[15].mxu0  ;;  %v2786_v42 = vpop.f32.mrb[19].mxu1  ;;  %v1216_v35 = vld [vmem:[%s8395_s28 + $0x8] sm:$0xff] }
 0xae4   : > { %v2702_v45 = vadd.f32 %v5439_v23, %v2701_v40  ;;  %v2787_v46 = vadd.f32 %v5439_v23, %v2786_v42  ;;  %6264 = vmatprep.subr.bf16.mxu0 %v6263_v32  ;;  %v3039_v36 = vpop.permute.xlu0 %3038  ;;  %v3097_v40 = vmul.f32 %v7080_v63, %v3034_v29 }
 0xae5   : > { %6266 = vmatpush3.bf16.msra.mxu0 %v6263_v32 }
 0xae6   : > { %v6267_v47 = vpack.c.bf16 %v2707_v38, %v2702_v45  ;;  %v6275_v48 = vpack.c.bf16 %v2792_v39, %v2787_v46  ;;  %v3096_v45 = vmul.f32 %v7080_v63, %v3029_v22 }
 0xae7   : > { %v5922_v34 = vpop.f32.mrb[16].mxu0  ;;  %v5936_v50 = vpop.f32.mrb[20].mxu1 }
 0xae8   : > { %v2892_v51 = vadd.f32 %v5922_v34, %v5439_v23  ;;  %v2977_v37 = vadd.f32 %v5936_v50, %v5439_v23  ;;  %v2886_v52 = vpop.f32.mrb[17].mxu0  ;;  %v2971_v53 = vpop.f32.mrb[21].mxu1  ;;  %6268 = vmatprep.subr.bf16.mxu0 %v6267_v47 }
 0xae9   : > { %v2887_v54 = vadd.f32 %v5439_v23, %v2886_v52  ;;  %v2972_v55 = vadd.f32 %v5439_v23, %v2971_v53  ;;  %6270 = vmatpush3.bf16.msra.mxu0 %v6267_v47 }
 0xaea   : > { %6272 = vmatprep.subr.bf16.mxu0 %v6271_v33 }
 0xaeb   : > { %v6279_v56 = vpack.c.bf16 %v2892_v51, %v2887_v54  ;;  %v6287_v57 = vpack.c.bf16 %v2977_v37, %v2972_v55  ;;  %v5925_v58 = vpop.f32.mrb[18].mxu0  ;;  %v5939_v60 = vpop.f32.mrb[22].mxu1  ;;  %v3098_v37 = vmul.f32 %v7080_v63, %v3039_v36  ;;  %v1217_v55 = vld [vmem:[%s8395_s28 + $0x10] sm:$0xff] }
 0xaec   : > { %v2902_v61 = vadd.f32 %v5925_v58, %v5439_v23  ;;  %v2987_v41 = vadd.f32 %v5939_v60, %v5439_v23  ;;  %v2896_v62 = vpop.f32.mrb[19].mxu0  ;;  %v2981_v0 = vpop.f32.mrb[23].mxu1 }
 0xaed   : > { %v2897_v43 = vadd.f32 %v5439_v23, %v2896_v62  ;;  %v2982_v1 = vadd.f32 %v5439_v23, %v2981_v0  ;;  %6274 = vmatpush3.bf16.msra.mxu0 %v6271_v33  ;;  %v7085_v23 = vld [vmem:[%s8394_s26] ss:$0 sm:$0xff]  ;;  %s8397_s26 = sld [smem:[#allocation17_spill]] }
 0xaee   : > { %6276 = vmatprep.subr.bf16.mxu0 %v6275_v48  ;;  %v3115_v25 = vadd.f32 %v7085_v23, %v3093_v19  ;;  %v3114_v28 = vadd.f32 %v7085_v23, %v3092_v21  ;;  %v3117_v32 = vadd.f32 %v7085_v23, %v3095_v24  ;;  %v1215_v33 = vld [vmem:[%s8395_s28] sm:$0xff]  ;;  %v3119_v60 = vadd.f32 %v7085_v23, %v3097_v40 }
 0xaef   : > { %v6283_v2 = vpack.c.bf16 %v2902_v61, %v2897_v43  ;;  %v6291_v5 = vpack.c.bf16 %v2987_v41, %v2982_v1  ;;  %v6295_v39 = vpack.c.bf16 %v1216_v35, %v1215_v33  ;;  %v3049_v61 = vpop.permute.xlu0 %3048  ;;  %v3118_v43 = vadd.f32 %v7085_v23, %v3096_v45 }
 0xaf1   : > { %6278 = vmatpush3.bf16.msra.mxu0 %v6275_v48  ;;  %v3116_v48 = vadd.f32 %v7085_v23, %v3094_v26  ;;  %6296 = vmatprep.subr.bf16.mxu1 %v6295_v39 }
 0xaf2   : > { %6280 = vmatprep.subr.bf16.mxu0 %v6279_v56  ;;  %6298 = vmatpush3.bf16.msra.mxu1 %v6295_v39 }
 0xaf3   : > { %6000 = vmatprep.subr.mxu1 %v1217_v55  ;;  %v3059_v29 = vpop.permute.xlu0 %3058 }
 0xaf5   : > { %6282 = vmatpush3.bf16.msra.mxu0 %v6279_v56  ;;  %v3044_v56 = vpop.permute.xlu1 %3043 }
 0xaf6   : > { %6284 = vmatprep.subr.bf16.mxu0 %v6283_v2  ;;  %v3099_v41 = vmul.f32 %v7080_v63, %v3044_v56  ;;  %6001 = vmatpush3.msra.mxu1 %v1217_v55 }
 0xaf9   : > { %6286 = vmatpush3.bf16.msra.mxu0 %v6283_v2  ;;  %v3054_v20 = vpop.permute.xlu1 %3053 }
 0xafa   : > { %6288 = vmatprep.subr.bf16.mxu0 %v6287_v57 }
 0xafd   : > { %6290 = vmatpush3.bf16.msra.mxu0 %v6287_v57 }
 0xafe   : > { %6292 = vmatprep.subr.bf16.mxu0 %v6291_v5 }
 0xb01   : > { %6294 = vmatpush3.bf16.msra.mxu0 %v6291_v5 }
 0xb04   : > { %5973 = vmatmul.mubr.f32.vlgmr.msra.gmra.mrb[20].mxu0 %v1198_v44 }
 0xb05   : > { %5975 = vmatprep.mubr.f32.mxu0 %v1199_v4 }
 0xb08   : > { %5976 = vmatmul.mubr.f32.gmra.mrb[22].mxu0 %v1200_v6 }
 0xb09   : > { %5978 = vmatprep.mubr.f32.mxu0 %v1201_v7 }
 0xb0c   : > { %5979 = vmatmul.mubr.f32.gmra.mrb[24].mxu0 %v1202_v49  ;;  %v3120_v49 = vadd.f32 %v7085_v23, %v3098_v37 }
 0xb0d   : > { %5981 = vmatprep.mubr.f32.mxu0 %v1203_v8 }
 0xb10   : > { %5982 = vmatmul.mubr.f32.gmra.mrb[26].mxu0 %v1204_v3  ;;  %v3100_v3 = vmul.f32 %v7080_v63, %v3049_v61 }
 0xb11   : > { %5984 = vmatprep.mubr.f32.mxu0 %v1205_v9 }
 0xb14   : > { %5985 = vmatmul.mubr.f32.gmra.mrb[28].mxu0 %v1206_v10 }
 0xb15   : > { %5987 = vmatprep.mubr.f32.mxu0 %v1207_v11 }
 0xb18   : > { %5988 = vmatmul.mubr.f32.gmra.mrb[30].mxu0 %v1208_v12 }
 0xb19   : > { %5990 = vmatprep.mubr.f32.mxu0 %v1209_v13 }
 0xb1c   : > { %5991 = vmatmul.mubr.f32.gmra.mrb[32].mxu0 %v1210_v14  ;;  %v3121_v14 = vadd.f32 %v7085_v23, %v3099_v41 }
 0xb1d   : > { %5993 = vmatprep.mubr.f32.mxu0 %v1211_v15 }
 0xb20   : > { %5994 = vmatmul.mubr.f32.gmra.mrb[34].mxu0 %v1212_v16 }
 0xbd7   : > { %v5974_v27 = vpop.f32.mrb[20].mxu0 }
 0xbd8   : > { %v7091_v30 = vadd.f32 %v5974_v27, %v3115_v25  ;;  %v3196_v31 = vpop.f32.mrb[21].mxu0  ;;  %v3101_v25 = vmul.f32 %v7080_v63, %v3054_v20 }
 0xbd9   : > { %v7096_v38 = vadd.f32 %v3196_v31, %v3114_v28  ;;  %v3122_v28 = vadd.f32 %v7085_v23, %v3100_v3  ;;  %v3069_v3 = vpop.permute.xlu0 %3068 }
 0xbda   : > { %vm3276_vm0 = vcmp.ge.f32.partialorder %v7091_v30, 0.0  ;;  %v3292_v42 = vmul.f32 0.1, %v7091_v30 }
 0xbdb   : > { %vm3275_vm9 = vcmp.ge.f32.partialorder %v7096_v38, 0.0  ;;  %v3291_v46 = vmul.f32 0.1, %v7096_v38  ;;  %v5977_v47 = vpop.f32.mrb[22].mxu0 }
 0xbdc   : > { %v3308_v34 = vsel %vm3276_vm0, %v7091_v30, %v3292_v42  ;;  %v7106_v50 = vadd.f32 %v5977_v47, %v3117_v32  ;;  %v3206_v51 = vpop.f32.mrb[23].mxu0 }
 0xbdd   : > { %v3340_v52 = vrot.slane %v3308_v34, 7  ;;  %v3307_v53 = vsel %vm3275_vm9, %v7096_v38, %v3291_v46  ;;  %v7110_v54 = vadd.f32 %v3206_v51, %v3116_v48  ;;  %v3102_v48 = vmul.f32 %v7080_v63, %v3059_v29 }
 0xbde   : > { %v3339_v57 = vrot.slane %v3307_v53, 7  ;;  %vm3278_vm11 = vcmp.ge.f32.partialorder %v7106_v50, 0.0  ;;  %v3294_v58 = vmul.f32 0.1, %v7106_v50 }
 0xbdf   : > { %vm3277_vm14 = vcmp.ge.f32.partialorder %v7110_v54, 0.0  ;;  %v3293_v62 = vmul.f32 0.1, %v7110_v54  ;;  %v5980_v0 = vpop.f32.mrb[24].mxu0 }
 0xbe0   : > { %v3310_v1 = vsel %vm3278_vm11, %v7106_v50, %v3294_v58  ;;  %v7121_v2 = vadd.f32 %v5980_v0, %v3119_v60  ;;  %v3216_v5 = vpop.f32.mrb[25].mxu0  ;;  %v7124_v44 = vsel %vm1639_vm12, %v3339_v57, %v3340_v52  ;;  %v7127_v4 = vsel %vm1639_vm12, 0.0, %v3339_v57 }
 0xbe1   : > { %v3309_v6 = vsel %vm3277_vm14, %v7110_v54, %v3293_v62  ;;  %v7130_v7 = vadd.f32 %v3216_v5, %v3118_v43  ;;  %v3391_v8 = vrot.slane %v7127_v4, 1  ;;  %v3344_v9 = vrot.slane %v3310_v1, 7  ;;  %v3064_v43 = vpop.permute.xlu1 %3063 }
 0xbe2   : > { %v3342_v10 = vrot.slane %v3309_v6, 7  ;;  %v3392_v11 = vrot.slane %v7124_v44, 1  ;;  %v3296_v12 = vmul.f32 0.1, %v7121_v2  ;;  %v3472_v18 = vrot.slane %v7127_v4, 2 }
 0xbe3   : > { %vm3279_vm15 = vcmp.ge.f32.partialorder %v7130_v7, 0.0  ;;  %v3295_v13 = vmul.f32 0.1, %v7130_v7  ;;  %v5983_v15 = vpop.f32.mrb[26].mxu0  ;;  %v3473_v19 = vrot.slane %v7124_v44, 2  ;;  %vm3280_vm0 = vcmp.ge.f32.partialorder %v7121_v2, 0.0 }
 0xbe4   : > { %v3226_v16 = vpop.f32.mrb[27].mxu0  ;;  %v3393_v59 = vsel %vm1508_vm4, %v3391_v8, %v3392_v11  ;;  %v7142_v17 = vsel %vm1639_vm12, %v3340_v52, %v3342_v10  ;;  %v7153_v27 = vadd.f32 %v5983_v15, %v3121_v14  ;;  %v3312_v36 = vsel %vm3280_vm0, %v7121_v2, %v3296_v12 }
 0xbe5   : > { %v3311_v21 = vsel %vm3279_vm15, %v7130_v7, %v3295_v13  ;;  %v7148_v22 = vadd.f32 %v3226_v16, %v3120_v49  ;;  %3424 = vrot.lane.b32.xlu0 %v3393_v59, %s8355_s11  ;;  %v3394_v24 = vrot.slane %v7142_v17, 1  ;;  %v3475_v35 = vrot.slane %v7142_v17, 2 }
 0xbe6   : > { %v3346_v26 = vrot.slane %v3311_v21, 7  ;;  %v3474_v40 = vsel %vm1515_vm5, %v3472_v18, %v3473_v19  ;;  %v7166_v42 = vsel %vm1639_vm12, %v3342_v10, %v3344_v9  ;;  %v3298_v34 = vmul.f32 0.1, %v7153_v27 }
 0xbe7   : > { %vm3281_vm9 = vcmp.ge.f32.partialorder %v7148_v22, 0.0  ;;  %v3297_v31 = vmul.f32 0.1, %v7148_v22  ;;  %v5986_v32 = vpop.f32.mrb[28].mxu0  ;;  %v3395_v33 = vsel %vm1508_vm4, %v3392_v11, %v3394_v24  ;;  %v3396_v51 = vrot.slane %v7166_v42, 1 }
 0xbe8   : > { %v3236_v39 = vpop.f32.mrb[29].mxu0  ;;  %3426 = vrot.lane.b32.xlu1 %v3395_v33, %s8355_s11  ;;  %v7169_v45 = vsel %vm1639_vm12, %v3344_v9, %v3346_v26  ;;  %v3348_v37 = vrot.slane %v3312_v36, 7  ;;  %vm3282_vm11 = vcmp.ge.f32.partialorder %v7153_v27, 0.0  ;;  %v3476_v53 = vsel %vm1515_vm5, %v3473_v19, %v3475_v35  ;;  %v3074_v36 = vpop.permute.xlu1 %3073 }
 0xbe9   : > { %v3313_v46 = vsel %vm3281_vm9, %v7148_v22, %v3297_v31  ;;  %v7172_v47 = vadd.f32 %v3236_v39, %v3122_v28  ;;  %3505 = vrot.lane.b32.xlu0 %v3474_v40, %s8363_s20  ;;  %v3398_v55 = vrot.slane %v7169_v45, 1  ;;  %v3123_v57 = vadd.f32 %v7085_v23, %v3101_v25 }
 0xbea   : > { %v3350_v56 = vrot.slane %v3313_v46, 7  ;;  %v3397_v60 = vsel %vm1508_vm4, %v3394_v24, %v3396_v51  ;;  %v3477_v61 = vrot.slane %v7166_v42, 2  ;;  %v3314_v62 = vsel %vm3282_vm11, %v7153_v27, %v3298_v34 }
 0xbeb   : > { %v5989_v52 = vpop.f32.mrb[30].mxu0  ;;  %v3299_v41 = vmul.f32 0.1, %v7172_v47  ;;  %v7188_v0 = vadd.f32 %v5986_v32, %v3123_v57  ;;  %vm3283_vm14 = vcmp.ge.f32.partialorder %v7172_v47, 0.0  ;;  %v3124_v1 = vadd.f32 %v7085_v23, %v3102_v48  ;;  %v3079_v48 = vpop.permute.xlu0 %3078 }
 0xbec   : > { %v3246_v58 = vpop.f32.mrb[31].mxu0  ;;  %3507 = vrot.lane.b32.xlu1 %v3476_v53, %s8363_s20  ;;  %v3399_v6 = vsel %vm1508_vm4, %v3396_v51, %v3398_v55  ;;  %v3479_v49 = vrot.slane %v7169_v45, 2  ;;  %v7197_v8 = vsel %vm1639_vm12, %v3346_v26, %v3348_v37  ;;  %v3103_v9 = vmul.f32 %v7080_v63, %v3064_v43 }
 0xbed   : > { %3428 = vrot.lane.b32.xlu0 %v3397_v60, %s8355_s11  ;;  %v3478_v11 = vsel %vm1515_vm5, %v3475_v35, %v3477_v61  ;;  %v3400_v12 = vrot.slane %v7197_v8, 1  ;;  %v7204_v13 = vsel %vm1639_vm12, %v3348_v37, %v3350_v56  ;;  %v3352_v14 = vrot.slane %v3314_v62, 7 }
 0xbee   : > { %v3315_v15 = vsel %vm3283_vm14, %v7172_v47, %v3299_v41  ;;  %v7207_v16 = vadd.f32 %v3246_v58, %v3124_v1  ;;  %v3300_v59 = vmul.f32 0.1, %v7188_v0  ;;  %v3104_v18 = vmul.f32 %v7080_v63, %v3069_v3 }
 0xbef   : > { %v7192_v5 = vpop.f32.mrb[32].mxu0  ;;  %vm3284_vm15 = vcmp.ge.f32.partialorder %v7188_v0, 0.0  ;;  %v3480_v20 = vsel %vm1515_vm5, %v3477_v61, %v3479_v49  ;;  %v3402_v21 = vrot.slane %v7204_v13, 1  ;;  %v3354_v24 = vrot.slane %v3315_v15, 7 }
 0xbf0   : > { %v3256_v10 = vpop.f32.mrb[33].mxu0  ;;  %3430 = vrot.lane.b32.xlu1 %v3399_v6, %s8355_s11  ;;  %v3125_v25 = vadd.f32 %v7085_v23, %v3103_v9  ;;  %v3401_v28 = vsel %vm1508_vm4, %v3398_v55, %v3400_v12  ;;  %v3481_v29 = vrot.slane %v7197_v8, 2  ;;  %v3301_v31 = vmul.f32 0.1, %v7207_v16  ;;  %v3084_v6 = vpop.permute.xlu1 %3083 }
 0xbf1   : > { %3509 = vrot.lane.b32.xlu0 %v3478_v11, %s8363_s20  ;;  %v7224_v32 = vsel %vm1639_vm12, %v3350_v56, %v3352_v14  ;;  %v3316_v33 = vsel %vm3284_vm15, %v7188_v0, %v3300_v59  ;;  %vm3285_vm0 = vcmp.ge.f32.partialorder %v7207_v16, 0.0  ;;  %v3126_v39 = vadd.f32 %v7085_v23, %v3104_v18 }
 0xbf2   : > { %v7227_v35 = vadd.f32 %v5989_v52, %v3125_v25  ;;  %v3403_v40 = vsel %vm1508_vm4, %v3400_v12, %v3402_v21  ;;  %v3483_v46 = vrot.slane %v7204_v13, 2  ;;  %v3105_v34 = vmul.f32 %v7080_v63, %v3074_v36 }
 0xbf3   : > { %v7213_v19 = vpop.f32.mrb[34].mxu0  ;;  %v3482_v51 = vsel %vm1515_vm5, %v3479_v49, %v3481_v29  ;;  %v3404_v37 = vrot.slane %v7224_v32, 1  ;;  %v7238_v52 = vsel %vm1639_vm12, %v3352_v14, %v3354_v24  ;;  %v3356_v53 = vrot.slane %v3316_v33, 7 }
 0xbf4   : > { %v3266_v26 = vpop.f32.mrb[35].mxu0  ;;  %3511 = vrot.lane.b32.xlu1 %v3480_v20, %s8363_s20  ;;  %v3317_v55 = vsel %vm3285_vm0, %v7207_v16, %v3301_v31  ;;  %v7241_v56 = vadd.f32 %v3256_v10, %v3126_v39  ;;  %v3302_v57 = vmul.f32 0.1, %v7227_v35  ;;  %v3106_v58 = vmul.f32 %v7080_v63, %v3079_v48 }
 0xbf5   : > { %3432 = vrot.lane.b32.xlu0 %v3401_v28, %s8355_s11  ;;  %vm3286_vm9 = vcmp.ge.f32.partialorder %v7227_v35, 0.0  ;;  %v3484_v60 = vsel %vm1515_vm5, %v3481_v29, %v3483_v46  ;;  %v3406_v61 = vrot.slane %v7238_v52, 1  ;;  %v3358_v41 = vrot.slane %v3317_v55, 7 }
 0xbf6   : > { %v3127_v62 = vadd.f32 %v7085_v23, %v3105_v34  ;;  %v3405_v43 = vsel %vm1508_vm4, %v3402_v21, %v3404_v37  ;;  %v3485_v1 = vrot.slane %v7224_v32, 2  ;;  %v3303_v49 = vmul.f32 0.1, %v7241_v56 }
 0xbf7   : > { %v7256_v3 = vsel %vm1639_vm12, %v3354_v24, %v3356_v53  ;;  %v3318_v9 = vsel %vm3286_vm9, %v7227_v35, %v3302_v57  ;;  %vm3287_vm11 = vcmp.ge.f32.partialorder %v7241_v56, 0.0  ;;  %v3128_v11 = vadd.f32 %v7085_v23, %v3106_v58 }
 0xbf8   : > { %3434 = vrot.lane.b32.xlu1 %v3403_v40, %s8355_s11  ;;  %v7260_v10 = vadd.f32 %v7192_v5, %v3127_v62  ;;  %v3407_v12 = vsel %vm1508_vm4, %v3404_v37, %v3406_v61  ;;  %v3487_v14 = vrot.slane %v7238_v52, 2  ;;  %v3107_v15 = vmul.f32 %v7080_v63, %v3084_v6 }
 0xbf9   : > { %3513 = vrot.lane.b32.xlu0 %v3482_v51, %s8363_s20  ;;  %v3486_v59 = vsel %vm1515_vm5, %v3483_v46, %v3485_v1  ;;  %v3408_v18 = vrot.slane %v7256_v3, 1  ;;  %v7271_v20 = vsel %vm1639_vm12, %v3356_v53, %v3358_v41  ;;  %v3360_v5 = vrot.slane %v3318_v9, 7 }
 0xbfa   : > { %v3319_v21 = vsel %vm3287_vm11, %v7241_v56, %v3303_v49  ;;  %v7274_v24 = vadd.f32 %v3266_v26, %v3128_v11  ;;  %v3304_v25 = vmul.f32 0.1, %v7260_v10  ;;  %vm3288_vm14 = vcmp.ge.f32.partialorder %v7260_v10, 0.0 }
 0xbfb   : > { %v3488_v63 = vsel %vm1515_vm5, %v3485_v1, %v3487_v14  ;;  %v3410_v28 = vrot.slane %v7271_v20, 1  ;;  %v3362_v29 = vrot.slane %v3319_v21, 7  ;;  %v3129_v31 = vadd.f32 %v7085_v23, %v3107_v15 }
 0xbfc   : > { %3515 = vrot.lane.b32.xlu1 %v3484_v60, %s8363_s20  ;;  %v3409_v33 = vsel %vm1508_vm4, %v3406_v61, %v3408_v18  ;;  %v3489_v26 = vrot.slane %v7256_v3, 2  ;;  %v3305_v36 = vmul.f32 0.1, %v7274_v24  ;;  %v7288_v39 = vsel %vm1639_vm12, %v3358_v41, %v3360_v5 }
 0xbfd   : > { %3436 = vrot.lane.b32.xlu0 %v3405_v43, %s8355_s11  ;;  %v3320_v40 = vsel %vm3288_vm14, %v7260_v10, %v3304_v25  ;;  %v7292_v46 = vadd.f32 %v7213_v19, %v3129_v31  ;;  %vm3289_vm15 = vcmp.ge.f32.partialorder %v7274_v24, 0.0  ;;  %v3411_v23 = vsel %vm1508_vm4, %v3408_v18, %v3410_v28 }
 0xbfe   : > { %v3491_v48 = vrot.slane %v7271_v20, 2  ;;  %v3490_v34 = vsel %vm1515_vm5, %v3487_v14, %v3489_v26  ;;  %v3412_v51 = vrot.slane %v7288_v39, 1  ;;  %v7301_v37 = vsel %vm1639_vm12, %v3360_v5, %v3362_v29 }
 0xbff   : > { %v3364_v53 = vrot.slane %v3320_v40, 7  ;;  %v3321_v55 = vsel %vm3289_vm15, %v7274_v24, %v3305_v36  ;;  %v3306_v19 = vmul.f32 0.1, %v7292_v46  ;;  %vm3290_vm0 = vcmp.ge.f32.partialorder %v7292_v46, 0.0 }
 0xc00   : > { %3438 = vrot.lane.b32.xlu1 %v3407_v12, %s8355_s11  ;;  %v3492_v57 = vsel %vm1515_vm5, %v3489_v26, %v3491_v48  ;;  %v3414_v58 = vrot.slane %v7301_v37, 1  ;;  %v3366_v60 = vrot.slane %v3321_v55, 7  ;;  %v3413_v61 = vsel %vm1508_vm4, %v3410_v28, %v3412_v51 }
 0xc01   : > { %3517 = vrot.lane.b32.xlu0 %v3486_v59, %s8363_s20  ;;  %v3493_v41 = vrot.slane %v7288_v39, 2  ;;  %v7314_v62 = vsel %vm1639_vm12, %v3362_v29, %v3364_v53  ;;  %v3322_v43 = vsel %vm3290_vm0, %v7292_v46, %v3306_v19  ;;  %v3495_v6 = vrot.slane %v7301_v37, 2 }
 0xc02   : > { %v3415_v1 = vsel %vm1508_vm4, %v3412_v51, %v3414_v58  ;;  %v3416_v9 = vrot.slane %v7314_v62, 1  ;;  %v7323_v11 = vsel %vm1639_vm12, %v3364_v53, %v3366_v60  ;;  %v3368_v12 = vrot.slane %v3322_v43, 7 }
 0xc03   : > { %v3494_v49 = vsel %vm1515_vm5, %v3491_v48, %v3493_v41  ;;  %v3496_v14 = vsel %vm1515_vm5, %v3493_v41, %v3495_v6  ;;  %v3418_v15 = vrot.slane %v7323_v11, 1  ;;  %v3497_v18 = vrot.slane %v7314_v62, 2 }
 0xc04   : > { %3519 = vrot.lane.b32.xlu1 %v3488_v63, %s8363_s20  ;;  %v3417_v59 = vsel %vm1508_vm4, %v3414_v58, %v3416_v9  ;;  %v7333_v5 = vsel %vm1639_vm12, %v3366_v60, %v3368_v12  ;;  %v3499_v25 = vrot.slane %v7323_v11, 2  ;;  %v3388_v29 = vsel %vm1639_vm12, %v3368_v12, 0.0 }
 0xc05   : > { %3440 = vrot.lane.b32.xlu0 %v3409_v33, %s8355_s11  ;;  %v3419_v21 = vsel %vm1508_vm4, %v3416_v9, %v3418_v15  ;;  %v3498_v63 = vsel %vm1515_vm5, %v3495_v6, %v3497_v18  ;;  %v3420_v28 = vrot.slane %v7333_v5, 1  ;;  %v3422_v33 = vrot.slane %v3388_v29, 1 }
 0xc06   : > { %v3500_v31 = vsel %vm1515_vm5, %v3497_v18, %v3499_v25  ;;  %v3501_v36 = vrot.slane %v7333_v5, 2  ;;  %vm3591_vm12 = vcmask 195584  }
 0xc07   : > { %v3421_v26 = vsel %vm1508_vm4, %v3418_v15, %v3420_v28  ;;  %v3423_v40 = vsel %vm1508_vm4, %v3420_v28, %v3422_v33 }
 0xc08   : > { %3442 = vrot.lane.b32.xlu1 %v3411_v23, %s8355_s11  ;;  %v3503_v23 = vrot.slane %v3388_v29, 2  ;;  %v3502_v48 = vsel %vm1515_vm5, %v3499_v25, %v3501_v36 }
 0xc09   : > { %3521 = vrot.lane.b32.xlu0 %v3490_v34, %s8363_s20 }
 0xc0a   : > { %v3504_v34 = vsel %vm1515_vm5, %v3501_v36, %v3503_v23 }
 0xc0c   : > { %3523 = vrot.lane.b32.xlu1 %v3492_v57, %s8363_s20 }
 0xc0d   : > { %3444 = vrot.lane.b32.xlu0 %v3413_v61, %s8355_s11 }
 0xc10   : > { %3446 = vrot.lane.b32.xlu1 %v3415_v1, %s8355_s11 }
 0xc11   : > { %3525 = vrot.lane.b32.xlu0 %v3494_v49, %s8363_s20 }
 0xc14   : > { %3527 = vrot.lane.b32.xlu1 %v3496_v14, %s8363_s20 }
 0xc15   : > { %3448 = vrot.lane.b32.xlu0 %v3417_v59, %s8355_s11 }
 0xc18   : > { %3450 = vrot.lane.b32.xlu1 %v3419_v21, %s8355_s11 }
 0xc19   : > { %3529 = vrot.lane.b32.xlu0 %v3498_v63, %s8363_s20 }
 0xc1c   : > { %3531 = vrot.lane.b32.xlu1 %v3500_v31, %s8363_s20 }
 0xc1d   : > { %3452 = vrot.lane.b32.xlu0 %v3421_v26, %s8355_s11 }
 0xc20   : > { %3454 = vrot.lane.b32.xlu1 %v3423_v40, %s8355_s11 }
 0xc21   : > { %3533 = vrot.lane.b32.xlu0 %v3502_v48, %s8363_s20 }
 0xc24   : > { %3535 = vrot.lane.b32.xlu1 %v3504_v34, %s8363_s20 }
 0xc57   : > { %v3425_v51 = vpop.permute.xlu0 %3424 }
 0xc58   : > { %v3553_v55 = vsel %vm1965_vm13, %v7127_v4, %v3425_v51 }
 0xc5a   : > { %v3427_v53 = vpop.permute.xlu1 %3426 }
 0xc5b   : > { %v3506_v19 = vpop.permute.xlu0 %3505  ;;  %v3554_v58 = vsel %vm1965_vm13, %v7124_v44, %v3427_v53 }
 0xc5c   : > { %v3569_v57 = vsel %vm1238_vm1, %v3553_v55, %v3506_v19 }
 0xc5d   : > { %6002 = vmatprep.mubr.msk.f32.mxu1 %vm3591_vm12, %v3569_v57 }
 0xc5e   : > { %v3508_v60 = vpop.permute.xlu1 %3507 }
 0xc5f   : > { %v3570_v61 = vsel %vm1238_vm1, %v3554_v58, %v3508_v60  ;;  %v3429_v41 = vpop.permute.xlu0 %3428 }
 0xc60   : > { %6003 = vmatmul.mubr.msk.f32.vlgmr.msra.gmra.mrb[24].mxu1 %vm3591_vm12, %v3570_v61  ;;  %v3555_v1 = vsel %vm1965_vm13, %v7142_v17, %v3429_v41 }
 0xc62   : > { %v3431_v43 = vpop.permute.xlu1 %3430 }
 0xc63   : > { %v3510_v6 = vpop.permute.xlu0 %3509  ;;  %v3556_v49 = vsel %vm1965_vm13, %v7166_v42, %v3431_v43 }
 0xc64   : > { %v3571_v4 = vsel %vm1238_vm1, %v3555_v1, %v3510_v6 }
 0xc65   : > { %6005 = vmatprep.mubr.msk.f32.mxu1 %vm3591_vm12, %v3571_v4 }
 0xc66   : > { %v3512_v9 = vpop.permute.xlu1 %3511 }
 0xc67   : > { %v3572_v44 = vsel %vm1238_vm1, %v3556_v49, %v3512_v9  ;;  %v3433_v12 = vpop.permute.xlu0 %3432 }
 0xc68   : > { %6006 = vmatmul.mubr.msk.f32.gmra.mrb[26].mxu1 %vm3591_vm12, %v3572_v44  ;;  %v3557_v15 = vsel %vm1965_vm13, %v7169_v45, %v3433_v12 }
 0xc6a   : > { %v3435_v14 = vpop.permute.xlu1 %3434 }
 0xc6b   : > { %v3514_v59 = vpop.permute.xlu0 %3513  ;;  %v3558_v18 = vsel %vm1965_vm13, %v7197_v8, %v3435_v14 }
 0xc6c   : > { %v3573_v17 = vsel %vm1238_vm1, %v3557_v15, %v3514_v59  ;;  %v1219_v15 = vld [vmem:[%s8396_s18] sm:$0xff]  ;;  %v1220_v59 = vld [vmem:[%s8396_s18 + $0x8] sm:$0xff] }
 0xc6d   : > { %6008 = vmatprep.mubr.msk.f32.mxu1 %vm3591_vm12, %v3573_v17  ;;  %v6299_v17 = vpack.c.bf16 %v1220_v59, %v1219_v15 }
 0xc6e   : > { %v3516_v21 = vpop.permute.xlu1 %3515 }
 0xc6f   : > { %v3574_v42 = vsel %vm1238_vm1, %v3558_v18, %v3516_v21  ;;  %v3437_v25 = vpop.permute.xlu0 %3436  ;;  %v1221_v18 = vld [vmem:[%s8396_s18 + $0x10] sm:$0xff]  ;;  %6300 = vmatprep.subr.bf16.mxu1 %v6299_v17 }
 0xc70   : > { %6009 = vmatmul.mubr.msk.f32.gmra.mrb[28].mxu1 %vm3591_vm12, %v3574_v42  ;;  %v3559_v28 = vsel %vm1965_vm13, %v7204_v13, %v3437_v25 }
 0xc71   : > { %6302 = vmatpush3.bf16.msra.mxu1 %v6299_v17 }
 0xc72   : > { %v3439_v63 = vpop.permute.xlu1 %3438  ;;  %6030 = vmatprep.subr.mxu1 %v1221_v18 }
 0xc73   : > { %v3518_v29 = vpop.permute.xlu0 %3517  ;;  %v3560_v31 = vsel %vm1965_vm13, %v7224_v32, %v3439_v63 }
 0xc74   : > { %v3575_v45 = vsel %vm1238_vm1, %v3559_v28, %v3518_v29 }
 0xc75   : > { %6011 = vmatprep.mubr.msk.f32.mxu1 %vm3591_vm12, %v3575_v45  ;;  %6031 = vmatpush3.msra.mxu1 %v1221_v18 }
 0xc76   : > { %v3520_v33 = vpop.permute.xlu1 %3519 }
 0xc77   : > { %v3576_v8 = vsel %vm1238_vm1, %v3560_v31, %v3520_v33  ;;  %v3441_v26 = vpop.permute.xlu0 %3440 }
 0xc78   : > { %6012 = vmatmul.mubr.msk.f32.gmra.mrb[30].mxu1 %vm3591_vm12, %v3576_v8  ;;  %v3561_v40 = vsel %vm1965_vm13, %v7238_v52, %v3441_v26 }
 0xc7a   : > { %v3443_v36 = vpop.permute.xlu1 %3442 }
 0xc7b   : > { %v3522_v23 = vpop.permute.xlu0 %3521  ;;  %v3562_v48 = vsel %vm1965_vm13, %v7256_v3, %v3443_v36 }
 0xc7c   : > { %v3577_v13 = vsel %vm1238_vm1, %v3561_v40, %v3522_v23 }
 0xc7d   : > { %6014 = vmatprep.mubr.msk.f32.mxu1 %vm3591_vm12, %v3577_v13 }
 0xc7e   : > { %v3524_v34 = vpop.permute.xlu1 %3523 }
 0xc7f   : > { %v3578_v32 = vsel %vm1238_vm1, %v3562_v48, %v3524_v34  ;;  %v3445_v51 = vpop.permute.xlu0 %3444 }
 0xc80   : > { %6015 = vmatmul.mubr.msk.f32.gmra.mrb[32].mxu1 %vm3591_vm12, %v3578_v32  ;;  %v3563_v55 = vsel %vm1965_vm13, %v7271_v20, %v3445_v51 }
 0xc82   : > { %v3447_v53 = vpop.permute.xlu1 %3446 }
 0xc83   : > { %v3526_v19 = vpop.permute.xlu0 %3525  ;;  %v3564_v57 = vsel %vm1965_vm13, %v7288_v39, %v3447_v53 }
 0xc84   : > { %v3579_v52 = vsel %vm1238_vm1, %v3563_v55, %v3526_v19 }
 0xc85   : > { %6017 = vmatprep.mubr.msk.f32.mxu1 %vm3591_vm12, %v3579_v52 }
 0xc86   : > { %v3528_v58 = vpop.permute.xlu1 %3527 }
 0xc87   : > { %v3580_v3 = vsel %vm1238_vm1, %v3564_v57, %v3528_v58  ;;  %v3449_v60 = vpop.permute.xlu0 %3448 }
 0xc88   : > { %6018 = vmatmul.mubr.msk.f32.gmra.mrb[34].mxu1 %vm3591_vm12, %v3580_v3  ;;  %v3565_v41 = vsel %vm1965_vm13, %v7301_v37, %v3449_v60 }
 0xc8a   : > { %v3451_v61 = vpop.permute.xlu1 %3450 }
 0xc8b   : > { %v3530_v43 = vpop.permute.xlu0 %3529  ;;  %v3566_v39 = vsel %vm1965_vm13, %v7314_v62, %v3451_v61 }
 0xc8c   : > { %v3581_v20 = vsel %vm1238_vm1, %v3565_v41, %v3530_v43 }
 0xc8d   : > { %6020 = vmatprep.mubr.msk.f32.mxu1 %vm3591_vm12, %v3581_v20 }
 0xc8e   : > { %v3532_v1 = vpop.permute.xlu1 %3531 }
 0xc8f   : > { %v3582_v6 = vsel %vm1238_vm1, %v3566_v39, %v3532_v1  ;;  %v3453_v4 = vpop.permute.xlu0 %3452 }
 0xc90   : > { %6021 = vmatmul.mubr.msk.f32.gmra.mrb[36].mxu1 %vm3591_vm12, %v3582_v6  ;;  %v3567_v37 = vsel %vm1965_vm13, %v7323_v11, %v3453_v4  ;;  %v7421_v11 = vld [vmem:[%s8397_s26] ss:$0 sm:$0xff]  ;;  %s8359_s26 = smov 40  }
 0xc92   : > { %v3455_v49 = vpop.permute.xlu1 %3454 }
 0xc93   : > { %v3534_v9 = vpop.permute.xlu0 %3533  ;;  %v3568_v62 = vsel %vm1965_vm13, %v7333_v5, %v3455_v49 }
 0xc94   : > { %v3583_v44 = vsel %vm1238_vm1, %v3567_v37, %v3534_v9 }
 0xc95   : > { %6023 = vmatprep.mubr.msk.f32.mxu1 %vm3591_vm12, %v3583_v44 }
 0xc96   : > { %v3536_v12 = vpop.permute.xlu1 %3535 }
 0xc97   : > { %v3584_v14 = vsel %vm1238_vm1, %v3568_v62, %v3536_v12 }
 0xc98   : > { %6024 = vmatmul.mubr.msk.f32.gmra.mrb[38].mxu1 %vm3591_vm12, %v3584_v14 }
 0xd33   : > { %v6004_v21 = vpop.f32.mrb[24].mxu1 }
 0xd34   : > { %v3712_v42 = vadd.f32 %v6004_v21, %v7421_v11  ;;  %v3706_v25 = vpop.f32.mrb[25].mxu1 }
 0xd35   : > { %v3707_v5 = vadd.f32 %v7421_v11, %v3706_v25 }
 0xd36   : > { %v7426_v63 = vadd.f32 %v3712_v42, %v7091_v30 }
 0xd37   : > { %v7429_v28 = vadd.f32 %v3707_v5, %v7096_v38 }
 0xd38   : > { %vm3802_vm9 = vcmp.ge.f32.partialorder %v7426_v63, 0.0  ;;  %v3818_v29 = vmul.f32 0.1, %v7426_v63 }
 0xd39   : > { %vm3801_vm11 = vcmp.ge.f32.partialorder %v7429_v28, 0.0  ;;  %v3817_v45 = vmul.f32 0.1, %v7429_v28 }
 0xd3a   : > { %v3834_v31 = vsel %vm3802_vm9, %v7426_v63, %v3818_v29 }
 0xd3b   : > { %v3866_v33 = vrot.slane %v3834_v31, 5  ;;  %v3833_v8 = vsel %vm3801_vm11, %v7429_v28, %v3817_v45  ;;  %v6007_v26 = vpop.f32.mrb[26].mxu1 }
 0xd3c   : > { %v3722_v30 = vadd.f32 %v6007_v26, %v7421_v11  ;;  %v3716_v36 = vpop.f32.mrb[27].mxu1  ;;  %v3865_v40 = vrot.slane %v3833_v8, 5 }
 0xd3d   : > { %v3717_v38 = vadd.f32 %v7421_v11, %v3716_v36 }
 0xd3e   : > { %v7440_v23 = vadd.f32 %v3722_v30, %v7106_v50  ;;  %v7443_v13 = vsel %vm1503_vm3, %v3865_v40, %v3866_v33  ;;  %v7446_v48 = vsel %vm1503_vm3, 0.0, %v3865_v40 }
 0xd3f   : > { %v7449_v34 = vadd.f32 %v3717_v38, %v7110_v54  ;;  %v3917_v32 = vrot.slane %v7446_v48, 3  ;;  %v3918_v51 = vrot.slane %v7443_v13, 3  ;;  %v3998_v50 = vrot.slane %v7446_v48, 6 }
 0xd40   : > { %vm3804_vm14 = vcmp.ge.f32.partialorder %v7440_v23, 0.0  ;;  %v3820_v53 = vmul.f32 0.1, %v7440_v23  ;;  %v3999_v52 = vrot.slane %v7443_v13, 6 }
 0xd41   : > { %vm3803_vm15 = vcmp.ge.f32.partialorder %v7449_v34, 0.0  ;;  %v3819_v55 = vmul.f32 0.1, %v7449_v34  ;;  %v3919_v19 = vsel %vm1522_vm7, %v3917_v32, %v3918_v51 }
 0xd42   : > { %v3836_v54 = vsel %vm3804_vm14, %v7440_v23, %v3820_v53  ;;  %3950 = vrot.lane.b32.xlu0 %v3919_v19, %s8355_s11  ;;  %v4000_v20 = vsel %vm1540_vm6, %v3998_v50, %v3999_v52 }
 0xd43   : > { %v3870_v57 = vrot.slane %v3836_v54, 5  ;;  %v3835_v58 = vsel %vm3803_vm15, %v7449_v34, %v3819_v55  ;;  %v6010_v3 = vpop.f32.mrb[28].mxu1 }
 0xd44   : > { %v3868_v60 = vrot.slane %v3835_v58, 5  ;;  %v3732_v61 = vadd.f32 %v6010_v3, %v7421_v11  ;;  %v3726_v41 = vpop.f32.mrb[29].mxu1 }
 0xd45   : > { %v3727_v43 = vadd.f32 %v7421_v11, %v3726_v41 }
 0xd46   : > { %v7467_v39 = vadd.f32 %v3732_v61, %v7121_v2  ;;  %4031 = vrot.lane.b32.xlu0 %v4000_v20, %s8363_s20  ;;  %v7471_v1 = vsel %vm1503_vm3, %v3866_v33, %v3868_v60  ;;  %v7474_v6 = vsel %vm1503_vm3, %v3868_v60, %v3870_v57 }
 0xd47   : > { %v7477_v4 = vadd.f32 %v3727_v43, %v7130_v7  ;;  %v3920_v49 = vrot.slane %v7471_v1, 3  ;;  %v3922_v37 = vrot.slane %v7474_v6, 3  ;;  %v4001_v9 = vrot.slane %v7471_v1, 6 }
 0xd48   : > { %vm3806_vm0 = vcmp.ge.f32.partialorder %v7467_v39, 0.0  ;;  %v3822_v2 = vmul.f32 0.1, %v7467_v39  ;;  %v4003_v44 = vrot.slane %v7474_v6, 6 }
 0xd49   : > { %vm3805_vm9 = vcmp.ge.f32.partialorder %v7477_v4, 0.0  ;;  %v3821_v62 = vmul.f32 0.1, %v7477_v4  ;;  %v3923_v12 = vsel %vm1522_vm7, %v3920_v49, %v3922_v37  ;;  %v3921_v7 = vsel %vm1522_vm7, %v3918_v51, %v3920_v49 }
 0xd4a   : > { %v3838_v14 = vsel %vm3806_vm0, %v7467_v39, %v3822_v2  ;;  %3954 = vrot.lane.b32.xlu0 %v3923_v12, %s8355_s11  ;;  %3952 = vrot.lane.b32.xlu1 %v3921_v7, %s8355_s11  ;;  %v4004_v5 = vsel %vm1540_vm6, %v4001_v9, %v4003_v44  ;;  %v4002_v29 = vsel %vm1540_vm6, %v3999_v52, %v4001_v9 }
 0xd4b   : > { %v3874_v15 = vrot.slane %v3838_v14, 5  ;;  %v3837_v59 = vsel %vm3805_vm9, %v7477_v4, %v3821_v62  ;;  %v6013_v17 = vpop.f32.mrb[30].mxu1 }
 0xd4c   : > { %v3872_v18 = vrot.slane %v3837_v59, 5  ;;  %v3742_v21 = vadd.f32 %v6013_v17, %v7421_v11  ;;  %v3736_v42 = vpop.f32.mrb[31].mxu1 }
 0xd4d   : > { %v3737_v25 = vadd.f32 %v7421_v11, %v3736_v42 }
 0xd4e   : > { %v7498_v45 = vadd.f32 %v3742_v21, %v7153_v27  ;;  %4035 = vrot.lane.b32.xlu0 %v4004_v5, %s8363_s20  ;;  %4033 = vrot.lane.b32.xlu1 %v4002_v29, %s8363_s20  ;;  %v7503_v31 = vsel %vm1503_vm3, %v3870_v57, %v3872_v18  ;;  %v7506_v33 = vsel %vm1503_vm3, %v3872_v18, %v3874_v15 }
 0xd4f   : > { %v7509_v8 = vadd.f32 %v3737_v25, %v7148_v22  ;;  %v3924_v26 = vrot.slane %v7503_v31, 3  ;;  %v3926_v30 = vrot.slane %v7506_v33, 3  ;;  %v4005_v36 = vrot.slane %v7503_v31, 6 }
 0xd50   : > { %vm3808_vm11 = vcmp.ge.f32.partialorder %v7498_v45, 0.0  ;;  %v3824_v27 = vmul.f32 0.1, %v7498_v45  ;;  %v4007_v40 = vrot.slane %v7506_v33, 6 }
 0xd51   : > { %vm3807_vm14 = vcmp.ge.f32.partialorder %v7509_v8, 0.0  ;;  %v3823_v38 = vmul.f32 0.1, %v7509_v8  ;;  %v3927_v32 = vsel %vm1522_vm7, %v3924_v26, %v3926_v30  ;;  %v3925_v22 = vsel %vm1522_vm7, %v3922_v37, %v3924_v26 }
 0xd52   : > { %v3840_v51 = vsel %vm3808_vm11, %v7498_v45, %v3824_v27  ;;  %3958 = vrot.lane.b32.xlu0 %v3927_v32, %s8355_s11  ;;  %3956 = vrot.lane.b32.xlu1 %v3925_v22, %s8355_s11  ;;  %v4008_v58 = vsel %vm1540_vm6, %v4005_v36, %v4007_v40  ;;  %v4006_v3 = vsel %vm1540_vm6, %v4003_v44, %v4005_v36 }
 0xd53   : > { %v3878_v53 = vrot.slane %v3840_v51, 5  ;;  %v3839_v50 = vsel %vm3807_vm14, %v7509_v8, %v3823_v38  ;;  %v6016_v55 = vpop.f32.mrb[32].mxu1 }
 0xd54   : > { %v3876_v19 = vrot.slane %v3839_v50, 5  ;;  %v3752_v52 = vadd.f32 %v6016_v55, %v7421_v11  ;;  %v3746_v54 = vpop.f32.mrb[33].mxu1 }
 0xd55   : > { %v3747_v57 = vadd.f32 %v7421_v11, %v3746_v54 }
 0xd56   : > { %v7530_v60 = vadd.f32 %v3752_v52, %v7188_v0  ;;  %4039 = vrot.lane.b32.xlu0 %v4008_v58, %s8363_s20  ;;  %4037 = vrot.lane.b32.xlu1 %v4006_v3, %s8363_s20  ;;  %v7535_v61 = vsel %vm1503_vm3, %v3874_v15, %v3876_v19  ;;  %v7538_v41 = vsel %vm1503_vm3, %v3876_v19, %v3878_v53 }
 0xd57   : > { %v7541_v43 = vadd.f32 %v3747_v57, %v7172_v47  ;;  %v3928_v20 = vrot.slane %v7535_v61, 3  ;;  %v3930_v49 = vrot.slane %v7538_v41, 3  ;;  %v4009_v37 = vrot.slane %v7535_v61, 6 }
 0xd58   : > { %vm3810_vm15 = vcmp.ge.f32.partialorder %v7530_v60, 0.0  ;;  %v3826_v0 = vmul.f32 0.1, %v7530_v60  ;;  %v4011_v2 = vrot.slane %v7538_v41, 6 }
 0xd59   : > { %vm3809_vm0 = vcmp.ge.f32.partialorder %v7541_v43, 0.0  ;;  %v3825_v9 = vmul.f32 0.1, %v7541_v43  ;;  %v3931_v44 = vsel %vm1522_vm7, %v3928_v20, %v3930_v49  ;;  %v3929_v47 = vsel %vm1522_vm7, %v3926_v30, %v3928_v20 }
 0xd5a   : > { %v3842_v62 = vsel %vm3810_vm15, %v7530_v60, %v3826_v0  ;;  %3962 = vrot.lane.b32.xlu0 %v3931_v44, %s8355_s11  ;;  %3960 = vrot.lane.b32.xlu1 %v3929_v47, %s8355_s11  ;;  %v4012_v21 = vsel %vm1540_vm6, %v4009_v37, %v4011_v2  ;;  %v4010_v42 = vsel %vm1540_vm6, %v4007_v40, %v4009_v37 }
 0xd5b   : > { %v3882_v12 = vrot.slane %v3842_v62, 5  ;;  %v3841_v7 = vsel %vm3809_vm0, %v7541_v43, %v3825_v9  ;;  %v6019_v14 = vpop.f32.mrb[34].mxu1 }
 0xd5c   : > { %v3880_v15 = vrot.slane %v3841_v7, 5  ;;  %v3762_v59 = vadd.f32 %v6019_v14, %v7421_v11  ;;  %v3756_v17 = vpop.f32.mrb[35].mxu1 }
 0xd5d   : > { %v3757_v18 = vadd.f32 %v7421_v11, %v3756_v17 }
 0xd5e   : > { %v7562_v25 = vadd.f32 %v3762_v59, %v7227_v35  ;;  %4043 = vrot.lane.b32.xlu0 %v4012_v21, %s8363_s20  ;;  %4041 = vrot.lane.b32.xlu1 %v4010_v42, %s8363_s20  ;;  %v7567_v5 = vsel %vm1503_vm3, %v3878_v53, %v3880_v15  ;;  %v7570_v29 = vsel %vm1503_vm3, %v3880_v15, %v3882_v12 }
 0xd5f   : > { %v7573_v26 = vadd.f32 %v3757_v18, %v7207_v16  ;;  %v3932_v30 = vrot.slane %v7567_v5, 3  ;;  %v3934_v27 = vrot.slane %v7570_v29, 3  ;;  %v4013_v36 = vrot.slane %v7567_v5, 6 }
 0xd60   : > { %vm3812_vm9 = vcmp.ge.f32.partialorder %v7562_v25, 0.0  ;;  %v3828_v35 = vmul.f32 0.1, %v7562_v25  ;;  %v4015_v40 = vrot.slane %v7570_v29, 6 }
 0xd61   : > { %vm3811_vm11 = vcmp.ge.f32.partialorder %v7573_v26, 0.0  ;;  %v3827_v38 = vmul.f32 0.1, %v7573_v26  ;;  %v3935_v32 = vsel %vm1522_vm7, %v3932_v30, %v3934_v27  ;;  %v3933_v16 = vsel %vm1522_vm7, %v3930_v49, %v3932_v30 }
 0xd62   : > { %v3844_v22 = vsel %vm3812_vm9, %v7562_v25, %v3828_v35  ;;  %3966 = vrot.lane.b32.xlu0 %v3935_v32, %s8355_s11  ;;  %3964 = vrot.lane.b32.xlu1 %v3933_v16, %s8355_s11  ;;  %v4016_v57 = vsel %vm1540_vm6, %v4013_v36, %v4015_v40  ;;  %v4014_v58 = vsel %vm1540_vm6, %v4011_v2, %v4013_v36 }
 0xd63   : > { %v3886_v51 = vrot.slane %v3844_v22, 5  ;;  %v3843_v53 = vsel %vm3811_vm11, %v7573_v26, %v3827_v38  ;;  %v6022_v50 = vpop.f32.mrb[36].mxu1 }
 0xd64   : > { %v3884_v55 = vrot.slane %v3843_v53, 5  ;;  %v3772_v19 = vadd.f32 %v6022_v50, %v7421_v11  ;;  %v3766_v52 = vpop.f32.mrb[37].mxu1 }
 0xd65   : > { %v3767_v54 = vadd.f32 %v7421_v11, %v3766_v52 }
 0xd66   : > { %v7594_v3 = vadd.f32 %v3772_v19, %v7260_v10  ;;  %4047 = vrot.lane.b32.xlu0 %v4016_v57, %s8363_s20  ;;  %4045 = vrot.lane.b32.xlu1 %v4014_v58, %s8363_s20  ;;  %v7599_v20 = vsel %vm1503_vm3, %v3882_v12, %v3884_v55  ;;  %v7602_v49 = vsel %vm1503_vm3, %v3884_v55, %v3886_v51 }
 0xd67   : > { %v7605_v0 = vadd.f32 %v3767_v54, %v7241_v56  ;;  %v3936_v37 = vrot.slane %v7599_v20, 3  ;;  %v3938_v2 = vrot.slane %v7602_v49, 3  ;;  %v4017_v9 = vrot.slane %v7599_v20, 6 }
 0xd68   : > { %vm3814_vm14 = vcmp.ge.f32.partialorder %v7594_v3, 0.0  ;;  %v3830_v10 = vmul.f32 0.1, %v7594_v3  ;;  %v4019_v44 = vrot.slane %v7602_v49, 6 }
 0xd69   : > { %vm3813_vm15 = vcmp.ge.f32.partialorder %v7605_v0, 0.0  ;;  %v3829_v47 = vmul.f32 0.1, %v7605_v0  ;;  %v3939_v62 = vsel %vm1522_vm7, %v3936_v37, %v3938_v2  ;;  %v3937_v56 = vsel %vm1522_vm7, %v3934_v27, %v3936_v37 }
 0xd6a   : > { %v3846_v12 = vsel %vm3814_vm14, %v7594_v3, %v3830_v10  ;;  %3970 = vrot.lane.b32.xlu0 %v3939_v62, %s8355_s11  ;;  %3968 = vrot.lane.b32.xlu1 %v3937_v56, %s8355_s11  ;;  %v4020_v42 = vsel %vm1540_vm6, %v4017_v9, %v4019_v44  ;;  %v4018_v30 = vsel %vm1540_vm6, %v4015_v40, %v4017_v9 }
 0xd6b   : > { %v3890_v7 = vrot.slane %v3846_v12, 5  ;;  %v3845_v14 = vsel %vm3813_vm15, %v7605_v0, %v3829_v47  ;;  %v6025_v15 = vpop.f32.mrb[38].mxu1 }
 0xd6c   : > { %v3888_v59 = vrot.slane %v3845_v14, 5  ;;  %v3782_v17 = vadd.f32 %v6025_v15, %v7421_v11  ;;  %v3776_v18 = vpop.f32.mrb[39].mxu1 }
 0xd6d   : > { %v3777_v21 = vadd.f32 %v7421_v11, %v3776_v18 }
 0xd6e   : > { %v7626_v27 = vadd.f32 %v3782_v17, %v7292_v46  ;;  %4051 = vrot.lane.b32.xlu0 %v4020_v42, %s8363_s20  ;;  %4049 = vrot.lane.b32.xlu1 %v4018_v30, %s8363_s20  ;;  %v7631_v35 = vsel %vm1503_vm3, %v3886_v51, %v3888_v59  ;;  %v7634_v36 = vsel %vm1503_vm3, %v3888_v59, %v3890_v7 }
 0xd6f   : > { %v7637_v38 = vadd.f32 %v3777_v21, %v7274_v24  ;;  %v3940_v11 = vrot.slane %v7631_v35, 3  ;;  %v3942_v40 = vrot.slane %v7634_v36, 3  ;;  %v4021_v32 = vrot.slane %v7631_v35, 6 }
 0xd70   : > { %vm3816_vm0 = vcmp.ge.f32.partialorder %v7626_v27, 0.0  ;;  %v3832_v46 = vmul.f32 0.1, %v7626_v27  ;;  %v4023_v16 = vrot.slane %v7634_v36, 6 }
 0xd71   : > { %vm3815_vm9 = vcmp.ge.f32.partialorder %v7637_v38, 0.0  ;;  %v3831_v22 = vmul.f32 0.1, %v7637_v38  ;;  %v3943_v51 = vsel %vm1522_vm7, %v3940_v11, %v3942_v40  ;;  %v3941_v24 = vsel %vm1522_vm7, %v3938_v2, %v3940_v11 }
 0xd72   : > { %v3848_v53 = vsel %vm3816_vm0, %v7626_v27, %v3832_v46  ;;  %3974 = vrot.lane.b32.xlu0 %v3943_v51, %s8355_s11  ;;  %3972 = vrot.lane.b32.xlu1 %v3941_v24, %s8355_s11  ;;  %v4024_v52 = vsel %vm1540_vm6, %v4021_v32, %v4023_v16  ;;  %v4022_v54 = vsel %vm1540_vm6, %v4019_v44, %v4021_v32 }
 0xd73   : > { %v3894_v50 = vrot.slane %v3848_v53, 5  ;;  %v3847_v55 = vsel %vm3815_vm9, %v7637_v38, %v3831_v22 }
 0xd74   : > { %v3892_v19 = vrot.slane %v3847_v55, 5 }
 0xd75   : > { %v3914_v62 = vsel %vm1503_vm3, %v3894_v50, 0.0 }
 0xd76   : > { %4055 = vrot.lane.b32.xlu0 %v4024_v52, %s8363_s20  ;;  %4053 = vrot.lane.b32.xlu1 %v4022_v54, %s8363_s20  ;;  %v7658_v57 = vsel %vm1503_vm3, %v3890_v7, %v3892_v19  ;;  %v7661_v58 = vsel %vm1503_vm3, %v3892_v19, %v3894_v50  ;;  %v3948_v7 = vrot.slane %v3914_v62, 3  ;;  %v4029_v15 = vrot.slane %v3914_v62, 6 }
 0xd77   : > { %v3944_v37 = vrot.slane %v7658_v57, 3  ;;  %v3946_v2 = vrot.slane %v7661_v58, 3  ;;  %v4025_v44 = vrot.slane %v7658_v57, 6  ;;  %v4027_v47 = vrot.slane %v7661_v58, 6 }
 0xd79   : > { %v3947_v10 = vsel %vm1522_vm7, %v3944_v37, %v3946_v2  ;;  %v3945_v9 = vsel %vm1522_vm7, %v3942_v40, %v3944_v37  ;;  %v4028_v56 = vsel %vm1540_vm6, %v4025_v44, %v4027_v47  ;;  %v4026_v12 = vsel %vm1540_vm6, %v4023_v16, %v4025_v44 }
 0xd7a   : > { %3978 = vrot.lane.b32.xlu0 %v3947_v10, %s8355_s11  ;;  %3976 = vrot.lane.b32.xlu1 %v3945_v9, %s8355_s11  ;;  %v3949_v14 = vsel %vm1522_vm7, %v3946_v2, %v3948_v7  ;;  %v4030_v59 = vsel %vm1540_vm6, %v4027_v47, %v4029_v15 }
 0xd7e   : > { %4059 = vrot.lane.b32.xlu0 %v4028_v56, %s8363_s20  ;;  %4057 = vrot.lane.b32.xlu1 %v4026_v12, %s8363_s20 }
 0xd82   : > { %3980 = vrot.lane.b32.xlu1 %v3949_v14, %s8355_s11 }
 0xd86   : > { %4061 = vrot.lane.b32.xlu1 %v4030_v59, %s8363_s20 }
 0xdb4   : > { %v3951_v17 = vpop.permute.xlu0 %3950 }
 0xdb5   : > { %v4079_v18 = vsel %vm1965_vm13, %v7446_v48, %v3951_v17 }
 0xdb8   : > { %v4032_v21 = vpop.permute.xlu0 %4031 }
 0xdb9   : > { %v4095_v42 = vsel %vm1238_vm1, %v4079_v18, %v4032_v21 }
 0xdba   : > { %6032 = vmatprep.mubr.msk.f32.mxu1 %vm3591_vm12, %v4095_v42 }
 0xdbc   : > { %v3953_v30 = vpop.permute.xlu1 %3952  ;;  %v3955_v11 = vpop.permute.xlu0 %3954 }
 0xdbd   : > { %v4080_v40 = vsel %vm1965_vm13, %v7443_v13, %v3953_v30  ;;  %v4081_v46 = vsel %vm1965_vm13, %v7471_v1, %v3955_v11 }
 0xdc0   : > { %v4034_v32 = vpop.permute.xlu1 %4033  ;;  %v4036_v16 = vpop.permute.xlu0 %4035 }
 0xdc1   : > { %v4096_v22 = vsel %vm1238_vm1, %v4080_v40, %v4034_v32  ;;  %v4097_v51 = vsel %vm1238_vm1, %v4081_v46, %v4036_v16 }
 0xdc2   : > { %6033 = vmatmul.mubr.msk.f32.vlgmr.msra.gmra.mrb[40].mxu1 %vm3591_vm12, %v4096_v22 }
 0xdc3   : > { %6035 = vmatprep.mubr.msk.f32.mxu1 %vm3591_vm12, %v4097_v51 }
 0xdc4   : > { %v3957_v48 = vpop.permute.xlu1 %3956  ;;  %v3959_v24 = vpop.permute.xlu0 %3958 }
 0xdc5   : > { %v4082_v53 = vsel %vm1965_vm13, %v7474_v6, %v3957_v48  ;;  %v4083_v13 = vsel %vm1965_vm13, %v7503_v31, %v3959_v24 }
 0xdc8   : > { %v4038_v50 = vpop.permute.xlu1 %4037  ;;  %v4040_v1 = vpop.permute.xlu0 %4039 }
 0xdc9   : > { %v4098_v55 = vsel %vm1238_vm1, %v4082_v53, %v4038_v50  ;;  %v4099_v19 = vsel %vm1238_vm1, %v4083_v13, %v4040_v1 }
 0xdca   : > { %6036 = vmatmul.mubr.msk.f32.gmra.mrb[42].mxu1 %vm3591_vm12, %v4098_v55 }
 0xdcb   : > { %6038 = vmatprep.mubr.msk.f32.mxu1 %vm3591_vm12, %v4099_v19 }
 0xdcc   : > { %v3961_v52 = vpop.permute.xlu1 %3960  ;;  %v3963_v54 = vpop.permute.xlu0 %3962 }
 0xdcd   : > { %v4084_v37 = vsel %vm1965_vm13, %v7506_v33, %v3961_v52  ;;  %v4085_v6 = vsel %vm1965_vm13, %v7535_v61, %v3963_v54 }
 0xdd0   : > { %v4042_v2 = vpop.permute.xlu1 %4041  ;;  %v4044_v31 = vpop.permute.xlu0 %4043 }
 0xdd1   : > { %v4100_v10 = vsel %vm1238_vm1, %v4084_v37, %v4042_v2  ;;  %v4101_v9 = vsel %vm1238_vm1, %v4085_v6, %v4044_v31 }
 0xdd2   : > { %6039 = vmatmul.mubr.msk.f32.gmra.mrb[44].mxu1 %vm3591_vm12, %v4100_v10 }
 0xdd3   : > { %6041 = vmatprep.mubr.msk.f32.mxu1 %vm3591_vm12, %v4101_v9 }
 0xdd4   : > { %v3965_v44 = vpop.permute.xlu1 %3964  ;;  %v3967_v47 = vpop.permute.xlu0 %3966 }
 0xdd5   : > { %v4086_v62 = vsel %vm1965_vm13, %v7538_v41, %v3965_v44  ;;  %v4087_v33 = vsel %vm1965_vm13, %v7567_v5, %v3967_v47 }
 0xdd8   : > { %v4046_v56 = vpop.permute.xlu1 %4045  ;;  %v4048_v61 = vpop.permute.xlu0 %4047 }
 0xdd9   : > { %v4102_v12 = vsel %vm1238_vm1, %v4086_v62, %v4046_v56  ;;  %v4103_v7 = vsel %vm1238_vm1, %v4087_v33, %v4048_v61 }
 0xdda   : > { %6042 = vmatmul.mubr.msk.f32.gmra.mrb[46].mxu1 %vm3591_vm12, %v4102_v12 }
 0xddb   : > { %6044 = vmatprep.mubr.msk.f32.mxu1 %vm3591_vm12, %v4103_v7 }
 0xddc   : > { %v3969_v14 = vpop.permute.xlu1 %3968  ;;  %v3971_v15 = vpop.permute.xlu0 %3970 }
 0xddd   : > { %v4088_v59 = vsel %vm1965_vm13, %v7570_v29, %v3969_v14  ;;  %v4089_v41 = vsel %vm1965_vm13, %v7599_v20, %v3971_v15 }
 0xde0   : > { %v4050_v17 = vpop.permute.xlu1 %4049  ;;  %v4052_v5 = vpop.permute.xlu0 %4051 }
 0xde1   : > { %v4104_v18 = vsel %vm1238_vm1, %v4088_v59, %v4050_v17  ;;  %v4105_v21 = vsel %vm1238_vm1, %v4089_v41, %v4052_v5 }
 0xde2   : > { %6045 = vmatmul.mubr.msk.f32.gmra.mrb[48].mxu1 %vm3591_vm12, %v4104_v18 }
 0xde3   : > { %6047 = vmatprep.mubr.msk.f32.mxu1 %vm3591_vm12, %v4105_v21 }
 0xde4   : > { %v3973_v42 = vpop.permute.xlu1 %3972  ;;  %v3975_v30 = vpop.permute.xlu0 %3974 }
 0xde5   : > { %v4090_v11 = vsel %vm1965_vm13, %v7602_v49, %v3973_v42  ;;  %v4091_v29 = vsel %vm1965_vm13, %v7631_v35, %v3975_v30 }
 0xde8   : > { %v4054_v40 = vpop.permute.xlu1 %4053  ;;  %v4056_v20 = vpop.permute.xlu0 %4055 }
 0xde9   : > { %v4106_v46 = vsel %vm1238_vm1, %v4090_v11, %v4054_v40  ;;  %v4107_v32 = vsel %vm1238_vm1, %v4091_v29, %v4056_v20  ;;  %v1223_v11 = vld [vmem:[%s6634_s12] sm:$0xff]  ;;  %v1224_v29 = vld [vmem:[%s6634_s12 + $0x8] sm:$0xff] }
 0xdea   : > { %6048 = vmatmul.mubr.msk.f32.gmra.mrb[50].mxu1 %vm3591_vm12, %v4106_v46 }
 0xdeb   : > { %6050 = vmatprep.mubr.msk.f32.mxu1 %vm3591_vm12, %v4107_v32 }
 0xdec   : > { %v3977_v16 = vpop.permute.xlu1 %3976  ;;  %v3979_v22 = vpop.permute.xlu0 %3978 }
 0xded   : > { %v4092_v51 = vsel %vm1965_vm13, %v7634_v36, %v3977_v16  ;;  %v4093_v49 = vsel %vm1965_vm13, %v7658_v57, %v3979_v22  ;;  %v7745_v57 = vld [vmem:[%s6629_s21] ss:$0 sm:$0xff] }
 0xdf0   : > { %v4058_v35 = vpop.permute.xlu1 %4057  ;;  %v4060_v48 = vpop.permute.xlu0 %4059 }
 0xdf1   : > { %v4108_v24 = vsel %vm1238_vm1, %v4092_v51, %v4058_v35  ;;  %v4109_v53 = vsel %vm1238_vm1, %v4093_v49, %v4060_v48 }
 0xdf2   : > { %6051 = vmatmul.mubr.msk.f32.gmra.mrb[52].mxu1 %vm3591_vm12, %v4108_v24  ;;  %v6303_v24 = vpack.c.bf16 %v1224_v29, %v1223_v11 }
 0xdf3   : > { %6053 = vmatprep.mubr.msk.f32.mxu1 %vm3591_vm12, %v4109_v53 }
 0xdf4   : > { %v3981_v13 = vpop.permute.xlu1 %3980  ;;  %6304 = vmatprep.subr.bf16.mxu0 %v6303_v24 }
 0xdf5   : > { %v4094_v50 = vsel %vm1965_vm13, %v7661_v58, %v3981_v13  ;;  %6306 = vmatpush3.bf16.msra.mxu0 %v6303_v24 }
 0xdf8   : > { %v4062_v1 = vpop.permute.xlu1 %4061 }
 0xdf9   : > { %v4110_v36 = vsel %vm1238_vm1, %v4094_v50, %v4062_v1 }
 0xdfa   : > { %6054 = vmatmul.mubr.msk.f32.gmra.mrb[54].mxu1 %vm3591_vm12, %v4110_v36 }
 0xe95   : > { %v6034_v55 = vpop.f32.mrb[40].mxu1 }
 0xe96   : > { %v4237_v19 = vadd.f32 %v6034_v55, %v7745_v57  ;;  %v4231_v52 = vpop.f32.mrb[41].mxu1 }
 0xe97   : > { %v4232_v54 = vadd.f32 %v7745_v57, %v4231_v52 }
 0xe98   : > { %v4311_v37 = vadd.f32 %v4237_v19, %v7426_v63 }
 0xe99   : > { %v4310_v6 = vadd.f32 %v4232_v54, %v7429_v28 }
 0xe9a   : > { %vm4327_vm11 = vcmp.ge.f32.partialorder %v4311_v37, 0.0  ;;  %v4343_v2 = vmul.f32 0.01, %v4311_v37 }
 0xe9b   : > { %vm4326_vm14 = vcmp.ge.f32.partialorder %v4310_v6, 0.0  ;;  %v4342_v58 = vmul.f32 0.01, %v4310_v6 }
 0xe9c   : > { %v4359_v31 = vsel %vm4327_vm11, %v4311_v37, %v4343_v2 }
 0xe9d   : > { %v4391_v10 = vrot.slane %v4359_v31, 5  ;;  %v4358_v9 = vsel %vm4326_vm14, %v4310_v6, %v4342_v58  ;;  %v6037_v44 = vpop.f32.mrb[42].mxu1 }
 0xe9e   : > { %v4390_v47 = vrot.slane %v4358_v9, 5  ;;  %v4247_v62 = vadd.f32 %v6037_v44, %v7745_v57  ;;  %v4241_v33 = vpop.f32.mrb[43].mxu1 }
 0xe9f   : > { %v4242_v56 = vadd.f32 %v7745_v57, %v4241_v33 }
 0xea0   : > { %v7754_v61 = vsel %vm1503_vm3, %v4390_v47, %v4391_v10  ;;  %v7757_v63 = vsel %vm1503_vm3, 0.0, %v4390_v47  ;;  %v4313_v28 = vadd.f32 %v4247_v62, %v7440_v23 }
 0xea1   : > { %v4312_v12 = vadd.f32 %v4242_v56, %v7449_v34  ;;  %v4766_v7 = vrot.slane %v7757_v63, 5  ;;  %v4767_v14 = vrot.slane %v7754_v61, 5  ;;  %v4442_v15 = vrot.slane %v7757_v63, 1 }
 0xea2   : > { %vm4329_vm15 = vcmp.ge.f32.partialorder %v4313_v28, 0.0  ;;  %v4345_v59 = vmul.f32 0.01, %v4313_v28  ;;  %v4443_v41 = vrot.slane %v7754_v61, 1  ;;  %v4847_v17 = vrot.slane %v7757_v63, 6 }
 0xea3   : > { %vm4328_vm0 = vcmp.ge.f32.partialorder %v4312_v12, 0.0  ;;  %v4344_v5 = vmul.f32 0.01, %v4312_v12  ;;  %v4768_v23 = vsel %vm1503_vm3, %v4766_v7, %v4767_v14  ;;  %v4848_v34 = vrot.slane %v7754_v61, 6 }
 0xea4   : > { %v4361_v18 = vsel %vm4329_vm15, %v4313_v28, %v4345_v59  ;;  %4799 = vrot.lane.b32.xlu1 %v4768_v23, %s8359_s26  ;;  %v4444_v21 = vsel %vm1508_vm4, %v4442_v15, %v4443_v41  ;;  %v4523_v42 = vrot.slane %v7757_v63, 2  ;;  %v4524_v30 = vrot.slane %v7754_v61, 2 }
 0xea5   : > { %v4395_v40 = vrot.slane %v4361_v18, 5  ;;  %v4360_v20 = vsel %vm4328_vm0, %v4312_v12, %v4344_v5  ;;  %4475 = vrot.lane.b32.xlu0 %v4444_v21, %s8355_s11  ;;  %v6040_v46 = vpop.f32.mrb[44].mxu1  ;;  %v4849_v51 = vsel %vm1540_vm6, %v4847_v17, %v4848_v34  ;;  %v4604_v48 = vrot.slane %v7757_v63, 3 }
 0xea6   : > { %v4393_v32 = vrot.slane %v4360_v20, 5  ;;  %v4257_v16 = vadd.f32 %v6040_v46, %v7745_v57  ;;  %v4251_v22 = vpop.f32.mrb[45].mxu1  ;;  %v4525_v35 = vsel %vm1515_vm5, %v4523_v42, %v4524_v30  ;;  %v4605_v1 = vrot.slane %v7754_v61, 3 }
 0xea7   : > { %v4252_v49 = vadd.f32 %v7745_v57, %v4251_v22  ;;  %v4685_v52 = vrot.slane %v7757_v63, 4  ;;  %v4686_v54 = vrot.slane %v7754_v61, 4 }
 0xea8   : > { %v7785_v53 = vsel %vm1503_vm3, %v4391_v10, %v4393_v32  ;;  %v7788_v13 = vsel %vm1503_vm3, %v4393_v32, %v4395_v40  ;;  %v4315_v50 = vadd.f32 %v4257_v16, %v7467_v39  ;;  %4880 = vrot.lane.b32.xlu1 %v4849_v51, %s8353_s1  ;;  %s8357_s1 = smov 24  }
 0xea9   : > { %v4314_v36 = vadd.f32 %v4252_v49, %v7477_v4  ;;  %4556 = vrot.lane.b32.xlu0 %v4525_v35, %s8363_s20  ;;  %v4445_v55 = vrot.slane %v7785_v53, 1  ;;  %v4526_v6 = vrot.slane %v7785_v53, 2  ;;  %v4606_v4 = vsel %vm1522_vm7, %v4604_v48, %v4605_v1 }
 0xeaa   : > { %vm4331_vm9 = vcmp.ge.f32.partialorder %v4315_v50, 0.0  ;;  %v4347_v19 = vmul.f32 0.01, %v4315_v50  ;;  %v4687_v33 = vsel %vm1529_vm8, %v4685_v52, %v4686_v54  ;;  %v4607_v28 = vrot.slane %v7785_v53, 3 }
 0xeab   : > { %vm4330_vm11 = vcmp.ge.f32.partialorder %v4314_v36, 0.0  ;;  %v4346_v39 = vmul.f32 0.01, %v4314_v36  ;;  %v4446_v37 = vsel %vm1508_vm4, %v4443_v41, %v4445_v55  ;;  %v4527_v56 = vsel %vm1515_vm5, %v4524_v30, %v4526_v6 }
 0xeac   : > { %v4363_v2 = vsel %vm4331_vm9, %v4315_v50, %v4347_v19  ;;  %4477 = vrot.lane.b32.xlu1 %v4446_v37, %s8355_s11  ;;  %v4688_v59 = vrot.slane %v7785_v53, 4  ;;  %v4608_v23 = vsel %vm1522_vm7, %v4605_v1, %v4607_v28  ;;  %v4447_v18 = vrot.slane %v7788_v13, 1 }
 0xead   : > { %v4399_v58 = vrot.slane %v4363_v2, 5  ;;  %v4362_v31 = vsel %vm4330_vm11, %v4314_v36, %v4346_v39  ;;  %4637 = vrot.lane.b32.xlu0 %v4606_v4, %s8357_s1  ;;  %v6043_v10 = vpop.f32.mrb[46].mxu1  ;;  %v4850_v16 = vrot.slane %v7785_v53, 6  ;;  %v4528_v22 = vrot.slane %v7788_v13, 2 }
 0xeae   : > { %v4397_v9 = vrot.slane %v4362_v31, 5  ;;  %v4267_v44 = vadd.f32 %v6043_v10, %v7745_v57  ;;  %v4261_v47 = vpop.f32.mrb[47].mxu1  ;;  %v4689_v42 = vsel %vm1529_vm8, %v4686_v54, %v4688_v59  ;;  %v4448_v32 = vsel %vm1508_vm4, %v4445_v55, %v4447_v18 }
 0xeaf   : > { %v4262_v62 = vadd.f32 %v7745_v57, %v4261_v47  ;;  %v4690_v1 = vrot.slane %v7788_v13, 4  ;;  %v4529_v55 = vsel %vm1515_vm5, %v4526_v6, %v4528_v22 }
 0xeb0   : > { %v7809_v12 = vsel %vm1503_vm3, %v4395_v40, %v4397_v9  ;;  %v7812_v7 = vsel %vm1503_vm3, %v4397_v9, %v4399_v58  ;;  %v4317_v15 = vadd.f32 %v4267_v44, %v7498_v45  ;;  %4558 = vrot.lane.b32.xlu1 %v4527_v56, %s8363_s20  ;;  %v4769_v45 = vrot.slane %v7785_v53, 5 }
 0xeb1   : > { %v4316_v41 = vadd.f32 %v4262_v62, %v7509_v8  ;;  %4718 = vrot.lane.b32.xlu0 %v4687_v33, %s8361_s16  ;;  %v4691_v4 = vsel %vm1529_vm8, %v4688_v59, %v4690_v1  ;;  %v4449_v44 = vrot.slane %v7809_v12, 1  ;;  %v4530_v59 = vrot.slane %v7809_v12, 2 }
 0xeb2   : > { %vm4333_vm14 = vcmp.ge.f32.partialorder %v4317_v15, 0.0  ;;  %v4349_v17 = vmul.f32 0.01, %v4317_v15  ;;  %v4770_v48 = vsel %vm1503_vm3, %v4767_v14, %v4769_v45  ;;  %v4851_v14 = vsel %vm1540_vm6, %v4848_v34, %v4850_v16 }
 0xeb3   : > { %vm4332_vm15 = vcmp.ge.f32.partialorder %v4316_v41, 0.0  ;;  %v4348_v5 = vmul.f32 0.01, %v4316_v41  ;;  %v4771_v34 = vrot.slane %v7788_v13, 5 }
 0xeb4   : > { %v4365_v21 = vsel %vm4333_vm14, %v4317_v15, %v4349_v17  ;;  %4639 = vrot.lane.b32.xlu1 %v4608_v23, %s8357_s1 }
 0xeb5   : > { %v4403_v30 = vrot.slane %v4365_v21, 5  ;;  %v4364_v11 = vsel %vm4332_vm15, %v4316_v41, %v4348_v5  ;;  %4720 = vrot.lane.b32.xlu0 %v4689_v42, %s8361_s16  ;;  %v6046_v8 = vpop.f32.mrb[48].mxu1  ;;  %v4772_v56 = vsel %vm1503_vm3, %v4769_v45, %v4771_v34 }
 0xeb6   : > { %v4401_v29 = vrot.slane %v4364_v11, 5  ;;  %v4277_v40 = vadd.f32 %v6046_v8, %v7745_v57  ;;  %v4271_v20 = vpop.f32.mrb[49].mxu1  ;;  %v4692_v11 = vrot.slane %v7809_v12, 4 }
 0xeb7   : > { %v4272_v46 = vadd.f32 %v7745_v57, %v4271_v20 }
 0xeb8   : > { %v7831_v51 = vsel %vm1503_vm3, %v4399_v58, %v4401_v29  ;;  %v7834_v49 = vsel %vm1503_vm3, %v4401_v29, %v4403_v30  ;;  %v4319_v35 = vadd.f32 %v4277_v40, %v7530_v60  ;;  %4479 = vrot.lane.b32.xlu1 %v4448_v32, %s8355_s11  ;;  %v4609_v60 = vrot.slane %v7788_v13, 3  ;;  %s8398_s11 = smov 48  }
 0xeb9   : > { %v4318_v24 = vadd.f32 %v4272_v46, %v7541_v43  ;;  %4801 = vrot.lane.b32.xlu0 %v4770_v48, %s8359_s26  ;;  %v4531_v40 = vsel %vm1515_vm5, %v4528_v22, %v4530_v59  ;;  %v4451_v32 = vrot.slane %v7812_v7, 1  ;;  %v4773_v48 = vrot.slane %v7809_v12, 5 }
 0xeba   : > { %vm4335_vm0 = vcmp.ge.f32.partialorder %v4319_v35, 0.0  ;;  %v4351_v50 = vmul.f32 0.01, %v4319_v35  ;;  %v4610_v58 = vsel %vm1522_vm7, %v4607_v28, %v4609_v60  ;;  %v4852_v28 = vrot.slane %v7788_v13, 6 }
 0xebb   : > { %vm4334_vm9 = vcmp.ge.f32.partialorder %v4318_v24, 0.0  ;;  %v4350_v36 = vmul.f32 0.01, %v4318_v24 }
 0xebc   : > { %v4367_v19 = vsel %vm4335_vm0, %v4319_v35, %v4351_v50  ;;  %4560 = vrot.lane.b32.xlu1 %v4529_v55, %s8363_s20  ;;  %v4853_v45 = vsel %vm1540_vm6, %v4850_v16, %v4852_v28 }
 0xebd   : > { %v4407_v43 = vrot.slane %v4367_v19, 5  ;;  %v4366_v52 = vsel %vm4334_vm9, %v4318_v24, %v4350_v36  ;;  %4882 = vrot.lane.b32.xlu0 %v4851_v14, %s8398_s11  ;;  %v6049_v54 = vpop.f32.mrb[50].mxu1  ;;  %v4452_v14 = vsel %vm1508_vm4, %v4449_v44, %v4451_v32 }
 0xebe   : > { %v4405_v39 = vrot.slane %v4366_v52, 5  ;;  %v4287_v37 = vadd.f32 %v6049_v54, %v7745_v57  ;;  %v4281_v2 = vpop.f32.mrb[51].mxu1  ;;  %v4532_v52 = vrot.slane %v7812_v7, 2 }
 0xebf   : > { %v4282_v6 = vadd.f32 %v7745_v57, %v4281_v2 }
 0xec0   : > { %v7859_v31 = vsel %vm1503_vm3, %v4403_v30, %v4405_v39  ;;  %v7862_v10 = vsel %vm1503_vm3, %v4405_v39, %v4407_v43  ;;  %v4321_v9 = vadd.f32 %v4287_v37, %v7562_v25  ;;  %4641 = vrot.lane.b32.xlu1 %v4610_v58, %s8357_s1  ;;  %v4450_v25 = vsel %vm1508_vm4, %v4447_v18, %v4449_v44  ;;  %s8399_s1 = smov 8  }
 0xec1   : > { %v4320_v47 = vadd.f32 %v4282_v6, %v7573_v26  ;;  %4722 = vrot.lane.b32.xlu0 %v4691_v4, %s8361_s16  ;;  %v4611_v30 = vrot.slane %v7809_v12, 3  ;;  %v4854_v37 = vrot.slane %v7809_v12, 6  ;;  %v4533_v4 = vsel %vm1515_vm5, %v4530_v59, %v4532_v52 }
 0xec2   : > { %vm4337_vm11 = vcmp.ge.f32.partialorder %v4321_v9, 0.0  ;;  %v4353_v62 = vmul.f32 0.01, %v4321_v9  ;;  %v4613_v58 = vrot.slane %v7812_v7, 3 }
 0xec3   : > { %vm4336_vm14 = vcmp.ge.f32.partialorder %v4320_v47, 0.0  ;;  %v4352_v33 = vmul.f32 0.01, %v4320_v47  ;;  %v4612_v35 = vsel %vm1522_vm7, %v4609_v60, %v4611_v30 }
 0xec4   : > { %v4369_v15 = vsel %vm4337_vm11, %v4321_v9, %v4353_v62  ;;  %4803 = vrot.lane.b32.xlu1 %v4772_v56, %s8359_s26  ;;  %s8400_s26 = smov 24   ;;  %v4614_v62 = vsel %vm1522_vm7, %v4611_v30, %v4613_v58  ;;  %v1225_v56 = vld [vmem:[%s6634_s12 + $0x10] sm:$0xff] }
 0xec5   : > { %v4411_v41 = vrot.slane %v4369_v15, 5  ;;  %v4368_v17 = vsel %vm4336_vm14, %v4320_v47, %v4352_v33  ;;  %4481 = vrot.lane.b32.xlu0 %v4450_v25, %s8399_s1  ;;  %v6052_v26 = vpop.f32.mrb[52].mxu1  ;;  %v4775_v33 = vrot.slane %v7812_v7, 5  ;;  %v1226_v15 = vld [vmem:[%s6634_s12 + $0x18] sm:$0xff]  ;;  %vm4992_vm14 = vcmask 326656  }
 0xec6   : > { %v4409_v5 = vrot.slane %v4368_v17, 5  ;;  %v4297_v23 = vadd.f32 %v6052_v26, %v7745_v57  ;;  %v4291_v21 = vpop.f32.mrb[53].mxu1  ;;  %v6307_v17 = vpack.c.bf16 %v1226_v15, %v1225_v56  ;;  %v1227_v26 = vld [vmem:[%s6634_s12 + $0x20] sm:$0xff]  ;;  %v4540_v56 = vrot.slane %v7862_v10, 2 }
 0xec7   : > { %v4292_v42 = vadd.f32 %v7745_v57, %v4291_v21  ;;  %v4856_v21 = vrot.slane %v7812_v7, 6 }
 0xec8   : > { %v7881_v18 = vsel %vm1503_vm3, %v4407_v43, %v4409_v5  ;;  %v7884_v8 = vsel %vm1503_vm3, %v4409_v5, %v4411_v41  ;;  %v4323_v29 = vadd.f32 %v4297_v23, %v7594_v3  ;;  %4884 = vrot.lane.b32.xlu1 %v4853_v45, %s8398_s11  ;;  %v4693_v3 = vsel %vm1529_vm8, %v4690_v1, %v4692_v11  ;;  %v1228_v5 = vld [vmem:[%s6634_s12 + $0x28] sm:$0xff] }
 0xec9   : > { %v4322_v20 = vadd.f32 %v4292_v42, %v7605_v0  ;;  %4562 = vrot.lane.b32.xlu0 %v4531_v40, %s8363_s20  ;;  %v4774_v43 = vsel %vm1503_vm3, %v4771_v34, %v4773_v48  ;;  %v4776_v23 = vsel %vm1503_vm3, %v4773_v48, %v4775_v33  ;;  %v4534_v45 = vrot.slane %v7831_v51, 2  ;;  %6308 = vmatprep.subr.bf16.mxu0 %v6307_v17  ;;  %v1229_v40 = vld [vmem:[%s6634_s12 + $0x30] sm:$0xff] }
 0xeca   : > { %vm4339_vm15 = vcmp.ge.f32.partialorder %v4323_v29, 0.0  ;;  %v4355_v46 = vmul.f32 0.01, %v4323_v29  ;;  %6310 = vmatpush3.bf16.msra.mxu0 %v6307_v17  ;;  %v6311_v30 = vpack.c.bf16 %v1228_v5, %v1227_v26  ;;  %v4777_v48 = vrot.slane %v7831_v51, 5 }
 0xecb   : > { %vm4338_vm0 = vcmp.ge.f32.partialorder %v4322_v20, 0.0  ;;  %v4354_v16 = vmul.f32 0.01, %v4322_v20  ;;  %v4621_v17 = vrot.slane %v7862_v10, 3  ;;  %v4702_v5 = vrot.slane %v7862_v10, 4 }
 0xecc   : > { %v4371_v24 = vsel %vm4339_vm15, %v4323_v29, %v4355_v46  ;;  %4643 = vrot.lane.b32.xlu1 %v4612_v35, %s8400_s26  ;;  %v4615_v29 = vrot.slane %v7831_v51, 3  ;;  %6312 = vmatprep.subr.bf16.mxu0 %v6311_v30  ;;  %v4696_v46 = vrot.slane %v7831_v51, 4  ;;  %vm5031_vm15 = vcmask 457728  }
 0xecd   : > { %v4415_v0 = vrot.slane %v4371_v24, 5  ;;  %v4370_v22 = vsel %vm4338_vm0, %v4322_v20, %v4354_v16  ;;  %4724 = vrot.lane.b32.xlu0 %v4693_v3, %s8361_s16  ;;  %v6055_v50 = vpop.f32.mrb[54].mxu1  ;;  %s8401_s16 = smov 40   ;;  %v4535_v20 = vsel %vm1515_vm5, %v4532_v52, %v4534_v45  ;;  %v4455_v16 = vrot.slane %v7834_v49, 1 }
 0xece   : > { %v4413_v36 = vrot.slane %v4370_v22, 5  ;;  %v4307_v55 = vadd.f32 %v6055_v50, %v7745_v57  ;;  %v4301_v19 = vpop.f32.mrb[55].mxu1  ;;  %6314 = vmatpush3.bf16.msra.mxu0 %v6311_v30  ;;  %v4536_v3 = vrot.slane %v7834_v49, 2  ;;  %v4858_v22 = vrot.slane %v7831_v51, 6 }
 0xecf   : > { %v4302_v60 = vadd.f32 %v7745_v57, %v4301_v19  ;;  %6068 = vmatprep.subr.mxu0 %v1229_v40  ;;  %v4698_v19 = vrot.slane %v7834_v49, 4  ;;  %v4457_v52 = vrot.slane %v7859_v31, 1 }
 0xed0   : > { %v7905_v54 = vsel %vm1503_vm3, %v4411_v41, %v4413_v36  ;;  %v7908_v1 = vsel %vm1503_vm3, %v4413_v36, %v4415_v0  ;;  %v4325_v39 = vadd.f32 %v4307_v55, %v7626_v27  ;;  %4483 = vrot.lane.b32.xlu1 %v4452_v14, %s8399_s1  ;;  %v4855_v27 = vsel %vm1540_vm6, %v4852_v28, %v4854_v37 }
 0xed1   : > { %v4324_v57 = vadd.f32 %v4302_v60, %v7637_v38  ;;  %4805 = vrot.lane.b32.xlu0 %v4774_v43, %s8401_s16  ;;  %v4694_v38 = vrot.slane %v7812_v7, 4  ;;  %v4453_v41 = vrot.slane %v7831_v51, 1  ;;  %v4537_v50 = vsel %vm1515_vm5, %v4534_v45, %v4536_v3 }
 0xed2   : > { %vm4341_vm9 = vcmp.ge.f32.partialorder %v4325_v39, 0.0  ;;  %v4357_v2 = vmul.f32 0.01, %v4325_v39  ;;  %6069 = vmatpush3.msra.mxu0 %v1229_v40  ;;  %v4617_v36 = vrot.slane %v7834_v49, 3  ;;  %v4859_v55 = vsel %vm1540_vm6, %v4856_v21, %v4858_v22 }
 0xed3   : > { %vm4340_vm11 = vcmp.ge.f32.partialorder %v4324_v57, 0.0  ;;  %v4356_v6 = vmul.f32 0.01, %v4324_v57  ;;  %v4695_v59 = vsel %vm1529_vm8, %v4692_v11, %v4694_v38  ;;  %v4454_v42 = vsel %vm1508_vm4, %v4451_v32, %v4453_v41 }
 0xed4   : > { %v7917_v34 = vsel %vm4341_vm9, %v4325_v39, %v4357_v2  ;;  %4564 = vrot.lane.b32.xlu1 %v4533_v4, %s8363_s20  ;;  %s8402_s20 = smov 32   ;;  %v4857_v11 = vsel %vm1540_vm6, %v4854_v37, %v4856_v21  ;;  %v4616_v32 = vsel %vm1522_vm7, %v4613_v58, %v4615_v29  ;;  %v4697_v35 = vsel %vm1529_vm8, %v4694_v38, %v4696_v46 }
 0xed5   : > { %v4419_v9 = vrot.slane %v7917_v34, 5  ;;  %v4372_v44 = vsel %vm4340_vm11, %v4324_v57, %v4356_v6  ;;  %4886 = vrot.lane.b32.xlu0 %v4855_v27, %s8398_s11  ;;  %v4456_v24 = vsel %vm1508_vm4, %v4453_v41, %v4455_v16  ;;  %v4618_v60 = vsel %vm1522_vm7, %v4615_v29, %v4617_v36 }
 0xed6   : > { %v4417_v47 = vrot.slane %v4372_v44, 5  ;;  %v4779_v14 = vrot.slane %v7834_v49, 5  ;;  %v4699_v43 = vsel %vm1529_vm8, %v4696_v46, %v4698_v19  ;;  %v4860_v37 = vrot.slane %v7834_v49, 6 }
 0xed7   : > { %v4458_v57 = vsel %vm1508_vm4, %v4455_v16, %v4457_v52  ;;  %v4538_v2 = vrot.slane %v7859_v31, 2  ;;  %v4619_v4 = vrot.slane %v7859_v31, 3  ;;  %v4700_v27 = vrot.slane %v7859_v31, 4 }
 0xed8   : > { %v7929_v25 = vsel %vm1503_vm3, %v4415_v0, %v4417_v47  ;;  %v7934_v28 = vsel %vm1503_vm3, %v4417_v47, %v4419_v9  ;;  %4645 = vrot.lane.b32.xlu1 %v4614_v62, %s8400_s26  ;;  %v4778_v0 = vsel %vm1503_vm3, %v4775_v33, %v4777_v48  ;;  %v4780_v39 = vsel %vm1503_vm3, %v4777_v48, %v4779_v14 }
 0xed9   : > { %4726 = vrot.lane.b32.xlu0 %v4695_v59, %s8402_s20  ;;  %v4861_v6 = vsel %vm1540_vm6, %v4858_v22, %v4860_v37  ;;  %v4539_v58 = vsel %vm1515_vm5, %v4536_v3, %v4538_v2  ;;  %v4620_v38 = vsel %vm1522_vm7, %v4617_v36, %v4619_v4  ;;  %v4459_v44 = vrot.slane %v7862_v10, 1 }
 0xeda   : > { %v4701_v47 = vsel %vm1529_vm8, %v4698_v19, %v4700_v27  ;;  %v4781_v62 = vrot.slane %v7859_v31, 5  ;;  %v4862_v59 = vrot.slane %v7859_v31, 6  ;;  %v4541_v41 = vsel %vm1515_vm5, %v4538_v2, %v4540_v56 }
 0xedb   : > { %v4460_v33 = vsel %vm1508_vm4, %v4457_v52, %v4459_v44  ;;  %v4783_v21 = vrot.slane %v7862_v10, 5  ;;  %v4461_v45 = vrot.slane %v7881_v18, 1  ;;  %v4542_v40 = vrot.slane %v7881_v18, 2 }
 0xedc   : > { %4807 = vrot.lane.b32.xlu1 %v4776_v23, %s8401_s16  ;;  %v4782_v15 = vsel %vm1503_vm3, %v4779_v14, %v4781_v62  ;;  %v4863_v26 = vsel %vm1540_vm6, %v4860_v37, %v4862_v59  ;;  %v4622_v23 = vsel %vm1522_vm7, %v4619_v4, %v4621_v17  ;;  %v4623_v46 = vrot.slane %v7881_v18, 3 }
 0xedd   : > { %4485 = vrot.lane.b32.xlu0 %v4454_v42, %s8399_s1  ;;  %v4703_v42 = vsel %vm1529_vm8, %v4700_v27, %v4702_v5  ;;  %v4784_v30 = vsel %vm1503_vm3, %v4781_v62, %v4783_v21  ;;  %v4462_v29 = vsel %vm1508_vm4, %v4459_v44, %v4461_v45  ;;  %v4704_v16 = vrot.slane %v7881_v18, 4 }
 0xede   : > { %v4463_v48 = vrot.slane %v7884_v8, 1  ;;  %v4785_v3 = vrot.slane %v7881_v18, 5  ;;  %v4544_v36 = vrot.slane %v7884_v8, 2  ;;  %v4866_v19 = vrot.slane %v7881_v18, 6 }
 0xedf   : > { %v4625_v52 = vrot.slane %v7884_v8, 3  ;;  %v4706_v37 = vrot.slane %v7884_v8, 4  ;;  %v4787_v4 = vrot.slane %v7884_v8, 5  ;;  %v4465_v27 = vrot.slane %v7905_v54, 1 }
 0xee0   : > { %4888 = vrot.lane.b32.xlu1 %v4857_v11, %s8398_s11  ;;  %v4864_v11 = vrot.slane %v7862_v10, 6 }
 0xee1   : > { %4566 = vrot.lane.b32.xlu0 %v4535_v20, %s8403_s0 }
 0xee2   : > { %v4865_v20 = vsel %vm1540_vm6, %v4862_v59, %v4864_v11 }
 0xee4   : > { %4647 = vrot.lane.b32.xlu1 %v4616_v32, %s8400_s26  ;;  %v4543_v32 = vsel %vm1515_vm5, %v4540_v56, %v4542_v40  ;;  %v4788_v56 = vsel %vm1503_vm3, %v4785_v3, %v4787_v4 }
 0xee5   : > { %4728 = vrot.lane.b32.xlu0 %v4697_v35, %s8402_s20  ;;  %v4624_v35 = vsel %vm1522_vm7, %v4621_v17, %v4623_v46 }
 0xee8   : > { %4487 = vrot.lane.b32.xlu1 %v4456_v24, %s8399_s1  ;;  %v4705_v24 = vsel %vm1529_vm8, %v4702_v5, %v4704_v16 }
 0xee9   : > { %4809 = vrot.lane.b32.xlu0 %v4778_v0, %s8401_s16 }
 0xeec   : > { %4568 = vrot.lane.b32.xlu1 %v4537_v50, %s8403_s0  ;;  %v4464_v50 = vsel %vm1508_vm4, %v4461_v45, %v4463_v48 }
 0xeed   : > { %4890 = vrot.lane.b32.xlu0 %v4859_v55, %s8398_s11  ;;  %v4786_v55 = vsel %vm1503_vm3, %v4783_v21, %v4785_v3 }
 0xef0   : > { %4649 = vrot.lane.b32.xlu1 %v4618_v60, %s8400_s26 }
 0xef1   : > { %4730 = vrot.lane.b32.xlu0 %v4699_v43, %s8402_s20  ;;  %v4545_v43 = vsel %vm1515_vm5, %v4542_v40, %v4544_v36 }
 0xef4   : > { %4811 = vrot.lane.b32.xlu1 %v4780_v39, %s8401_s16  ;;  %v4867_v39 = vsel %vm1540_vm6, %v4864_v11, %v4866_v19 }
 0xef5   : > { %4489 = vrot.lane.b32.xlu0 %v4458_v57, %s8399_s1 }
 0xef8   : > { %4892 = vrot.lane.b32.xlu1 %v4861_v6, %s8398_s11  ;;  %v4626_v6 = vsel %vm1522_vm7, %v4623_v46, %v4625_v52 }
 0xef9   : > { %4570 = vrot.lane.b32.xlu0 %v4539_v58, %s8403_s0  ;;  %v4707_v58 = vsel %vm1529_vm8, %v4704_v16, %v4706_v37  ;;  %v4467_v16 = vrot.slane %v7908_v1, 1 }
 0xefc   : > { %4651 = vrot.lane.b32.xlu1 %v4620_v38, %s8400_s26 }
 0xefd   : > { %4732 = vrot.lane.b32.xlu0 %v4701_v47, %s8402_s20 }
 0xf00   : > { %4491 = vrot.lane.b32.xlu1 %v4460_v33, %s8399_s1 }
 0xf01   : > { %4813 = vrot.lane.b32.xlu0 %v4782_v15, %s8401_s16  ;;  %v4868_v15 = vrot.slane %v7884_v8, 6 }
 0xf03   : > { %v4869_v21 = vsel %vm1540_vm6, %v4866_v19, %v4868_v15  ;;  %v4870_v19 = vrot.slane %v7905_v54, 6 }
 0xf04   : > { %4572 = vrot.lane.b32.xlu1 %v4541_v41, %s8403_s0  ;;  %v4466_v41 = vsel %vm1508_vm4, %v4463_v48, %v4465_v27  ;;  %v4789_v48 = vrot.slane %v7905_v54, 5 }
 0xf05   : > { %4894 = vrot.lane.b32.xlu0 %v4863_v26, %s8398_s11 }
 0xf08   : > { %4653 = vrot.lane.b32.xlu1 %v4622_v23, %s8400_s26 }
 0xf09   : > { %4734 = vrot.lane.b32.xlu0 %v4703_v42, %s8402_s20  ;;  %v4627_v42 = vrot.slane %v7905_v54, 3 }
 0xf0c   : > { %4815 = vrot.lane.b32.xlu1 %v4784_v30, %s8401_s16  ;;  %v4708_v30 = vrot.slane %v7905_v54, 4 }
 0xf0d   : > { %4493 = vrot.lane.b32.xlu0 %v4462_v29, %s8399_s1 }
 0xf10   : > { %4896 = vrot.lane.b32.xlu1 %v4865_v20, %s8398_s11 }
 0xf11   : > { %4574 = vrot.lane.b32.xlu0 %v4543_v32, %s8403_s0  ;;  %v4628_v32 = vsel %vm1522_vm7, %v4625_v52, %v4627_v42  ;;  %v4629_v52 = vrot.slane %v7908_v1, 3 }
 0xf14   : > { %4655 = vrot.lane.b32.xlu1 %v4624_v35, %s8400_s26  ;;  %v4709_v35 = vsel %vm1529_vm8, %v4706_v37, %v4708_v30  ;;  %v4871_v37 = vsel %vm1540_vm6, %v4868_v15, %v4870_v19 }
 0xf15   : > { %4736 = vrot.lane.b32.xlu0 %v4705_v24, %s8402_s20 }
 0xf16   : > { %v4800_v0 = vpop.permute.xlu1 %4799 }
 0xf17   : > { %v4476_v22 = vpop.permute.xlu0 %4475 }
 0xf18   : > { %4495 = vrot.lane.b32.xlu1 %v4464_v50, %s8399_s1  ;;  %v4928_v38 = vsel %vm1965_vm13, %v7757_v63, %v4476_v22  ;;  %v4546_v63 = vrot.slane %v7905_v54, 2  ;;  %v4468_v22 = vsel %vm1508_vm4, %v4465_v27, %v4467_v16  ;;  %v4548_v50 = vrot.slane %v7908_v1, 2 }
 0xf19   : > { %4817 = vrot.lane.b32.xlu0 %v4786_v55, %s8401_s16  ;;  %v4790_v55 = vsel %vm1503_vm3, %v4787_v4, %v4789_v48  ;;  %v4630_v27 = vsel %vm1522_vm7, %v4627_v42, %v4629_v52 }
 0xf1a   : > { %v4881_v60 = vpop.permute.xlu1 %4880  ;;  %v4547_v45 = vsel %vm1515_vm5, %v4544_v36, %v4546_v63 }
 0xf1b   : > { %v4557_v14 = vpop.permute.xlu0 %4556 }
 0xf1c   : > { %4576 = vrot.lane.b32.xlu1 %v4545_v43, %s8403_s0  ;;  %v4944_v44 = vsel %vm1238_vm1, %v4928_v38, %v4557_v14  ;;  %v4549_v43 = vsel %vm1515_vm5, %v4546_v63, %v4548_v50  ;;  %v4791_v38 = vrot.slane %v7908_v1, 5 }
 0xf1d   : > { %4898 = vrot.lane.b32.xlu0 %v4867_v39, %s8398_s11 }
 0xf1e   : > { %v4478_v57 = vpop.permute.xlu1 %4477 }
 0xf1f   : > { %v4638_v2 = vpop.permute.xlu0 %4637  ;;  %v4929_v11 = vsel %vm1965_vm13, %v7754_v61, %v4478_v57  ;;  %v4710_v57 = vrot.slane %v7908_v1, 4 }
 0xf20   : > { %4657 = vrot.lane.b32.xlu1 %v4626_v6, %s8400_s26  ;;  %v4960_v62 = vsel %vm3591_vm12, %v4944_v44, %v4638_v2  ;;  %v4469_v44 = vrot.slane %v7929_v25, 1 }
 0xf21   : > { %4738 = vrot.lane.b32.xlu0 %v4707_v58, %s8402_s20 }
 0xf22   : > { %v4559_v47 = vpop.permute.xlu1 %4558  ;;  %v4470_v63 = vsel %vm1508_vm4, %v4467_v16, %v4469_v44  ;;  %v4471_v16 = vrot.slane %v7934_v28, 1 }
 0xf23   : > { %v4719_v33 = vpop.permute.xlu0 %4718  ;;  %v4945_v29 = vsel %vm1238_vm1, %v4929_v11, %v4559_v47 }
 0xf24   : > { %v4976_v59 = vsel %vm1326_vm2, %v4960_v62, %v4719_v33  ;;  %4819 = vrot.lane.b32.xlu1 %v4788_v56, %s8401_s16 }
 0xf25   : > { %v4993_v17 = vsel %vm4992_vm14, %v4976_v59, %v4800_v0  ;;  %4497 = vrot.lane.b32.xlu0 %v4466_v41, %s8399_s1  ;;  %v4792_v59 = vsel %vm1503_vm3, %v4789_v48, %v4791_v38  ;;  %v4872_v41 = vrot.slane %v7908_v1, 6 }
 0xf26   : > { %v4640_v26 = vpop.permute.xlu1 %4639  ;;  %v5009_v5 = vsel %vm2248_vm10, %v4993_v17, %v4881_v60  ;;  %v4550_v17 = vrot.slane %v7929_v25, 2 }
 0xf27   : > { %6070 = vmatprep.mubr.msk.f32.mxu0 %vm5031_vm15, %v5009_v5  ;;  %v4721_v23 = vpop.permute.xlu0 %4720  ;;  %v4961_v20 = vsel %vm3591_vm12, %v4945_v29, %v4640_v26 }
 0xf28   : > { %4900 = vrot.lane.b32.xlu1 %v4869_v21, %s8398_s11  ;;  %v4977_v61 = vsel %vm1326_vm2, %v4961_v20, %v4721_v23  ;;  %v4873_v23 = vsel %vm1540_vm6, %v4870_v19, %v4872_v41  ;;  %v4631_v21 = vrot.slane %v7929_v25, 3  ;;  %v4551_v42 = vsel %vm1515_vm5, %v4548_v50, %v4550_v17 }
 0xf29   : > { %4578 = vrot.lane.b32.xlu0 %v4547_v45, %s8403_s0  ;;  %v4712_v45 = vrot.slane %v7929_v25, 4  ;;  %v4793_v50 = vrot.slane %v7929_v25, 5 }
 0xf2a   : > { %v4480_v40 = vpop.permute.xlu1 %4479 }
 0xf2b   : > { %v4802_v46 = vpop.permute.xlu0 %4801  ;;  %v4930_v39 = vsel %vm1965_vm13, %v7785_v53, %v4480_v40  ;;  %v4711_v53 = vsel %vm1529_vm8, %v4708_v30, %v4710_v57  ;;  %v8127_v30 = vsel %vm1503_vm3, %v4419_v9, 0.0  ;;  %v4713_v34 = vsel %vm1529_vm8, %v4710_v57, %v4712_v45 }
 0xf2c   : > { %4659 = vrot.lane.b32.xlu1 %v4628_v32, %s8400_s26  ;;  %v4994_v3 = vsel %vm4992_vm14, %v4977_v61, %v4802_v46  ;;  %v4632_v32 = vsel %vm1522_vm7, %v4629_v52, %v4631_v21  ;;  %v4554_v52 = vrot.slane %v8127_v30, 2 }
 0xf2d   : > { %4740 = vrot.lane.b32.xlu0 %v4709_v35, %s8402_s20 }
 0xf2e   : > { %v4561_v24 = vpop.permute.xlu1 %4560 }
 0xf2f   : > { %v4883_v0 = vpop.permute.xlu0 %4882  ;;  %v4946_v2 = vsel %vm1238_vm1, %v4930_v39, %v4561_v24  ;;  %v4472_v24 = vsel %vm1508_vm4, %v4469_v44, %v4471_v16 }
 0xf30   : > { %v5010_v36 = vsel %vm2248_vm10, %v4994_v3, %v4883_v0  ;;  %4499 = vrot.lane.b32.xlu1 %v4468_v22, %s8399_s1  ;;  %v4552_v3 = vrot.slane %v7934_v28, 2 }
 0xf31   : > { %4821 = vrot.lane.b32.xlu0 %v4790_v55, %s8401_s16  ;;  %6071 = vmatmul.mubr.msk.f32.vlgmr.msra.gmra.mrb[36].mxu0 %vm5031_vm15, %v5010_v36 }
 0xf32   : > { %v4642_v60 = vpop.permute.xlu1 %4641  ;;  %v4553_v19 = vsel %vm1515_vm5, %v4550_v17, %v4552_v3 }
 0xf33   : > { %v4723_v14 = vpop.permute.xlu0 %4722  ;;  %v4962_v6 = vsel %vm3591_vm12, %v4946_v2, %v4642_v60  ;;  %v4633_v60 = vrot.slane %v7934_v28, 3 }
 0xf34   : > { %4580 = vrot.lane.b32.xlu1 %v4549_v43, %s8403_s0  ;;  %v4978_v47 = vsel %vm1326_vm2, %v4962_v6, %v4723_v14  ;;  %v4794_v43 = vsel %vm1503_vm3, %v4791_v38, %v4793_v50 }
 0xf35   : > { %4902 = vrot.lane.b32.xlu0 %v4871_v37, %s8398_s11  ;;  %v4634_v6 = vsel %vm1522_vm7, %v4631_v21, %v4633_v60 }
 0xf36   : > { %v4804_v4 = vpop.permute.xlu1 %4803 }
 0xf37   : > { %v4482_v58 = vpop.permute.xlu0 %4481  ;;  %v4995_v62 = vsel %vm4992_vm14, %v4978_v47, %v4804_v4  ;;  %v4635_v4 = vrot.slane %v8127_v30, 3 }
 0xf38   : > { %4661 = vrot.lane.b32.xlu1 %v4630_v27, %s8400_s26  ;;  %v4931_v11 = vsel %vm1965_vm13, %v7788_v13, %v4482_v58  ;;  %v4473_v13 = vrot.slane %v8127_v30, 1  ;;  %v4874_v58 = vrot.slane %v7929_v25, 6 }
 0xf39   : > { %4742 = vrot.lane.b32.xlu0 %v4711_v53, %s8402_s20 }
 0xf3a   : > { %v4885_v33 = vpop.permute.xlu1 %4884  ;;  %v4474_v22 = vsel %vm1508_vm4, %v4471_v16, %v4473_v13 }
 0xf3b   : > { %v5011_v56 = vsel %vm2248_vm10, %v4995_v62, %v4885_v33  ;;  %v4563_v15 = vpop.permute.xlu0 %4562  ;;  %v4636_v62 = vsel %vm1522_vm7, %v4633_v60, %v4635_v4  ;;  %v4714_v33 = vrot.slane %v7934_v28, 4 }
 0xf3c   : > { %4823 = vrot.lane.b32.xlu1 %v4792_v59, %s8401_s16  ;;  %6073 = vmatprep.mubr.msk.f32.mxu0 %vm5031_vm15, %v5011_v56  ;;  %v4947_v29 = vsel %vm1238_vm1, %v4931_v11, %v4563_v15  ;;  %v4716_v56 = vrot.slane %v8127_v30, 4  ;;  %v4875_v15 = vsel %vm1540_vm6, %v4872_v41, %v4874_v58 }
 0xf3d   : > { %4501 = vrot.lane.b32.xlu0 %v4470_v63, %s8399_s1 }
 0xf3e   : > { %v4644_v26 = vpop.permute.xlu1 %4643  ;;  %v4717_v17 = vsel %vm1529_vm8, %v4714_v33, %v4716_v56 }
 0xf3f   : > { %v4725_v5 = vpop.permute.xlu0 %4724  ;;  %v4963_v20 = vsel %vm3591_vm12, %v4947_v29, %v4644_v26  ;;  %v4795_v26 = vrot.slane %v7934_v28, 5 }
 0xf40   : > { %4904 = vrot.lane.b32.xlu1 %v4873_v23, %s8398_s11  ;;  %v4979_v9 = vsel %vm1326_vm2, %v4963_v20, %v4725_v5  ;;  %v4797_v5 = vrot.slane %v8127_v30, 5  ;;  %v4715_v23 = vsel %vm1529_vm8, %v4712_v45, %v4714_v33  ;;  %v4876_v20 = vrot.slane %v7934_v28, 6 }
 0xf41   : > { %4582 = vrot.lane.b32.xlu0 %v4551_v42, %s8403_s0  ;;  %v4796_v45 = vsel %vm1503_vm3, %v4793_v50, %v4795_v26 }
 0xf42   : > { %v4484_v40 = vpop.permute.xlu1 %4483 }
 0xf43   : > { %v4806_v46 = vpop.permute.xlu0 %4805  ;;  %v4932_v14 = vsel %vm1965_vm13, %v7809_v12, %v4484_v40  ;;  %v4555_v12 = vsel %vm1515_vm5, %v4552_v3, %v4554_v52  ;;  %v4798_v40 = vsel %vm1503_vm3, %v4795_v26, %v4797_v5 }
 0xf44   : > { %4663 = vrot.lane.b32.xlu1 %v4632_v32, %s8400_s26  ;;  %v4996_v48 = vsel %vm4992_vm14, %v4979_v9, %v4806_v46  ;;  %v4878_v46 = vrot.slane %v8127_v30, 6  ;;  %v4877_v30 = vsel %vm1540_vm6, %v4874_v58, %v4876_v20 }
 0xf45   : > { %4744 = vrot.lane.b32.xlu0 %v4713_v34, %s8402_s20 }
 0xf46   : > { %v4565_v35 = vpop.permute.xlu1 %4564  ;;  %v4879_v13 = vsel %vm1540_vm6, %v4876_v20, %v4878_v46 }
 0xf47   : > { %v4887_v61 = vpop.permute.xlu0 %4886  ;;  %v4948_v39 = vsel %vm1238_vm1, %v4932_v14, %v4565_v35 }
 0xf48   : > { %v5012_v0 = vsel %vm2248_vm10, %v4996_v48, %v4887_v61  ;;  %4503 = vrot.lane.b32.xlu1 %v4472_v24, %s8399_s1 }
 0xf49   : > { %4505 = vrot.lane.b32.xlu0 %v4474_v22, %s8399_s1  ;;  %6074 = vmatmul.mubr.msk.f32.gmra.mrb[38].mxu0 %vm5031_vm15, %v5012_v0 }
 0xf4a   : > { %v4646_v36 = vpop.permute.xlu1 %4645 }
 0xf4b   : > { %v4727_v55 = vpop.permute.xlu0 %4726  ;;  %v4964_v37 = vsel %vm3591_vm12, %v4948_v39, %v4646_v36 }
 0xf4c   : > { %4584 = vrot.lane.b32.xlu1 %v4553_v19, %s8403_s0  ;;  %v4980_v27 = vsel %vm1326_vm2, %v4964_v37, %v4727_v55 }
 0xf4d   : > { %4825 = vrot.lane.b32.xlu0 %v4794_v43, %s8401_s16 }
 0xf4e   : > { %v4808_v57 = vpop.permute.xlu1 %4807 }
 0xf4f   : > { %v4486_v2 = vpop.permute.xlu0 %4485  ;;  %v4997_v38 = vsel %vm4992_vm14, %v4980_v27, %v4808_v57 }
 0xf50   : > { %4665 = vrot.lane.b32.xlu1 %v4634_v6, %s8400_s26  ;;  %v4933_v41 = vsel %vm1965_vm13, %v7812_v7, %v4486_v2 }
 0xf51   : > { %4586 = vrot.lane.b32.xlu0 %v4555_v12, %s8403_s0 }
 0xf52   : > { %v4889_v53 = vpop.permute.xlu1 %4888 }
 0xf53   : > { %v5013_v44 = vsel %vm2248_vm10, %v4997_v38, %v4889_v53  ;;  %v4567_v47 = vpop.permute.xlu0 %4566 }
 0xf54   : > { %4667 = vrot.lane.b32.xlu1 %v4636_v62, %s8400_s26  ;;  %6076 = vmatprep.mubr.msk.f32.mxu0 %vm5031_vm15, %v5013_v44  ;;  %v4949_v21 = vsel %vm1238_vm1, %v4933_v41, %v4567_v47 }
 0xf55   : > { %4906 = vrot.lane.b32.xlu0 %v4875_v15, %s8398_s11 }
 0xf56   : > { %v4648_v59 = vpop.permute.xlu1 %4647 }
 0xf57   : > { %v4729_v63 = vpop.permute.xlu0 %4728  ;;  %v4965_v11 = vsel %vm3591_vm12, %v4949_v21, %v4648_v59 }
 0xf58   : > { %4748 = vrot.lane.b32.xlu1 %v4717_v17, %s8402_s20  ;;  %v4981_v7 = vsel %vm1326_vm2, %v4965_v11, %v4729_v63 }
 0xf59   : > { %4746 = vrot.lane.b32.xlu0 %v4715_v23, %s8402_s20 }
 0xf5a   : > { %v4488_v42 = vpop.permute.xlu1 %4487 }
 0xf5b   : > { %v4810_v29 = vpop.permute.xlu0 %4809  ;;  %v4934_v61 = vsel %vm1965_vm13, %v7831_v51, %v4488_v42 }
 0xf5c   : > { %4829 = vrot.lane.b32.xlu1 %v4798_v40, %s8401_s16  ;;  %v4998_v16 = vsel %vm4992_vm14, %v4981_v7, %v4810_v29 }
 0xf5d   : > { %4827 = vrot.lane.b32.xlu0 %v4796_v45, %s8401_s16  ;;  %s8404_s16 = sshll.u32 %s8406_s10, 7 }
 0xf5e   : > { %v4569_v32 = vpop.permute.xlu1 %4568  ;;  %s8293_s20 = scalar_lea.vmem %s6642_s4, %s8404_s16 }
 0xf5f   : > { %v4891_v34 = vpop.permute.xlu0 %4890  ;;  %v4950_v24 = vsel %vm1238_vm1, %v4934_v61, %v4569_v32 }
 0xf60   : > { %v5014_v9 = vsel %vm2248_vm10, %v4998_v16, %v4891_v34  ;;  %4910 = vrot.lane.b32.xlu1 %v4879_v13, %s8398_s11 }
 0xf61   : > { %4908 = vrot.lane.b32.xlu0 %v4877_v30, %s8398_s11  ;;  %6077 = vmatmul.mubr.msk.f32.gmra.mrb[40].mxu0 %vm5031_vm15, %v5014_v9 }
 0xf62   : > { %v4650_v35 = vpop.permute.xlu1 %4649 }
 0xf63   : > { %v4731_v48 = vpop.permute.xlu0 %4730  ;;  %v4966_v3 = vsel %vm3591_vm12, %v4950_v24, %v4650_v35 }
 0xf64   : > { %v4982_v50 = vsel %vm1326_vm2, %v4966_v3, %v4731_v48 }
 0xf66   : > { %v4812_v0 = vpop.permute.xlu1 %4811 }
 0xf67   : > { %v4490_v22 = vpop.permute.xlu0 %4489  ;;  %v4999_v36 = vsel %vm4992_vm14, %v4982_v50, %v4812_v0 }
 0xf68   : > { %v4935_v51 = vsel %vm1965_vm13, %v7834_v49, %v4490_v22 }
 0xf6a   : > { %v4893_v55 = vpop.permute.xlu1 %4892 }
 0xf6b   : > { %v5015_v19 = vsel %vm2248_vm10, %v4999_v36, %v4893_v55  ;;  %v4571_v60 = vpop.permute.xlu0 %4570 }
 0xf6c   : > { %6079 = vmatprep.mubr.msk.f32.mxu0 %vm5031_vm15, %v5015_v19  ;;  %v4951_v52 = vsel %vm1238_vm1, %v4935_v51, %v4571_v60 }
 0xf6e   : > { %v4652_v14 = vpop.permute.xlu1 %4651 }
 0xf6f   : > { %v4733_v43 = vpop.permute.xlu0 %4732  ;;  %v4967_v37 = vsel %vm3591_vm12, %v4951_v52, %v4652_v14 }
 0xf70   : > { %v4983_v2 = vsel %vm1326_vm2, %v4967_v37, %v4733_v43 }
 0xf72   : > { %v4492_v39 = vpop.permute.xlu1 %4491 }
 0xf73   : > { %v4814_v57 = vpop.permute.xlu0 %4813  ;;  %v4936_v49 = vsel %vm1965_vm13, %v7859_v31, %v4492_v39 }
 0xf74   : > { %v5000_v4 = vsel %vm4992_vm14, %v4983_v2, %v4814_v57 }
 0xf76   : > { %v4573_v6 = vpop.permute.xlu1 %4572 }
 0xf77   : > { %v4895_v12 = vpop.permute.xlu0 %4894  ;;  %v4952_v53 = vsel %vm1238_vm1, %v4936_v49, %v4573_v6 }
 0xf78   : > { %v5016_v58 = vsel %vm2248_vm10, %v5000_v4, %v4895_v12 }
 0xf79   : > { %6080 = vmatmul.mubr.msk.f32.gmra.mrb[42].mxu0 %vm5031_vm15, %v5016_v58 }
 0xf7a   : > { %v4654_v27 = vpop.permute.xlu1 %4653 }
 0xf7b   : > { %v4735_v38 = vpop.permute.xlu0 %4734  ;;  %v4968_v44 = vsel %vm3591_vm12, %v4952_v53, %v4654_v27 }
 0xf7c   : > { %v4984_v33 = vsel %vm1326_vm2, %v4968_v44, %v4735_v38 }
 0xf7e   : > { %v4816_v47 = vpop.permute.xlu1 %4815 }
 0xf7f   : > { %v4494_v62 = vpop.permute.xlu0 %4493  ;;  %v5001_v56 = vsel %vm4992_vm14, %v4984_v33, %v4816_v47 }
 0xf80   : > { %v4937_v31 = vsel %vm1965_vm13, %v7862_v10, %v4494_v62 }
 0xf82   : > { %v4897_v15 = vpop.permute.xlu1 %4896 }
 0xf83   : > { %v5017_v59 = vsel %vm2248_vm10, %v5001_v56, %v4897_v15  ;;  %v4575_v63 = vpop.permute.xlu0 %4574 }
 0xf84   : > { %6082 = vmatprep.mubr.msk.f32.mxu0 %vm5031_vm15, %v5017_v59  ;;  %v4953_v5 = vsel %vm1238_vm1, %v4937_v31, %v4575_v63 }
 0xf86   : > { %v4656_v17 = vpop.permute.xlu1 %4655 }
 0xf87   : > { %v4737_v26 = vpop.permute.xlu0 %4736  ;;  %v4969_v41 = vsel %vm3591_vm12, %v4953_v5, %v4656_v17 }
 0xf88   : > { %v4985_v42 = vsel %vm1326_vm2, %v4969_v41, %v4737_v26 }
 0xf8a   : > { %v4496_v23 = vpop.permute.xlu1 %4495 }
 0xf8b   : > { %v4818_v21 = vpop.permute.xlu0 %4817  ;;  %v4938_v10 = vsel %vm1965_vm13, %v7881_v18, %v4496_v23 }
 0xf8c   : > { %v5002_v29 = vsel %vm4992_vm14, %v4985_v42, %v4818_v21 }
 0xf8e   : > { %v4577_v11 = vpop.permute.xlu1 %4576 }
 0xf8f   : > { %v4899_v40 = vpop.permute.xlu0 %4898  ;;  %v4954_v7 = vsel %vm1238_vm1, %v4938_v10, %v4577_v11 }
 0xf90   : > { %v5018_v20 = vsel %vm2248_vm10, %v5002_v29, %v4899_v40 }
 0xf91   : > { %6083 = vmatmul.mubr.msk.f32.gmra.mrb[44].mxu0 %vm5031_vm15, %v5018_v20 }
 0xf92   : > { %v4658_v46 = vpop.permute.xlu1 %4657 }
 0xf93   : > { %v4739_v45 = vpop.permute.xlu0 %4738  ;;  %v4970_v32 = vsel %vm3591_vm12, %v4954_v7, %v4658_v46 }
 0xf94   : > { %v4986_v13 = vsel %vm1326_vm2, %v4970_v32, %v4739_v45 }
 0xf96   : > { %v4820_v16 = vpop.permute.xlu1 %4819 }
 0xf97   : > { %v4498_v34 = vpop.permute.xlu0 %4497  ;;  %v5003_v9 = vsel %vm4992_vm14, %v4986_v13, %v4820_v16 }
 0xf98   : > { %v4939_v18 = vsel %vm1965_vm13, %v7884_v8, %v4498_v34  ;;  %v8286_v34 = vld [vmem:[#allocation2] ss:$0 sm:$0xff] }
 0xf9a   : > { %v4901_v30 = vpop.permute.xlu1 %4900 }
 0xf9b   : > { %v5019_v35 = vsel %vm2248_vm10, %v5003_v9, %v4901_v30  ;;  %v4579_v48 = vpop.permute.xlu0 %4578 }
 0xf9c   : > { %6085 = vmatprep.mubr.msk.f32.mxu0 %vm5031_vm15, %v5019_v35  ;;  %v4955_v3 = vsel %vm1238_vm1, %v4939_v18, %v4579_v48 }
 0xf9e   : > { %v4660_v61 = vpop.permute.xlu1 %4659 }
 0xf9f   : > { %v4741_v24 = vpop.permute.xlu0 %4740  ;;  %v4971_v22 = vsel %vm3591_vm12, %v4955_v3, %v4660_v61 }
 0xfa0   : > { %v4987_v36 = vsel %vm1326_vm2, %v4971_v22, %v4741_v24 }
 0xfa2   : > { %v4500_v0 = vpop.permute.xlu1 %4499 }
 0xfa3   : > { %v4822_v50 = vpop.permute.xlu0 %4821  ;;  %v4940_v8 = vsel %vm1965_vm13, %v7905_v54, %v4500_v0 }
 0xfa4   : > { %v5004_v19 = vsel %vm4992_vm14, %v4987_v36, %v4822_v50 }
 0xfa6   : > { %v4581_v55 = vpop.permute.xlu1 %4580 }
 0xfa7   : > { %v4903_v60 = vpop.permute.xlu0 %4902  ;;  %v4956_v52 = vsel %vm1238_vm1, %v4940_v8, %v4581_v55 }
 0xfa8   : > { %v5020_v14 = vsel %vm2248_vm10, %v5004_v19, %v4903_v60 }
 0xfa9   : > { %6086 = vmatmul.mubr.msk.f32.gmra.mrb[46].mxu0 %vm5031_vm15, %v5020_v14 }
 0xfaa   : > { %v4662_v43 = vpop.permute.xlu1 %4661 }
 0xfab   : > { %v4743_v51 = vpop.permute.xlu0 %4742  ;;  %v4972_v39 = vsel %vm3591_vm12, %v4956_v52, %v4662_v43 }
 0xfac   : > { %v4988_v2 = vsel %vm1326_vm2, %v4972_v39, %v4743_v51 }
 0xfae   : > { %v4824_v37 = vpop.permute.xlu1 %4823 }
 0xfaf   : > { %v4502_v57 = vpop.permute.xlu0 %4501  ;;  %v5005_v6 = vsel %vm4992_vm14, %v4988_v2, %v4824_v37 }
 0xfb0   : > { %v4941_v47 = vsel %vm1965_vm13, %v7908_v1, %v4502_v57 }
 0xfb2   : > { %v4905_v4 = vpop.permute.xlu1 %4904 }
 0xfb3   : > { %v5021_v12 = vsel %vm2248_vm10, %v5005_v6, %v4905_v4  ;;  %v4583_v58 = vpop.permute.xlu0 %4582 }
 0xfb4   : > { %6088 = vmatprep.mubr.msk.f32.mxu0 %vm5031_vm15, %v5021_v12  ;;  %v4957_v62 = vsel %vm1238_vm1, %v4941_v47, %v4583_v58 }
 0xfb6   : > { %v4664_v27 = vpop.permute.xlu1 %4663 }
 0xfb7   : > { %v4745_v38 = vpop.permute.xlu0 %4744  ;;  %v4973_v56 = vsel %vm3591_vm12, %v4957_v62, %v4664_v27 }
 0xfb8   : > { %v4989_v59 = vsel %vm1326_vm2, %v4973_v56, %v4745_v38 }
 0xfba   : > { %v4504_v49 = vpop.permute.xlu1 %4503 }
 0xfbb   : > { %v4506_v54 = vpop.permute.xlu0 %4505  ;;  %v4942_v21 = vsel %vm1965_vm13, %v7929_v25, %v4504_v49 }
 0xfbc   : > { %v4943_v1 = vsel %vm1965_vm13, %v7934_v28, %v4506_v54 }
 0xfbe   : > { %v4585_v53 = vpop.permute.xlu1 %4584 }
 0xfbf   : > { %v4826_v44 = vpop.permute.xlu0 %4825  ;;  %v4958_v29 = vsel %vm1238_vm1, %v4942_v21, %v4585_v53 }
 0xfc0   : > { %v5006_v17 = vsel %vm4992_vm14, %v4989_v59, %v4826_v44 }
 0xfc2   : > { %v4666_v33 = vpop.permute.xlu1 %4665 }
 0xfc3   : > { %v4587_v15 = vpop.permute.xlu0 %4586  ;;  %v4974_v20 = vsel %vm3591_vm12, %v4958_v29, %v4666_v33 }
 0xfc4   : > { %v4959_v42 = vsel %vm1238_vm1, %v4943_v1, %v4587_v15  ;;  %vm5241_vm1 = vcmask 7168  }
 0xfc6   : > { %v4668_v63 = vpop.permute.xlu1 %4667 }
 0xfc7   : > { %v4907_v26 = vpop.permute.xlu0 %4906  ;;  %v4975_v40 = vsel %vm3591_vm12, %v4959_v42, %v4668_v63 }
 0xfc8   : > { %v5022_v31 = vsel %vm2248_vm10, %v5006_v17, %v4907_v26 }
 0xfc9   : > { %6089 = vmatmul.mubr.msk.f32.gmra.mrb[48].mxu0 %vm5031_vm15, %v5022_v31 }
 0xfca   : > { %v4749_v5 = vpop.permute.xlu1 %4748 }
 0xfcb   : > { %v4747_v23 = vpop.permute.xlu0 %4746  ;;  %v4991_v46 = vsel %vm1326_vm2, %v4975_v40, %v4749_v5 }
 0xfcc   : > { %v4990_v45 = vsel %vm1326_vm2, %v4974_v20, %v4747_v23 }
 0xfce   : > { %v4830_v41 = vpop.permute.xlu1 %4829 }
 0xfcf   : > { %v4828_v11 = vpop.permute.xlu0 %4827  ;;  %v5008_v28 = vsel %vm4992_vm14, %v4991_v46, %v4830_v41 }
 0xfd0   : > { %v5007_v25 = vsel %vm4992_vm14, %v4990_v45, %v4828_v11 }
 0xfd2   : > { %v4911_v10 = vpop.permute.xlu1 %4910 }
 0xfd3   : > { %v5024_v7 = vsel %vm2248_vm10, %v5008_v28, %v4911_v10  ;;  %v4909_v32 = vpop.permute.xlu0 %4908 }
 0xfd4   : > { %v5023_v16 = vsel %vm2248_vm10, %v5007_v25, %v4909_v32 }
 0xfd5   : > { %6091 = vmatprep.mubr.msk.f32.mxu0 %vm5031_vm15, %v5023_v16 }
 0xfd6   : > { %6092 = vmatmul.mubr.msk.f32.gmra.mrb[50].mxu0 %vm5031_vm15, %v5024_v7 }
0x1004   : > { %v6072_v13 = vpop.f32.mrb[36].mxu0 }
0x1005   : > { %v5152_v9 = vadd.f32 %v6072_v13, %v8286_v34  ;;  %v5146_v30 = vpop.f32.mrb[37].mxu0 }
0x1006   : > { %v5147_v35 = vadd.f32 %v8286_v34, %v5146_v30 }
0x1007   : > { %6386 = vtanh.f32 %v5152_v9 }
0x1008   : > { %6388 = vtanh.f32 %v5147_v35 }
0x1011   : > { %v6387_v48 = vpop.eup %6386 }
0x1012   : > { %v6389_v61 = vpop.eup %6388  ;;  %5243 = vst.msk [vmem:[%s8293_s20 + $0x8] sm:$0xff] %vm5241_vm1, %v6387_v48 }
0x1013   : > { %5242 = vst.msk [vmem:[%s8293_s20] sm:$0xff] %vm5241_vm1, %v6389_v61 }
0x101c   : > { %v6075_v24 = vpop.f32.mrb[38].mxu0 }
0x101d   : > { %v5162_v18 = vadd.f32 %v6075_v24, %v8286_v34  ;;  %v5156_v3 = vpop.f32.mrb[39].mxu0 }
0x101e   : > { %v5157_v0 = vadd.f32 %v8286_v34, %v5156_v3 }
0x101f   : > { %6390 = vtanh.f32 %v5162_v18 }
0x1020   : > { %6392 = vtanh.f32 %v5157_v0 }
0x1029   : > { %v6391_v22 = vpop.eup %6390 }
0x102a   : > { %v6393_v50 = vpop.eup %6392  ;;  %5245 = vst.msk [vmem:[%s8293_s20 + $0x18] sm:$0xff] %vm5241_vm1, %v6391_v22 }
0x102b   : > { %5244 = vst.msk [vmem:[%s8293_s20 + $0x10] sm:$0xff] %vm5241_vm1, %v6393_v50 }
0x1034   : > { %v6078_v36 = vpop.f32.mrb[40].mxu0 }
0x1035   : > { %v5172_v55 = vadd.f32 %v6078_v36, %v8286_v34  ;;  %v5166_v19 = vpop.f32.mrb[41].mxu0 }
0x1036   : > { %v5167_v60 = vadd.f32 %v8286_v34, %v5166_v19 }
0x1037   : > { %6394 = vtanh.f32 %v5172_v55 }
0x1038   : > { %6396 = vtanh.f32 %v5167_v60 }
0x1041   : > { %v6395_v14 = vpop.eup %6394 }
0x1042   : > { %v6397_v43 = vpop.eup %6396  ;;  %5247 = vst.msk [vmem:[%s8293_s20 + $0x28] sm:$0xff] %vm5241_vm1, %v6395_v14 }
0x1043   : > { %5246 = vst.msk [vmem:[%s8293_s20 + $0x20] sm:$0xff] %vm5241_vm1, %v6397_v43 }
0x104c   : > { %v6081_v51 = vpop.f32.mrb[42].mxu0 }
0x104d   : > { %v5182_v8 = vadd.f32 %v6081_v51, %v8286_v34  ;;  %v5176_v52 = vpop.f32.mrb[43].mxu0 }
0x104e   : > { %v5177_v39 = vadd.f32 %v8286_v34, %v5176_v52 }
0x104f   : > { %6398 = vtanh.f32 %v5182_v8 }
0x1050   : > { %6400 = vtanh.f32 %v5177_v39 }
0x1059   : > { %v6399_v37 = vpop.eup %6398 }
0x105a   : > { %v6401_v57 = vpop.eup %6400  ;;  %5249 = vst.msk [vmem:[%s8293_s20 + $0x38] sm:$0xff] %vm5241_vm1, %v6399_v37 }
0x105b   : > { %5248 = vst.msk [vmem:[%s8293_s20 + $0x30] sm:$0xff] %vm5241_vm1, %v6401_v57 }
0x1064   : > { %v6084_v2 = vpop.f32.mrb[44].mxu0 }
0x1065   : > { %v5192_v6 = vadd.f32 %v6084_v2, %v8286_v34  ;;  %v5186_v4 = vpop.f32.mrb[45].mxu0 }
0x1066   : > { %v5187_v12 = vadd.f32 %v8286_v34, %v5186_v4 }
0x1067   : > { %6402 = vtanh.f32 %v5192_v6 }
0x1068   : > { %6404 = vtanh.f32 %v5187_v12 }
0x1071   : > { %v6403_v58 = vpop.eup %6402 }
0x1072   : > { %v6405_v27 = vpop.eup %6404  ;;  %5251 = vst.msk [vmem:[%s8293_s20 + $0x48] sm:$0xff] %vm5241_vm1, %v6403_v58 }
0x1073   : > { %5250 = vst.msk [vmem:[%s8293_s20 + $0x40] sm:$0xff] %vm5241_vm1, %v6405_v27 }
0x107c   : > { %v6087_v38 = vpop.f32.mrb[46].mxu0 }
0x107d   : > { %v5202_v49 = vadd.f32 %v6087_v38, %v8286_v34  ;;  %v5196_v54 = vpop.f32.mrb[47].mxu0 }
0x107e   : > { %v5197_v53 = vadd.f32 %v8286_v34, %v5196_v54 }
0x107f   : > { %6406 = vtanh.f32 %v5202_v49 }
0x1080   : > { %6408 = vtanh.f32 %v5197_v53 }
0x1089   : > { %v6407_v44 = vpop.eup %6406 }
0x108a   : > { %v6409_v47 = vpop.eup %6408  ;;  %5253 = vst.msk [vmem:[%s8293_s20 + $0x58] sm:$0xff] %vm5241_vm1, %v6407_v44 }
0x108b   : > { %5252 = vst.msk [vmem:[%s8293_s20 + $0x50] sm:$0xff] %vm5241_vm1, %v6409_v47 }
0x109c   : > { %v6090_v62 = vpop.f32.mrb[48].mxu0 }
0x109d   : > { %v5212_v33 = vadd.f32 %v6090_v62, %v8286_v34  ;;  %v5206_v56 = vpop.f32.mrb[49].mxu0 }
0x109e   : > { %v5207_v15 = vadd.f32 %v8286_v34, %v5206_v56 }
0x109f   : > { %6410 = vtanh.f32 %v5212_v33 }
0x10a0   : > { %6412 = vtanh.f32 %v5207_v15 }
0x10a9   : > { %v6411_v59 = vpop.eup %6410  ;;  %v6093_v63 = vpop.f32.mrb[50].mxu0 }
0x10aa   : > { %v6413_v17 = vpop.eup %6412  ;;  %5255 = vst.msk [vmem:[%s8293_s20 + $0x68] sm:$0xff] %vm5241_vm1, %v6411_v59  ;;  %v5222_v26 = vadd.f32 %v6093_v63, %v8286_v34  ;;  %v5216_v31 = vpop.f32.mrb[51].mxu0 }
0x10ab   : > { %5254 = vst.msk [vmem:[%s8293_s20 + $0x60] sm:$0xff] %vm5241_vm1, %v6413_v17  ;;  %v5217_v5 = vadd.f32 %v8286_v34, %v5216_v31 }
0x10ac   : > { %6414 = vtanh.f32 %v5222_v26 }
0x10ad   : > { %6416 = vtanh.f32 %v5217_v5 }
0x10b6   : > { %v6415_v23 = vpop.eup %6414 }
0x10b7   : > { %v6417_v1 = vpop.eup %6416  ;;  %5257 = vst.msk [vmem:[%s8293_s20 + $0x78] sm:$0xff] %vm5241_vm1, %v6415_v23 }
0x10b8   : > { %5256 = vst.msk [vmem:[%s8293_s20 + $0x70] sm:$0xff] %vm5241_vm1, %v6417_v1 }
0x10b9 PF: > { %s79_s7 = sadd.s32 1, %s6424_s7  }
0x10ba   : > { %p76_p4 = scmp.ge.s32.totalorder %s79_s7, 4  }
0x10bc   :  { %78 = sbr.rel (!%p76_p4) target bundleno = 59 (0x3b), region = 227 }

</bundles_post_ra>
